<compile_context>
chip_gen: v6e
topology: v6e:2x2x1
jax: 0.10.0
libtpu: 0.0.40
codegen_flags: <defaults>
</compile_context>

<pallas_src>
import functools

import jax
import jax.numpy as jnp
import numpy as np
from jax.experimental import pallas as pl
from jax.experimental.pallas import tpu as pltpu


def _lstm_baseline_kernel(x_ref, wih0_ref, wihr_ref, whh_ref, b_ref,
                          h0_ref, c0_ref, wfu_ref, bfu_ref, out_ref,
                          *, num_layers, hidden, seq, bchunk):
    """One batch-chunk of sequences, fully in VMEM / vregs.

    x_ref    : (seq, B, Din)        joint features, seq-major
    wih0_ref : (Din, 4H)            layer-0 input weights
    wihr_ref : (L-1, H, 4H)         folded input weights, layers 1..L-1
    whh_ref  : (L, H, 4H)           recurrent weights
    b_ref    : (L, 4H)              folded biases (b_ih + b_hh [+ fusion fold])
    h0_ref   : (L, H), c0_ref: (L, H)  initial hidden / cell states
    wfu_ref  : (H, A_pad)           folded funnel weights (zero-padded lanes)
    bfu_ref  : (1, A_pad)           folded funnel bias (-1e30 on padded lanes)
    out_ref  : (seq, B, A_pad)      row-wise log-softmax (lane-dense, 128 wide)
    """
    H = hidden
    L = num_layers
    B = bchunk

    # Initial states broadcast once (hoisted out of all loops) to (B, H).
    h = [jnp.broadcast_to(h0_ref[l:l + 1, :], (B, H)) for l in range(L)]
    c = [jnp.broadcast_to(c0_ref[l:l + 1, :], (B, H)) for l in range(L)]
    layer_out = [None] * L   # output of layer l at the timestep it last ran

    # Wavefront: at tick tau, layer l processes timestep t = tau - l.  The L
    # active (layer, t) cells in a tick are mutually independent, so their
    # MXU-push / EUP latencies overlap; cross-tick chain length = seq + L - 1.
    for tau in range(seq + L - 1):            # static unroll (seq=8, L=3)
        prev_out = list(layer_out)            # snapshot of last tick's outputs
        for l in range(L):
            t = tau - l
            if not (0 <= t < seq):
                continue
            if l == 0:
                inp = x_ref[t]                # (B, Din)
                wih = wih0_ref[...]
            else:
                inp = prev_out[l - 1]         # (B, H) from previous tick
                wih = wihr_ref[l - 1]
            bias = b_ref[l:l + 1, :]          # (1, 4H)
            g = (jnp.dot(inp, wih, preferred_element_type=jnp.float32)
                 + jnp.dot(h[l], whh_ref[l], preferred_element_type=jnp.float32)
                 + bias)                      # (B, 4H) == (B, 128)
            # Two full-vreg EUP passes; gates are lane slices afterwards.
            sg = jax.nn.sigmoid(g)
            tg = jnp.tanh(g)
            i_g = sg[:, 0 * H:1 * H]
            f_g = sg[:, 1 * H:2 * H]
            g_g = tg[:, 2 * H:3 * H]
            o_g = sg[:, 3 * H:4 * H]
            c[l] = f_g * c[l] + i_g * g_g
            h[l] = o_g * jnp.tanh(c[l])
            layer_out[l] = h[l]

            if l == L - 1:
                # Funnel (last fusion Linear folded in) + log_softmax; off the
                # recurrence chain, overlaps with remaining wavefront work.
                logits = (jnp.dot(h[l], wfu_ref[...],
                                  preferred_element_type=jnp.float32)
                          + bfu_ref[...])                 # (B, A_pad)
                m = jnp.max(logits, axis=1, keepdims=True)
                s = logits - m
                lse = jnp.log(jnp.sum(jnp.exp(s), axis=1, keepdims=True))
                out_ref[t] = s - lse                      # lane-dense store


def _fold_params(params, *, num_layers, hidden, num_actions, a_pad):
    """Host-side algebraic folding of the fusion Linears + lane padding."""
    H = hidden
    wihr = params["wihr_T"]        # (L-1, H, 4H) -- layer l's weight is wihr[l-1]
    wf = params["wf_T"]            # (L, H, H)
    bf = params["bf"]              # (L, H)
    b = params["b"]                # (L, 4H)

    # Fold fusion Linear l into layer (l+1)'s input projection.
    wihr_f = jnp.stack([wf[l] @ wihr[l] for l in range(num_layers - 1)], axis=0)
    b_rows = [b[0]] + [bf[l] @ wihr[l] + b[l + 1] for l in range(num_layers - 1)]
    b_f = jnp.stack(b_rows, axis=0)

    # Fold the last fusion Linear into the funnel Linear; pad actions to a_pad
    # lanes (zero weight columns, -1e30 bias so padded logits vanish).
    wfu_f = wf[num_layers - 1] @ params["wfu_T"]                        # (H, A)
    bfu_f = bf[num_layers - 1] @ params["wfu_T"] + params["bfu"][0]     # (A,)
    wfu_fp = jnp.zeros((H, a_pad), jnp.float32).at[:, :num_actions].set(wfu_f)
    bfu_fp = jnp.full((1, a_pad), -1e30, jnp.float32).at[0, :num_actions].set(bfu_f)

    return (params["wih0_T"], wihr_f, params["whh_T"], b_f,
            params["h0"], params["c0"], wfu_fp, bfu_fp)


def lstm_baseline_forward(x3d, params, *, num_layers, hidden, num_actions):
    """x3d: (B, seq_len, num_joints*3) float32 (unit LSTM batch already squeezed)."""
    B, seq, din = x3d.shape
    H = hidden
    a_pad = ((num_actions + 127) // 128) * 128      # lane-dense output width

    # Batch chunking: all sequences share one kernel invocation (sublane batch)
    # up to 8 per chunk; the chunk axis is a "parallel" grid dim for larger B.
    bchunk = B if B <= 8 else 8
    b_pad = ((B + bchunk - 1) // bchunk) * bchunk
    num_chunks = b_pad // bchunk

    x_sm = jnp.transpose(x3d, (1, 0, 2))            # (seq, B, Din), seq-major
    if b_pad != B:
        x_sm = jnp.pad(x_sm, ((0, 0), (0, b_pad - B), (0, 0)))

    (wih0, wihr_f, whh, b_f, h0, c0, wfu_fp, bfu_fp) = _fold_params(
        params, num_layers=num_layers, hidden=hidden,
        num_actions=num_actions, a_pad=a_pad)

    kernel = functools.partial(_lstm_baseline_kernel,
                               num_layers=num_layers, hidden=hidden,
                               seq=seq, bchunk=bchunk)

    def _whole(arr):
        nd = arr.ndim
        return pl.BlockSpec(arr.shape, lambda i, _nd=nd: (0,) * _nd)

    # Advisory cost hint for XLA scheduling around this small latency-bound call.
    flops = int(b_pad * seq * (2 * din * 4 * H
                               + 2 * (num_layers - 1) * H * 4 * H
                               + 2 * num_layers * H * 4 * H
                               + 2 * H * a_pad))
    transc = int(b_pad * seq * (num_layers * 9 * H + 2 * a_pad))
    nbytes = int(4 * (x_sm.size + wih0.size + wihr_f.size + whh.size + b_f.size
                      + h0.size + c0.size + wfu_fp.size + bfu_fp.size
                      + seq * b_pad * a_pad))

    out_padded = pl.pallas_call(
        kernel,
        out_shape=jax.ShapeDtypeStruct((seq, b_pad, a_pad), jnp.float32),
        grid=(num_chunks,),
        in_specs=[
            pl.BlockSpec((seq, bchunk, din), lambda i: (0, i, 0)),   # per-chunk
            _whole(wih0), _whole(wihr_f), _whole(whh), _whole(b_f),
            _whole(h0), _whole(c0), _whole(wfu_fp), _whole(bfu_fp),
        ],
        out_specs=pl.BlockSpec((seq, bchunk, a_pad), lambda i: (0, i, 0)),
        compiler_params=pltpu.CompilerParams(
            dimension_semantics=("parallel",)),
        cost_estimate=pl.CostEstimate(flops=flops, transcendentals=transc,
                                      bytes_accessed=nbytes),
    )(x_sm, wih0, wihr_f, whh, b_f, h0, c0, wfu_fp, bfu_fp)

    out = jnp.transpose(out_padded, (1, 0, 2))      # (B_pad, seq, A_pad)
    return out[:B, :, :num_actions]


def init_params(key, num_joints, num_actions, num_layers, hidden):
    """Deterministic synthetic parameters with PyTorch-default-like scales."""
    din = num_joints * 3
    H = hidden
    ks = iter(jax.random.split(key, 8 * num_layers + 8))

    def u(shape, kk, scale):
        return jax.random.uniform(kk, shape, jnp.float32, -scale, scale)

    k_lstm = 1.0 / np.sqrt(H)
    wih, whh, bih, bhh, wf, bf = [], [], [], [], [], []
    for layer in range(num_layers):
        in_size = din if layer == 0 else H
        wih.append(u((4 * H, in_size), next(ks), k_lstm))   # weight_ih
        whh.append(u((4 * H, H), next(ks), k_lstm))         # weight_hh
        bih.append(u((4 * H,), next(ks), k_lstm))
        bhh.append(u((4 * H,), next(ks), k_lstm))
        wf.append(u((H, H), next(ks), k_lstm))              # fusion Linear
        bf.append(u((H,), next(ks), k_lstm))
    wfu = u((num_actions, H), next(ks), k_lstm)             # funnel_in Linear
    bfu = u((num_actions,), next(ks), k_lstm)
    h0 = jax.random.normal(next(ks), (num_layers, H), jnp.float32)  # torch.randn
    c0 = jax.random.normal(next(ks), (num_layers, H), jnp.float32)

    return dict(
        wih0_T=wih[0].T,                                     # (Din, 4H)
        wihr_T=jnp.stack([w.T for w in wih[1:]], 0),         # (L-1, H, 4H)
        whh_T=jnp.stack([w.T for w in whh], 0),              # (L, H, 4H)
        b=jnp.stack([a + bb for a, bb in zip(bih, bhh)], 0), # (L, 4H)
        h0=h0, c0=c0,                                        # (L, H)
        wf_T=jnp.stack([w.T for w in wf], 0),                # (L, H, H)
        bf=jnp.stack(bf, 0),                                 # (L, H)
        wfu_T=wfu.T,                                         # (H, A)
        bfu=bfu.reshape(1, -1),                              # (1, A)
    )


def reference_forward(x2d, params, num_layers, hidden):
    """Plain-JAX mirror of the (unfolded) PyTorch forward for verification."""
    H = hidden
    cur = x2d
    for layer in range(num_layers):
        wih = params["wih0_T"] if layer == 0 else params["wihr_T"][layer - 1]
        whh = params["whh_T"][layer]
        b = params["b"][layer]
        h = params["h0"][layer:layer + 1]
        c = params["c0"][layer:layer + 1]
        outs = []
        for t in range(cur.shape[0]):
            g = cur[t:t + 1] @ wih + h @ whh + b
            i_g = jax.nn.sigmoid(g[:, :H])
            f_g = jax.nn.sigmoid(g[:, H:2 * H])
            g_g = jnp.tanh(g[:, 2 * H:3 * H])
            o_g = jax.nn.sigmoid(g[:, 3 * H:])
            c = f_g * c + i_g * g_g
            h = o_g * jnp.tanh(c)
            outs.append(h)
        hseq = jnp.concatenate(outs, 0)
        cur = hseq @ params["wf_T"][layer] + params["bf"][layer]
    logits = cur @ params["wfu_T"] + params["bfu"]
    return jax.nn.log_softmax(logits, axis=1)


if __name__ == "__main__":
    num_joints, num_actions, num_layers, hidden = 4, 8, 3, 32
    seq_len, batch = 8, 2

    key = jax.random.PRNGKey(0)
    kx, kp = jax.random.split(key)

    # A batch of independent sequences, each in nn.LSTM's (seq, batch=1, feat) layout.
    joints_sequences = jax.random.normal(
        kx, (batch, seq_len, 1, num_joints * 3), jnp.float32)
    params = init_params(kp, num_joints, num_actions, num_layers, hidden)

    x3d = joints_sequences[:, :, 0, :]   # squeeze the unit LSTM batch dim (glue)

    out = lstm_baseline_forward(x3d, params, num_layers=num_layers,
                                hidden=hidden, num_actions=num_actions)
    out = jax.block_until_ready(out)

    ref = jnp.stack([reference_forward(x3d[i], params, num_layers, hidden)
                     for i in range(batch)], 0)
    assert out.shape == (batch, seq_len, num_actions)
    np.testing.assert_allclose(np.asarray(out), np.asarray(ref),
                               atol=1e-2, rtol=1e-2)
    # log_softmax rows must exponentiate-sum to 1
    np.testing.assert_allclose(np.exp(np.asarray(out)).sum(axis=-1), 1.0, atol=1e-3)

    print("KERNEL_OK")
</pallas_src>

<mosaic_0001>
module attributes {stable_mosaic.version = 11 : i64} {
  func.func @_lstm_baseline_kernel(%arg0: i32, %arg1: memref<8x2x12xf32, #tpu.memory_space<vmem>>, %arg2: memref<12x128xf32, #tpu.memory_space<vmem>>, %arg3: memref<2x32x128xf32, #tpu.memory_space<vmem>>, %arg4: memref<3x32x128xf32, #tpu.memory_space<vmem>>, %arg5: memref<3x128xf32, #tpu.memory_space<vmem>>, %arg6: memref<3x32xf32, #tpu.memory_space<vmem>>, %arg7: memref<3x32xf32, #tpu.memory_space<vmem>>, %arg8: memref<32x128xf32, #tpu.memory_space<vmem>>, %arg9: memref<1x128xf32, #tpu.memory_space<vmem>>, %arg10: memref<8x2x128xf32, #tpu.memory_space<vmem>>) attributes {dimension_semantics = [#tpu.dimension_semantics<parallel>], iteration_bounds = array<i64: 1>, scalar_prefetch = 0 : i64, scratch_operands = 0 : i64, tpu.core_type = #tpu.core_type<tc>, window_params = [{transform_indices = @transform_0, window_bounds = array<i64: 8, 2, 12>}, {pipeline_mode = #tpu.pipeline_mode<synchronous>, transform_indices = @transform_1, window_bounds = array<i64: 12, 128>}, {pipeline_mode = #tpu.pipeline_mode<synchronous>, transform_indices = @transform_2, window_bounds = array<i64: 2, 32, 128>}, {pipeline_mode = #tpu.pipeline_mode<synchronous>, transform_indices = @transform_3, window_bounds = array<i64: 3, 32, 128>}, {pipeline_mode = #tpu.pipeline_mode<synchronous>, transform_indices = @transform_4, window_bounds = array<i64: 3, 128>}, {pipeline_mode = #tpu.pipeline_mode<synchronous>, transform_indices = @transform_5, window_bounds = array<i64: 3, 32>}, {pipeline_mode = #tpu.pipeline_mode<synchronous>, transform_indices = @transform_6, window_bounds = array<i64: 3, 32>}, {pipeline_mode = #tpu.pipeline_mode<synchronous>, transform_indices = @transform_7, window_bounds = array<i64: 32, 128>}, {pipeline_mode = #tpu.pipeline_mode<synchronous>, transform_indices = @transform_8, window_bounds = array<i64: 1, 128>}, {transform_indices = @transform_9, window_bounds = array<i64: 8, 2, 128>}]} {
    %c0 = arith.constant 0 : index
    %c0_0 = arith.constant 0 : index
    %0 = vector.load %arg6[%c0, %c0_0] : memref<3x32xf32, #tpu.memory_space<vmem>>, vector<1x32xf32>
    %1 = vector.shape_cast %0 : vector<1x32xf32> to vector<1x32xf32>
    %2 = vector.broadcast %1 : vector<1x32xf32> to vector<2x32xf32>
    %c1 = arith.constant 1 : index
    %c0_1 = arith.constant 0 : index
    %3 = vector.load %arg6[%c1, %c0_1] : memref<3x32xf32, #tpu.memory_space<vmem>>, vector<1x32xf32>
    %4 = vector.shape_cast %3 : vector<1x32xf32> to vector<1x32xf32>
    %5 = vector.broadcast %4 : vector<1x32xf32> to vector<2x32xf32>
    %c2 = arith.constant 2 : index
    %c0_2 = arith.constant 0 : index
    %6 = vector.load %arg6[%c2, %c0_2] : memref<3x32xf32, #tpu.memory_space<vmem>>, vector<1x32xf32>
    %7 = vector.shape_cast %6 : vector<1x32xf32> to vector<1x32xf32>
    %8 = vector.broadcast %7 : vector<1x32xf32> to vector<2x32xf32>
    %c0_3 = arith.constant 0 : index
    %c0_4 = arith.constant 0 : index
    %9 = vector.load %arg7[%c0_3, %c0_4] : memref<3x32xf32, #tpu.memory_space<vmem>>, vector<1x32xf32>
    %10 = vector.shape_cast %9 : vector<1x32xf32> to vector<1x32xf32>
    %11 = vector.broadcast %10 : vector<1x32xf32> to vector<2x32xf32>
    %c1_5 = arith.constant 1 : index
    %c0_6 = arith.constant 0 : index
    %12 = vector.load %arg7[%c1_5, %c0_6] : memref<3x32xf32, #tpu.memory_space<vmem>>, vector<1x32xf32>
    %13 = vector.shape_cast %12 : vector<1x32xf32> to vector<1x32xf32>
    %14 = vector.broadcast %13 : vector<1x32xf32> to vector<2x32xf32>
    %c2_7 = arith.constant 2 : index
    %c0_8 = arith.constant 0 : index
    %15 = vector.load %arg7[%c2_7, %c0_8] : memref<3x32xf32, #tpu.memory_space<vmem>>, vector<1x32xf32>
    %16 = vector.shape_cast %15 : vector<1x32xf32> to vector<1x32xf32>
    %17 = vector.broadcast %16 : vector<1x32xf32> to vector<2x32xf32>
    %c0_9 = arith.constant 0 : index
    %c0_10 = arith.constant 0 : index
    %c0_11 = arith.constant 0 : index
    %18 = vector.load %arg1[%c0_9, %c0_10, %c0_11] : memref<8x2x12xf32, #tpu.memory_space<vmem>>, vector<1x2x12xf32>
    %19 = vector.shape_cast %18 : vector<1x2x12xf32> to vector<2x12xf32>
    %c0_12 = arith.constant 0 : index
    %c0_13 = arith.constant 0 : index
    %20 = vector.load %arg2[%c0_12, %c0_13] : memref<12x128xf32, #tpu.memory_space<vmem>>, vector<12x128xf32>
    %c0_14 = arith.constant 0 : index
    %c0_15 = arith.constant 0 : index
    %21 = vector.load %arg5[%c0_14, %c0_15] : memref<3x128xf32, #tpu.memory_space<vmem>>, vector<1x128xf32>
    %cst = arith.constant dense<0.000000e+00> : vector<2x128xf32>
    %22 = tpu.matmul %19, %20, %cst {dimension_numbers = #tpu.dot_dimension_numbers<[1], [0], [0], [1], [0, 0, 1, 1], [], []>} : vector<2x12xf32>, vector<12x128xf32>, vector<2x128xf32> -> vector<2x128xf32>
    %c0_16 = arith.constant 0 : index
    %c0_17 = arith.constant 0 : index
    %c0_18 = arith.constant 0 : index
    %23 = vector.load %arg4[%c0_16, %c0_17, %c0_18] : memref<3x32x128xf32, #tpu.memory_space<vmem>>, vector<1x32x128xf32>
    %24 = vector.shape_cast %23 : vector<1x32x128xf32> to vector<32x128xf32>
    %cst_19 = arith.constant dense<0.000000e+00> : vector<2x128xf32>
    %25 = tpu.matmul %2, %24, %cst_19 {dimension_numbers = #tpu.dot_dimension_numbers<[1], [0], [0], [1], [0, 0, 1, 1], [], []>} : vector<2x32xf32>, vector<32x128xf32>, vector<2x128xf32> -> vector<2x128xf32>
    %26 = arith.addf %22, %25 : vector<2x128xf32>
    %27 = vector.broadcast %21 : vector<1x128xf32> to vector<2x128xf32>
    %28 = arith.addf %26, %27 : vector<2x128xf32>
    %29 = arith.negf %28 : vector<2x128xf32>
    %30 = math.exp %29 : vector<2x128xf32>
    %cst_20 = arith.constant 1.000000e+00 : f32
    %31 = vector.broadcast %cst_20 : f32 to vector<2x128xf32>
    %32 = arith.addf %31, %30 : vector<2x128xf32>
    %33 = arith.divf %31, %32 : vector<2x128xf32>
    %34 = math.tanh %28 : vector<2x128xf32>
    %35 = vector.extract_strided_slice %33 {offsets = [0, 0], sizes = [2, 32], strides = [1, 1]} : vector<2x128xf32> to vector<2x32xf32>
    %36 = vector.extract_strided_slice %33 {offsets = [0, 32], sizes = [2, 32], strides = [1, 1]} : vector<2x128xf32> to vector<2x32xf32>
    %37 = vector.extract_strided_slice %34 {offsets = [0, 64], sizes = [2, 32], strides = [1, 1]} : vector<2x128xf32> to vector<2x32xf32>
    %38 = vector.extract_strided_slice %33 {offsets = [0, 96], sizes = [2, 32], strides = [1, 1]} : vector<2x128xf32> to vector<2x32xf32>
    %39 = arith.mulf %36, %11 : vector<2x32xf32>
    %40 = arith.mulf %35, %37 : vector<2x32xf32>
    %41 = arith.addf %39, %40 : vector<2x32xf32>
    %42 = math.tanh %41 : vector<2x32xf32>
    %43 = arith.mulf %38, %42 : vector<2x32xf32>
    %c1_21 = arith.constant 1 : index
    %c0_22 = arith.constant 0 : index
    %c0_23 = arith.constant 0 : index
    %44 = vector.load %arg1[%c1_21, %c0_22, %c0_23] : memref<8x2x12xf32, #tpu.memory_space<vmem>>, vector<1x2x12xf32>
    %45 = vector.shape_cast %44 : vector<1x2x12xf32> to vector<2x12xf32>
    %c0_24 = arith.constant 0 : index
    %c0_25 = arith.constant 0 : index
    %46 = vector.load %arg2[%c0_24, %c0_25] : memref<12x128xf32, #tpu.memory_space<vmem>>, vector<12x128xf32>
    %c0_26 = arith.constant 0 : index
    %c0_27 = arith.constant 0 : index
    %47 = vector.load %arg5[%c0_26, %c0_27] : memref<3x128xf32, #tpu.memory_space<vmem>>, vector<1x128xf32>
    %cst_28 = arith.constant dense<0.000000e+00> : vector<2x128xf32>
    %48 = tpu.matmul %45, %46, %cst_28 {dimension_numbers = #tpu.dot_dimension_numbers<[1], [0], [0], [1], [0, 0, 1, 1], [], []>} : vector<2x12xf32>, vector<12x128xf32>, vector<2x128xf32> -> vector<2x128xf32>
    %c0_29 = arith.constant 0 : index
    %c0_30 = arith.constant 0 : index
    %c0_31 = arith.constant 0 : index
    %49 = vector.load %arg4[%c0_29, %c0_30, %c0_31] : memref<3x32x128xf32, #tpu.memory_space<vmem>>, vector<1x32x128xf32>
    %50 = vector.shape_cast %49 : vector<1x32x128xf32> to vector<32x128xf32>
    %cst_32 = arith.constant dense<0.000000e+00> : vector<2x128xf32>
    %51 = tpu.matmul %43, %50, %cst_32 {dimension_numbers = #tpu.dot_dimension_numbers<[1], [0], [0], [1], [0, 0, 1, 1], [], []>} : vector<2x32xf32>, vector<32x128xf32>, vector<2x128xf32> -> vector<2x128xf32>
    %52 = arith.addf %48, %51 : vector<2x128xf32>
    %53 = vector.broadcast %47 : vector<1x128xf32> to vector<2x128xf32>
    %54 = arith.addf %52, %53 : vector<2x128xf32>
    %55 = arith.negf %54 : vector<2x128xf32>
    %56 = math.exp %55 : vector<2x128xf32>
    %cst_33 = arith.constant 1.000000e+00 : f32
    %57 = vector.broadcast %cst_33 : f32 to vector<2x128xf32>
    %58 = arith.addf %57, %56 : vector<2x128xf32>
    %59 = arith.divf %57, %58 : vector<2x128xf32>
    %60 = math.tanh %54 : vector<2x128xf32>
    %61 = vector.extract_strided_slice %59 {offsets = [0, 0], sizes = [2, 32], strides = [1, 1]} : vector<2x128xf32> to vector<2x32xf32>
    %62 = vector.extract_strided_slice %59 {offsets = [0, 32], sizes = [2, 32], strides = [1, 1]} : vector<2x128xf32> to vector<2x32xf32>
    %63 = vector.extract_strided_slice %60 {offsets = [0, 64], sizes = [2, 32], strides = [1, 1]} : vector<2x128xf32> to vector<2x32xf32>
    %64 = vector.extract_strided_slice %59 {offsets = [0, 96], sizes = [2, 32], strides = [1, 1]} : vector<2x128xf32> to vector<2x32xf32>
    %65 = arith.mulf %62, %41 : vector<2x32xf32>
    %66 = arith.mulf %61, %63 : vector<2x32xf32>
    %67 = arith.addf %65, %66 : vector<2x32xf32>
    %68 = math.tanh %67 : vector<2x32xf32>
    %69 = arith.mulf %64, %68 : vector<2x32xf32>
    %c0_34 = arith.constant 0 : index
    %c0_35 = arith.constant 0 : index
    %c0_36 = arith.constant 0 : index
    %70 = vector.load %arg3[%c0_34, %c0_35, %c0_36] : memref<2x32x128xf32, #tpu.memory_space<vmem>>, vector<1x32x128xf32>
    %71 = vector.shape_cast %70 : vector<1x32x128xf32> to vector<32x128xf32>
    %c1_37 = arith.constant 1 : index
    %c0_38 = arith.constant 0 : index
    %72 = vector.load %arg5[%c1_37, %c0_38] : memref<3x128xf32, #tpu.memory_space<vmem>>, vector<1x128xf32>
    %cst_39 = arith.constant dense<0.000000e+00> : vector<2x128xf32>
    %73 = tpu.matmul %43, %71, %cst_39 {dimension_numbers = #tpu.dot_dimension_numbers<[1], [0], [0], [1], [0, 0, 1, 1], [], []>} : vector<2x32xf32>, vector<32x128xf32>, vector<2x128xf32> -> vector<2x128xf32>
    %c1_40 = arith.constant 1 : index
    %c0_41 = arith.constant 0 : index
    %c0_42 = arith.constant 0 : index
    %74 = vector.load %arg4[%c1_40, %c0_41, %c0_42] : memref<3x32x128xf32, #tpu.memory_space<vmem>>, vector<1x32x128xf32>
    %75 = vector.shape_cast %74 : vector<1x32x128xf32> to vector<32x128xf32>
    %cst_43 = arith.constant dense<0.000000e+00> : vector<2x128xf32>
    %76 = tpu.matmul %5, %75, %cst_43 {dimension_numbers = #tpu.dot_dimension_numbers<[1], [0], [0], [1], [0, 0, 1, 1], [], []>} : vector<2x32xf32>, vector<32x128xf32>, vector<2x128xf32> -> vector<2x128xf32>
    %77 = arith.addf %73, %76 : vector<2x128xf32>
    %78 = vector.broadcast %72 : vector<1x128xf32> to vector<2x128xf32>
    %79 = arith.addf %77, %78 : vector<2x128xf32>
    %80 = arith.negf %79 : vector<2x128xf32>
    %81 = math.exp %80 : vector<2x128xf32>
    %cst_44 = arith.constant 1.000000e+00 : f32
    %82 = vector.broadcast %cst_44 : f32 to vector<2x128xf32>
    %83 = arith.addf %82, %81 : vector<2x128xf32>
    %84 = arith.divf %82, %83 : vector<2x128xf32>
    %85 = math.tanh %79 : vector<2x128xf32>
    %86 = vector.extract_strided_slice %84 {offsets = [0, 0], sizes = [2, 32], strides = [1, 1]} : vector<2x128xf32> to vector<2x32xf32>
    %87 = vector.extract_strided_slice %84 {offsets = [0, 32], sizes = [2, 32], strides = [1, 1]} : vector<2x128xf32> to vector<2x32xf32>
    %88 = vector.extract_strided_slice %85 {offsets = [0, 64], sizes = [2, 32], strides = [1, 1]} : vector<2x128xf32> to vector<2x32xf32>
    %89 = vector.extract_strided_slice %84 {offsets = [0, 96], sizes = [2, 32], strides = [1, 1]} : vector<2x128xf32> to vector<2x32xf32>
    %90 = arith.mulf %87, %14 : vector<2x32xf32>
    %91 = arith.mulf %86, %88 : vector<2x32xf32>
    %92 = arith.addf %90, %91 : vector<2x32xf32>
    %93 = math.tanh %92 : vector<2x32xf32>
    %94 = arith.mulf %89, %93 : vector<2x32xf32>
    %c2_45 = arith.constant 2 : index
    %c0_46 = arith.constant 0 : index
    %c0_47 = arith.constant 0 : index
    %95 = vector.load %arg1[%c2_45, %c0_46, %c0_47] : memref<8x2x12xf32, #tpu.memory_space<vmem>>, vector<1x2x12xf32>
    %96 = vector.shape_cast %95 : vector<1x2x12xf32> to vector<2x12xf32>
    %c0_48 = arith.constant 0 : index
    %c0_49 = arith.constant 0 : index
    %97 = vector.load %arg2[%c0_48, %c0_49] : memref<12x128xf32, #tpu.memory_space<vmem>>, vector<12x128xf32>
    %c0_50 = arith.constant 0 : index
    %c0_51 = arith.constant 0 : index
    %98 = vector.load %arg5[%c0_50, %c0_51] : memref<3x128xf32, #tpu.memory_space<vmem>>, vector<1x128xf32>
    %cst_52 = arith.constant dense<0.000000e+00> : vector<2x128xf32>
    %99 = tpu.matmul %96, %97, %cst_52 {dimension_numbers = #tpu.dot_dimension_numbers<[1], [0], [0], [1], [0, 0, 1, 1], [], []>} : vector<2x12xf32>, vector<12x128xf32>, vector<2x128xf32> -> vector<2x128xf32>
    %c0_53 = arith.constant 0 : index
    %c0_54 = arith.constant 0 : index
    %c0_55 = arith.constant 0 : index
    %100 = vector.load %arg4[%c0_53, %c0_54, %c0_55] : memref<3x32x128xf32, #tpu.memory_space<vmem>>, vector<1x32x128xf32>
    %101 = vector.shape_cast %100 : vector<1x32x128xf32> to vector<32x128xf32>
    %cst_56 = arith.constant dense<0.000000e+00> : vector<2x128xf32>
    %102 = tpu.matmul %69, %101, %cst_56 {dimension_numbers = #tpu.dot_dimension_numbers<[1], [0], [0], [1], [0, 0, 1, 1], [], []>} : vector<2x32xf32>, vector<32x128xf32>, vector<2x128xf32> -> vector<2x128xf32>
    %103 = arith.addf %99, %102 : vector<2x128xf32>
    %104 = vector.broadcast %98 : vector<1x128xf32> to vector<2x128xf32>
    %105 = arith.addf %103, %104 : vector<2x128xf32>
    %106 = arith.negf %105 : vector<2x128xf32>
    %107 = math.exp %106 : vector<2x128xf32>
    %cst_57 = arith.constant 1.000000e+00 : f32
    %108 = vector.broadcast %cst_57 : f32 to vector<2x128xf32>
    %109 = arith.addf %108, %107 : vector<2x128xf32>
    %110 = arith.divf %108, %109 : vector<2x128xf32>
    %111 = math.tanh %105 : vector<2x128xf32>
    %112 = vector.extract_strided_slice %110 {offsets = [0, 0], sizes = [2, 32], strides = [1, 1]} : vector<2x128xf32> to vector<2x32xf32>
    %113 = vector.extract_strided_slice %110 {offsets = [0, 32], sizes = [2, 32], strides = [1, 1]} : vector<2x128xf32> to vector<2x32xf32>
    %114 = vector.extract_strided_slice %111 {offsets = [0, 64], sizes = [2, 32], strides = [1, 1]} : vector<2x128xf32> to vector<2x32xf32>
    %115 = vector.extract_strided_slice %110 {offsets = [0, 96], sizes = [2, 32], strides = [1, 1]} : vector<2x128xf32> to vector<2x32xf32>
    %116 = arith.mulf %113, %67 : vector<2x32xf32>
    %117 = arith.mulf %112, %114 : vector<2x32xf32>
    %118 = arith.addf %116, %117 : vector<2x32xf32>
    %119 = math.tanh %118 : vector<2x32xf32>
    %120 = arith.mulf %115, %119 : vector<2x32xf32>
    %c0_58 = arith.constant 0 : index
    %c0_59 = arith.constant 0 : index
    %c0_60 = arith.constant 0 : index
    %121 = vector.load %arg3[%c0_58, %c0_59, %c0_60] : memref<2x32x128xf32, #tpu.memory_space<vmem>>, vector<1x32x128xf32>
    %122 = vector.shape_cast %121 : vector<1x32x128xf32> to vector<32x128xf32>
    %c1_61 = arith.constant 1 : index
    %c0_62 = arith.constant 0 : index
    %123 = vector.load %arg5[%c1_61, %c0_62] : memref<3x128xf32, #tpu.memory_space<vmem>>, vector<1x128xf32>
    %cst_63 = arith.constant dense<0.000000e+00> : vector<2x128xf32>
    %124 = tpu.matmul %69, %122, %cst_63 {dimension_numbers = #tpu.dot_dimension_numbers<[1], [0], [0], [1], [0, 0, 1, 1], [], []>} : vector<2x32xf32>, vector<32x128xf32>, vector<2x128xf32> -> vector<2x128xf32>
    %c1_64 = arith.constant 1 : index
    %c0_65 = arith.constant 0 : index
    %c0_66 = arith.constant 0 : index
    %125 = vector.load %arg4[%c1_64, %c0_65, %c0_66] : memref<3x32x128xf32, #tpu.memory_space<vmem>>, vector<1x32x128xf32>
    %126 = vector.shape_cast %125 : vector<1x32x128xf32> to vector<32x128xf32>
    %cst_67 = arith.constant dense<0.000000e+00> : vector<2x128xf32>
    %127 = tpu.matmul %94, %126, %cst_67 {dimension_numbers = #tpu.dot_dimension_numbers<[1], [0], [0], [1], [0, 0, 1, 1], [], []>} : vector<2x32xf32>, vector<32x128xf32>, vector<2x128xf32> -> vector<2x128xf32>
    %128 = arith.addf %124, %127 : vector<2x128xf32>
    %129 = vector.broadcast %123 : vector<1x128xf32> to vector<2x128xf32>
    %130 = arith.addf %128, %129 : vector<2x128xf32>
    %131 = arith.negf %130 : vector<2x128xf32>
    %132 = math.exp %131 : vector<2x128xf32>
    %cst_68 = arith.constant 1.000000e+00 : f32
    %133 = vector.broadcast %cst_68 : f32 to vector<2x128xf32>
    %134 = arith.addf %133, %132 : vector<2x128xf32>
    %135 = arith.divf %133, %134 : vector<2x128xf32>
    %136 = math.tanh %130 : vector<2x128xf32>
    %137 = vector.extract_strided_slice %135 {offsets = [0, 0], sizes = [2, 32], strides = [1, 1]} : vector<2x128xf32> to vector<2x32xf32>
    %138 = vector.extract_strided_slice %135 {offsets = [0, 32], sizes = [2, 32], strides = [1, 1]} : vector<2x128xf32> to vector<2x32xf32>
    %139 = vector.extract_strided_slice %136 {offsets = [0, 64], sizes = [2, 32], strides = [1, 1]} : vector<2x128xf32> to vector<2x32xf32>
    %140 = vector.extract_strided_slice %135 {offsets = [0, 96], sizes = [2, 32], strides = [1, 1]} : vector<2x128xf32> to vector<2x32xf32>
    %141 = arith.mulf %138, %92 : vector<2x32xf32>
    %142 = arith.mulf %137, %139 : vector<2x32xf32>
    %143 = arith.addf %141, %142 : vector<2x32xf32>
    %144 = math.tanh %143 : vector<2x32xf32>
    %145 = arith.mulf %140, %144 : vector<2x32xf32>
    %c1_69 = arith.constant 1 : index
    %c0_70 = arith.constant 0 : index
    %c0_71 = arith.constant 0 : index
    %146 = vector.load %arg3[%c1_69, %c0_70, %c0_71] : memref<2x32x128xf32, #tpu.memory_space<vmem>>, vector<1x32x128xf32>
    %147 = vector.shape_cast %146 : vector<1x32x128xf32> to vector<32x128xf32>
    %c2_72 = arith.constant 2 : index
    %c0_73 = arith.constant 0 : index
    %148 = vector.load %arg5[%c2_72, %c0_73] : memref<3x128xf32, #tpu.memory_space<vmem>>, vector<1x128xf32>
    %cst_74 = arith.constant dense<0.000000e+00> : vector<2x128xf32>
    %149 = tpu.matmul %94, %147, %cst_74 {dimension_numbers = #tpu.dot_dimension_numbers<[1], [0], [0], [1], [0, 0, 1, 1], [], []>} : vector<2x32xf32>, vector<32x128xf32>, vector<2x128xf32> -> vector<2x128xf32>
    %c2_75 = arith.constant 2 : index
    %c0_76 = arith.constant 0 : index
    %c0_77 = arith.constant 0 : index
    %150 = vector.load %arg4[%c2_75, %c0_76, %c0_77] : memref<3x32x128xf32, #tpu.memory_space<vmem>>, vector<1x32x128xf32>
    %151 = vector.shape_cast %150 : vector<1x32x128xf32> to vector<32x128xf32>
    %cst_78 = arith.constant dense<0.000000e+00> : vector<2x128xf32>
    %152 = tpu.matmul %8, %151, %cst_78 {dimension_numbers = #tpu.dot_dimension_numbers<[1], [0], [0], [1], [0, 0, 1, 1], [], []>} : vector<2x32xf32>, vector<32x128xf32>, vector<2x128xf32> -> vector<2x128xf32>
    %153 = arith.addf %149, %152 : vector<2x128xf32>
    %154 = vector.broadcast %148 : vector<1x128xf32> to vector<2x128xf32>
    %155 = arith.addf %153, %154 : vector<2x128xf32>
    %156 = arith.negf %155 : vector<2x128xf32>
    %157 = math.exp %156 : vector<2x128xf32>
    %cst_79 = arith.constant 1.000000e+00 : f32
    %158 = vector.broadcast %cst_79 : f32 to vector<2x128xf32>
    %159 = arith.addf %158, %157 : vector<2x128xf32>
    %160 = arith.divf %158, %159 : vector<2x128xf32>
    %161 = math.tanh %155 : vector<2x128xf32>
    %162 = vector.extract_strided_slice %160 {offsets = [0, 0], sizes = [2, 32], strides = [1, 1]} : vector<2x128xf32> to vector<2x32xf32>
    %163 = vector.extract_strided_slice %160 {offsets = [0, 32], sizes = [2, 32], strides = [1, 1]} : vector<2x128xf32> to vector<2x32xf32>
    %164 = vector.extract_strided_slice %161 {offsets = [0, 64], sizes = [2, 32], strides = [1, 1]} : vector<2x128xf32> to vector<2x32xf32>
    %165 = vector.extract_strided_slice %160 {offsets = [0, 96], sizes = [2, 32], strides = [1, 1]} : vector<2x128xf32> to vector<2x32xf32>
    %166 = arith.mulf %163, %17 : vector<2x32xf32>
    %167 = arith.mulf %162, %164 : vector<2x32xf32>
    %168 = arith.addf %166, %167 : vector<2x32xf32>
    %169 = math.tanh %168 : vector<2x32xf32>
    %170 = arith.mulf %165, %169 : vector<2x32xf32>
    %c0_80 = arith.constant 0 : index
    %c0_81 = arith.constant 0 : index
    %171 = vector.load %arg8[%c0_80, %c0_81] : memref<32x128xf32, #tpu.memory_space<vmem>>, vector<32x128xf32>
    %cst_82 = arith.constant dense<0.000000e+00> : vector<2x128xf32>
    %172 = tpu.matmul %170, %171, %cst_82 {dimension_numbers = #tpu.dot_dimension_numbers<[1], [0], [0], [1], [0, 0, 1, 1], [], []>} : vector<2x32xf32>, vector<32x128xf32>, vector<2x128xf32> -> vector<2x128xf32>
    %c0_83 = arith.constant 0 : index
    %c0_84 = arith.constant 0 : index
    %173 = vector.load %arg9[%c0_83, %c0_84] : memref<1x128xf32, #tpu.memory_space<vmem>>, vector<1x128xf32>
    %174 = vector.broadcast %173 : vector<1x128xf32> to vector<2x128xf32>
    %175 = arith.addf %172, %174 : vector<2x128xf32>
    %cst_85 = arith.constant dense<0xFF800000> : vector<2xf32>
    %176 = vector.multi_reduction <maximumf>, %175, %cst_85 [1] : vector<2x128xf32> to vector<2xf32>
    %177 = vector.shape_cast %176 : vector<2xf32> to vector<2x1xf32>
    %178 = vector.broadcast %177 : vector<2x1xf32> to vector<2x128xf32>
    %179 = arith.subf %175, %178 : vector<2x128xf32>
    %180 = math.exp %179 : vector<2x128xf32>
    %cst_86 = arith.constant dense<0.000000e+00> : vector<2xf32>
    %181 = vector.multi_reduction <add>, %180, %cst_86 [1] : vector<2x128xf32> to vector<2xf32>
    %182 = vector.shape_cast %181 : vector<2xf32> to vector<2x1xf32>
    %183 = math.log %182 : vector<2x1xf32>
    %184 = vector.broadcast %183 : vector<2x1xf32> to vector<2x128xf32>
    %185 = arith.subf %179, %184 : vector<2x128xf32>
    %c0_87 = arith.constant 0 : index
    %c0_88 = arith.constant 0 : index
    %c0_89 = arith.constant 0 : index
    %186 = vector.load %arg10[%c0_87, %c0_88, %c0_89] : memref<8x2x128xf32, #tpu.memory_space<vmem>>, vector<1x2x128xf32>
    %187 = vector.shape_cast %186 : vector<1x2x128xf32> to vector<2x128xf32>
    %188 = vector.shape_cast %185 : vector<2x128xf32> to vector<1x2x128xf32>
    tpu.vector_store %arg10[%c0_87, %c0_88, %c0_89], %188 {strides = array<i32>} : memref<8x2x128xf32, #tpu.memory_space<vmem>>, vector<1x2x128xf32>,
    %c3 = arith.constant 3 : index
    %c0_90 = arith.constant 0 : index
    %c0_91 = arith.constant 0 : index
    %189 = vector.load %arg1[%c3, %c0_90, %c0_91] : memref<8x2x12xf32, #tpu.memory_space<vmem>>, vector<1x2x12xf32>
    %190 = vector.shape_cast %189 : vector<1x2x12xf32> to vector<2x12xf32>
    %c0_92 = arith.constant 0 : index
    %c0_93 = arith.constant 0 : index
    %191 = vector.load %arg2[%c0_92, %c0_93] : memref<12x128xf32, #tpu.memory_space<vmem>>, vector<12x128xf32>
    %c0_94 = arith.constant 0 : index
    %c0_95 = arith.constant 0 : index
    %192 = vector.load %arg5[%c0_94, %c0_95] : memref<3x128xf32, #tpu.memory_space<vmem>>, vector<1x128xf32>
    %cst_96 = arith.constant dense<0.000000e+00> : vector<2x128xf32>
    %193 = tpu.matmul %190, %191, %cst_96 {dimension_numbers = #tpu.dot_dimension_numbers<[1], [0], [0], [1], [0, 0, 1, 1], [], []>} : vector<2x12xf32>, vector<12x128xf32>, vector<2x128xf32> -> vector<2x128xf32>
    %c0_97 = arith.constant 0 : index
    %c0_98 = arith.constant 0 : index
    %c0_99 = arith.constant 0 : index
    %194 = vector.load %arg4[%c0_97, %c0_98, %c0_99] : memref<3x32x128xf32, #tpu.memory_space<vmem>>, vector<1x32x128xf32>
    %195 = vector.shape_cast %194 : vector<1x32x128xf32> to vector<32x128xf32>
    %cst_100 = arith.constant dense<0.000000e+00> : vector<2x128xf32>
    %196 = tpu.matmul %120, %195, %cst_100 {dimension_numbers = #tpu.dot_dimension_numbers<[1], [0], [0], [1], [0, 0, 1, 1], [], []>} : vector<2x32xf32>, vector<32x128xf32>, vector<2x128xf32> -> vector<2x128xf32>
    %197 = arith.addf %193, %196 : vector<2x128xf32>
    %198 = vector.broadcast %192 : vector<1x128xf32> to vector<2x128xf32>
    %199 = arith.addf %197, %198 : vector<2x128xf32>
    %200 = arith.negf %199 : vector<2x128xf32>
    %201 = math.exp %200 : vector<2x128xf32>
    %cst_101 = arith.constant 1.000000e+00 : f32
    %202 = vector.broadcast %cst_101 : f32 to vector<2x128xf32>
    %203 = arith.addf %202, %201 : vector<2x128xf32>
    %204 = arith.divf %202, %203 : vector<2x128xf32>
    %205 = math.tanh %199 : vector<2x128xf32>
    %206 = vector.extract_strided_slice %204 {offsets = [0, 0], sizes = [2, 32], strides = [1, 1]} : vector<2x128xf32> to vector<2x32xf32>
    %207 = vector.extract_strided_slice %204 {offsets = [0, 32], sizes = [2, 32], strides = [1, 1]} : vector<2x128xf32> to vector<2x32xf32>
    %208 = vector.extract_strided_slice %205 {offsets = [0, 64], sizes = [2, 32], strides = [1, 1]} : vector<2x128xf32> to vector<2x32xf32>
    %209 = vector.extract_strided_slice %204 {offsets = [0, 96], sizes = [2, 32], strides = [1, 1]} : vector<2x128xf32> to vector<2x32xf32>
    %210 = arith.mulf %207, %118 : vector<2x32xf32>
    %211 = arith.mulf %206, %208 : vector<2x32xf32>
    %212 = arith.addf %210, %211 : vector<2x32xf32>
    %213 = math.tanh %212 : vector<2x32xf32>
    %214 = arith.mulf %209, %213 : vector<2x32xf32>
    %c0_102 = arith.constant 0 : index
    %c0_103 = arith.constant 0 : index
    %c0_104 = arith.constant 0 : index
    %215 = vector.load %arg3[%c0_102, %c0_103, %c0_104] : memref<2x32x128xf32, #tpu.memory_space<vmem>>, vector<1x32x128xf32>
    %216 = vector.shape_cast %215 : vector<1x32x128xf32> to vector<32x128xf32>
    %c1_105 = arith.constant 1 : index
    %c0_106 = arith.constant 0 : index
    %217 = vector.load %arg5[%c1_105, %c0_106] : memref<3x128xf32, #tpu.memory_space<vmem>>, vector<1x128xf32>
    %cst_107 = arith.constant dense<0.000000e+00> : vector<2x128xf32>
    %218 = tpu.matmul %120, %216, %cst_107 {dimension_numbers = #tpu.dot_dimension_numbers<[1], [0], [0], [1], [0, 0, 1, 1], [], []>} : vector<2x32xf32>, vector<32x128xf32>, vector<2x128xf32> -> vector<2x128xf32>
    %c1_108 = arith.constant 1 : index
    %c0_109 = arith.constant 0 : index
    %c0_110 = arith.constant 0 : index
    %219 = vector.load %arg4[%c1_108, %c0_109, %c0_110] : memref<3x32x128xf32, #tpu.memory_space<vmem>>, vector<1x32x128xf32>
    %220 = vector.shape_cast %219 : vector<1x32x128xf32> to vector<32x128xf32>
    %cst_111 = arith.constant dense<0.000000e+00> : vector<2x128xf32>
    %221 = tpu.matmul %145, %220, %cst_111 {dimension_numbers = #tpu.dot_dimension_numbers<[1], [0], [0], [1], [0, 0, 1, 1], [], []>} : vector<2x32xf32>, vector<32x128xf32>, vector<2x128xf32> -> vector<2x128xf32>
    %222 = arith.addf %218, %221 : vector<2x128xf32>
    %223 = vector.broadcast %217 : vector<1x128xf32> to vector<2x128xf32>
    %224 = arith.addf %222, %223 : vector<2x128xf32>
    %225 = arith.negf %224 : vector<2x128xf32>
    %226 = math.exp %225 : vector<2x128xf32>
    %cst_112 = arith.constant 1.000000e+00 : f32
    %227 = vector.broadcast %cst_112 : f32 to vector<2x128xf32>
    %228 = arith.addf %227, %226 : vector<2x128xf32>
    %229 = arith.divf %227, %228 : vector<2x128xf32>
    %230 = math.tanh %224 : vector<2x128xf32>
    %231 = vector.extract_strided_slice %229 {offsets = [0, 0], sizes = [2, 32], strides = [1, 1]} : vector<2x128xf32> to vector<2x32xf32>
    %232 = vector.extract_strided_slice %229 {offsets = [0, 32], sizes = [2, 32], strides = [1, 1]} : vector<2x128xf32> to vector<2x32xf32>
    %233 = vector.extract_strided_slice %230 {offsets = [0, 64], sizes = [2, 32], strides = [1, 1]} : vector<2x128xf32> to vector<2x32xf32>
    %234 = vector.extract_strided_slice %229 {offsets = [0, 96], sizes = [2, 32], strides = [1, 1]} : vector<2x128xf32> to vector<2x32xf32>
    %235 = arith.mulf %232, %143 : vector<2x32xf32>
    %236 = arith.mulf %231, %233 : vector<2x32xf32>
    %237 = arith.addf %235, %236 : vector<2x32xf32>
    %238 = math.tanh %237 : vector<2x32xf32>
    %239 = arith.mulf %234, %238 : vector<2x32xf32>
    %c1_113 = arith.constant 1 : index
    %c0_114 = arith.constant 0 : index
    %c0_115 = arith.constant 0 : index
    %240 = vector.load %arg3[%c1_113, %c0_114, %c0_115] : memref<2x32x128xf32, #tpu.memory_space<vmem>>, vector<1x32x128xf32>
    %241 = vector.shape_cast %240 : vector<1x32x128xf32> to vector<32x128xf32>
    %c2_116 = arith.constant 2 : index
    %c0_117 = arith.constant 0 : index
    %242 = vector.load %arg5[%c2_116, %c0_117] : memref<3x128xf32, #tpu.memory_space<vmem>>, vector<1x128xf32>
    %cst_118 = arith.constant dense<0.000000e+00> : vector<2x128xf32>
    %243 = tpu.matmul %145, %241, %cst_118 {dimension_numbers = #tpu.dot_dimension_numbers<[1], [0], [0], [1], [0, 0, 1, 1], [], []>} : vector<2x32xf32>, vector<32x128xf32>, vector<2x128xf32> -> vector<2x128xf32>
    %c2_119 = arith.constant 2 : index
    %c0_120 = arith.constant 0 : index
    %c0_121 = arith.constant 0 : index
    %244 = vector.load %arg4[%c2_119, %c0_120, %c0_121] : memref<3x32x128xf32, #tpu.memory_space<vmem>>, vector<1x32x128xf32>
    %245 = vector.shape_cast %244 : vector<1x32x128xf32> to vector<32x128xf32>
    %cst_122 = arith.constant dense<0.000000e+00> : vector<2x128xf32>
    %246 = tpu.matmul %170, %245, %cst_122 {dimension_numbers = #tpu.dot_dimension_numbers<[1], [0], [0], [1], [0, 0, 1, 1], [], []>} : vector<2x32xf32>, vector<32x128xf32>, vector<2x128xf32> -> vector<2x128xf32>
    %247 = arith.addf %243, %246 : vector<2x128xf32>
    %248 = vector.broadcast %242 : vector<1x128xf32> to vector<2x128xf32>
    %249 = arith.addf %247, %248 : vector<2x128xf32>
    %250 = arith.negf %249 : vector<2x128xf32>
    %251 = math.exp %250 : vector<2x128xf32>
    %cst_123 = arith.constant 1.000000e+00 : f32
    %252 = vector.broadcast %cst_123 : f32 to vector<2x128xf32>
    %253 = arith.addf %252, %251 : vector<2x128xf32>
    %254 = arith.divf %252, %253 : vector<2x128xf32>
    %255 = math.tanh %249 : vector<2x128xf32>
    %256 = vector.extract_strided_slice %254 {offsets = [0, 0], sizes = [2, 32], strides = [1, 1]} : vector<2x128xf32> to vector<2x32xf32>
    %257 = vector.extract_strided_slice %254 {offsets = [0, 32], sizes = [2, 32], strides = [1, 1]} : vector<2x128xf32> to vector<2x32xf32>
    %258 = vector.extract_strided_slice %255 {offsets = [0, 64], sizes = [2, 32], strides = [1, 1]} : vector<2x128xf32> to vector<2x32xf32>
    %259 = vector.extract_strided_slice %254 {offsets = [0, 96], sizes = [2, 32], strides = [1, 1]} : vector<2x128xf32> to vector<2x32xf32>
    %260 = arith.mulf %257, %168 : vector<2x32xf32>
    %261 = arith.mulf %256, %258 : vector<2x32xf32>
    %262 = arith.addf %260, %261 : vector<2x32xf32>
    %263 = math.tanh %262 : vector<2x32xf32>
    %264 = arith.mulf %259, %263 : vector<2x32xf32>
    %c0_124 = arith.constant 0 : index
    %c0_125 = arith.constant 0 : index
    %265 = vector.load %arg8[%c0_124, %c0_125] : memref<32x128xf32, #tpu.memory_space<vmem>>, vector<32x128xf32>
    %cst_126 = arith.constant dense<0.000000e+00> : vector<2x128xf32>
    %266 = tpu.matmul %264, %265, %cst_126 {dimension_numbers = #tpu.dot_dimension_numbers<[1], [0], [0], [1], [0, 0, 1, 1], [], []>} : vector<2x32xf32>, vector<32x128xf32>, vector<2x128xf32> -> vector<2x128xf32>
    %c0_127 = arith.constant 0 : index
    %c0_128 = arith.constant 0 : index
    %267 = vector.load %arg9[%c0_127, %c0_128] : memref<1x128xf32, #tpu.memory_space<vmem>>, vector<1x128xf32>
    %268 = vector.broadcast %267 : vector<1x128xf32> to vector<2x128xf32>
    %269 = arith.addf %266, %268 : vector<2x128xf32>
    %cst_129 = arith.constant dense<0xFF800000> : vector<2xf32>
    %270 = vector.multi_reduction <maximumf>, %269, %cst_129 [1] : vector<2x128xf32> to vector<2xf32>
    %271 = vector.shape_cast %270 : vector<2xf32> to vector<2x1xf32>
    %272 = vector.broadcast %271 : vector<2x1xf32> to vector<2x128xf32>
    %273 = arith.subf %269, %272 : vector<2x128xf32>
    %274 = math.exp %273 : vector<2x128xf32>
    %cst_130 = arith.constant dense<0.000000e+00> : vector<2xf32>
    %275 = vector.multi_reduction <add>, %274, %cst_130 [1] : vector<2x128xf32> to vector<2xf32>
    %276 = vector.shape_cast %275 : vector<2xf32> to vector<2x1xf32>
    %277 = math.log %276 : vector<2x1xf32>
    %278 = vector.broadcast %277 : vector<2x1xf32> to vector<2x128xf32>
    %279 = arith.subf %273, %278 : vector<2x128xf32>
    %c1_131 = arith.constant 1 : index
    %c0_132 = arith.constant 0 : index
    %c0_133 = arith.constant 0 : index
    %280 = vector.load %arg10[%c1_131, %c0_132, %c0_133] : memref<8x2x128xf32, #tpu.memory_space<vmem>>, vector<1x2x128xf32>
    %281 = vector.shape_cast %280 : vector<1x2x128xf32> to vector<2x128xf32>
    %282 = vector.shape_cast %279 : vector<2x128xf32> to vector<1x2x128xf32>
    tpu.vector_store %arg10[%c1_131, %c0_132, %c0_133], %282 {strides = array<i32>} : memref<8x2x128xf32, #tpu.memory_space<vmem>>, vector<1x2x128xf32>,
    %c4 = arith.constant 4 : index
    %c0_134 = arith.constant 0 : index
    %c0_135 = arith.constant 0 : index
    %283 = vector.load %arg1[%c4, %c0_134, %c0_135] : memref<8x2x12xf32, #tpu.memory_space<vmem>>, vector<1x2x12xf32>
    %284 = vector.shape_cast %283 : vector<1x2x12xf32> to vector<2x12xf32>
    %c0_136 = arith.constant 0 : index
    %c0_137 = arith.constant 0 : index
    %285 = vector.load %arg2[%c0_136, %c0_137] : memref<12x128xf32, #tpu.memory_space<vmem>>, vector<12x128xf32>
    %c0_138 = arith.constant 0 : index
    %c0_139 = arith.constant 0 : index
    %286 = vector.load %arg5[%c0_138, %c0_139] : memref<3x128xf32, #tpu.memory_space<vmem>>, vector<1x128xf32>
    %cst_140 = arith.constant dense<0.000000e+00> : vector<2x128xf32>
    %287 = tpu.matmul %284, %285, %cst_140 {dimension_numbers = #tpu.dot_dimension_numbers<[1], [0], [0], [1], [0, 0, 1, 1], [], []>} : vector<2x12xf32>, vector<12x128xf32>, vector<2x128xf32> -> vector<2x128xf32>
    %c0_141 = arith.constant 0 : index
    %c0_142 = arith.constant 0 : index
    %c0_143 = arith.constant 0 : index
    %288 = vector.load %arg4[%c0_141, %c0_142, %c0_143] : memref<3x32x128xf32, #tpu.memory_space<vmem>>, vector<1x32x128xf32>
    %289 = vector.shape_cast %288 : vector<1x32x128xf32> to vector<32x128xf32>
    %cst_144 = arith.constant dense<0.000000e+00> : vector<2x128xf32>
    %290 = tpu.matmul %214, %289, %cst_144 {dimension_numbers = #tpu.dot_dimension_numbers<[1], [0], [0], [1], [0, 0, 1, 1], [], []>} : vector<2x32xf32>, vector<32x128xf32>, vector<2x128xf32> -> vector<2x128xf32>
    %291 = arith.addf %287, %290 : vector<2x128xf32>
    %292 = vector.broadcast %286 : vector<1x128xf32> to vector<2x128xf32>
    %293 = arith.addf %291, %292 : vector<2x128xf32>
    %294 = arith.negf %293 : vector<2x128xf32>
    %295 = math.exp %294 : vector<2x128xf32>
    %cst_145 = arith.constant 1.000000e+00 : f32
    %296 = vector.broadcast %cst_145 : f32 to vector<2x128xf32>
    %297 = arith.addf %296, %295 : vector<2x128xf32>
    %298 = arith.divf %296, %297 : vector<2x128xf32>
    %299 = math.tanh %293 : vector<2x128xf32>
    %300 = vector.extract_strided_slice %298 {offsets = [0, 0], sizes = [2, 32], strides = [1, 1]} : vector<2x128xf32> to vector<2x32xf32>
    %301 = vector.extract_strided_slice %298 {offsets = [0, 32], sizes = [2, 32], strides = [1, 1]} : vector<2x128xf32> to vector<2x32xf32>
    %302 = vector.extract_strided_slice %299 {offsets = [0, 64], sizes = [2, 32], strides = [1, 1]} : vector<2x128xf32> to vector<2x32xf32>
    %303 = vector.extract_strided_slice %298 {offsets = [0, 96], sizes = [2, 32], strides = [1, 1]} : vector<2x128xf32> to vector<2x32xf32>
    %304 = arith.mulf %301, %212 : vector<2x32xf32>
    %305 = arith.mulf %300, %302 : vector<2x32xf32>
    %306 = arith.addf %304, %305 : vector<2x32xf32>
    %307 = math.tanh %306 : vector<2x32xf32>
    %308 = arith.mulf %303, %307 : vector<2x32xf32>
    %c0_146 = arith.constant 0 : index
    %c0_147 = arith.constant 0 : index
    %c0_148 = arith.constant 0 : index
    %309 = vector.load %arg3[%c0_146, %c0_147, %c0_148] : memref<2x32x128xf32, #tpu.memory_space<vmem>>, vector<1x32x128xf32>
    %310 = vector.shape_cast %309 : vector<1x32x128xf32> to vector<32x128xf32>
    %c1_149 = arith.constant 1 : index
    %c0_150 = arith.constant 0 : index
    %311 = vector.load %arg5[%c1_149, %c0_150] : memref<3x128xf32, #tpu.memory_space<vmem>>, vector<1x128xf32>
    %cst_151 = arith.constant dense<0.000000e+00> : vector<2x128xf32>
    %312 = tpu.matmul %214, %310, %cst_151 {dimension_numbers = #tpu.dot_dimension_numbers<[1], [0], [0], [1], [0, 0, 1, 1], [], []>} : vector<2x32xf32>, vector<32x128xf32>, vector<2x128xf32> -> vector<2x128xf32>
    %c1_152 = arith.constant 1 : index
    %c0_153 = arith.constant 0 : index
    %c0_154 = arith.constant 0 : index
    %313 = vector.load %arg4[%c1_152, %c0_153, %c0_154] : memref<3x32x128xf32, #tpu.memory_space<vmem>>, vector<1x32x128xf32>
    %314 = vector.shape_cast %313 : vector<1x32x128xf32> to vector<32x128xf32>
    %cst_155 = arith.constant dense<0.000000e+00> : vector<2x128xf32>
    %315 = tpu.matmul %239, %314, %cst_155 {dimension_numbers = #tpu.dot_dimension_numbers<[1], [0], [0], [1], [0, 0, 1, 1], [], []>} : vector<2x32xf32>, vector<32x128xf32>, vector<2x128xf32> -> vector<2x128xf32>
    %316 = arith.addf %312, %315 : vector<2x128xf32>
    %317 = vector.broadcast %311 : vector<1x128xf32> to vector<2x128xf32>
    %318 = arith.addf %316, %317 : vector<2x128xf32>
    %319 = arith.negf %318 : vector<2x128xf32>
    %320 = math.exp %319 : vector<2x128xf32>
    %cst_156 = arith.constant 1.000000e+00 : f32
    %321 = vector.broadcast %cst_156 : f32 to vector<2x128xf32>
    %322 = arith.addf %321, %320 : vector<2x128xf32>
    %323 = arith.divf %321, %322 : vector<2x128xf32>
    %324 = math.tanh %318 : vector<2x128xf32>
    %325 = vector.extract_strided_slice %323 {offsets = [0, 0], sizes = [2, 32], strides = [1, 1]} : vector<2x128xf32> to vector<2x32xf32>
    %326 = vector.extract_strided_slice %323 {offsets = [0, 32], sizes = [2, 32], strides = [1, 1]} : vector<2x128xf32> to vector<2x32xf32>
    %327 = vector.extract_strided_slice %324 {offsets = [0, 64], sizes = [2, 32], strides = [1, 1]} : vector<2x128xf32> to vector<2x32xf32>
    %328 = vector.extract_strided_slice %323 {offsets = [0, 96], sizes = [2, 32], strides = [1, 1]} : vector<2x128xf32> to vector<2x32xf32>
    %329 = arith.mulf %326, %237 : vector<2x32xf32>
    %330 = arith.mulf %325, %327 : vector<2x32xf32>
    %331 = arith.addf %329, %330 : vector<2x32xf32>
    %332 = math.tanh %331 : vector<2x32xf32>
    %333 = arith.mulf %328, %332 : vector<2x32xf32>
    %c1_157 = arith.constant 1 : index
    %c0_158 = arith.constant 0 : index
    %c0_159 = arith.constant 0 : index
    %334 = vector.load %arg3[%c1_157, %c0_158, %c0_159] : memref<2x32x128xf32, #tpu.memory_space<vmem>>, vector<1x32x128xf32>
    %335 = vector.shape_cast %334 : vector<1x32x128xf32> to vector<32x128xf32>
    %c2_160 = arith.constant 2 : index
    %c0_161 = arith.constant 0 : index
    %336 = vector.load %arg5[%c2_160, %c0_161] : memref<3x128xf32, #tpu.memory_space<vmem>>, vector<1x128xf32>
    %cst_162 = arith.constant dense<0.000000e+00> : vector<2x128xf32>
    %337 = tpu.matmul %239, %335, %cst_162 {dimension_numbers = #tpu.dot_dimension_numbers<[1], [0], [0], [1], [0, 0, 1, 1], [], []>} : vector<2x32xf32>, vector<32x128xf32>, vector<2x128xf32> -> vector<2x128xf32>
    %c2_163 = arith.constant 2 : index
    %c0_164 = arith.constant 0 : index
    %c0_165 = arith.constant 0 : index
    %338 = vector.load %arg4[%c2_163, %c0_164, %c0_165] : memref<3x32x128xf32, #tpu.memory_space<vmem>>, vector<1x32x128xf32>
    %339 = vector.shape_cast %338 : vector<1x32x128xf32> to vector<32x128xf32>
    %cst_166 = arith.constant dense<0.000000e+00> : vector<2x128xf32>
    %340 = tpu.matmul %264, %339, %cst_166 {dimension_numbers = #tpu.dot_dimension_numbers<[1], [0], [0], [1], [0, 0, 1, 1], [], []>} : vector<2x32xf32>, vector<32x128xf32>, vector<2x128xf32> -> vector<2x128xf32>
    %341 = arith.addf %337, %340 : vector<2x128xf32>
    %342 = vector.broadcast %336 : vector<1x128xf32> to vector<2x128xf32>
    %343 = arith.addf %341, %342 : vector<2x128xf32>
    %344 = arith.negf %343 : vector<2x128xf32>
    %345 = math.exp %344 : vector<2x128xf32>
    %cst_167 = arith.constant 1.000000e+00 : f32
    %346 = vector.broadcast %cst_167 : f32 to vector<2x128xf32>
    %347 = arith.addf %346, %345 : vector<2x128xf32>
    %348 = arith.divf %346, %347 : vector<2x128xf32>
    %349 = math.tanh %343 : vector<2x128xf32>
    %350 = vector.extract_strided_slice %348 {offsets = [0, 0], sizes = [2, 32], strides = [1, 1]} : vector<2x128xf32> to vector<2x32xf32>
    %351 = vector.extract_strided_slice %348 {offsets = [0, 32], sizes = [2, 32], strides = [1, 1]} : vector<2x128xf32> to vector<2x32xf32>
    %352 = vector.extract_strided_slice %349 {offsets = [0, 64], sizes = [2, 32], strides = [1, 1]} : vector<2x128xf32> to vector<2x32xf32>
    %353 = vector.extract_strided_slice %348 {offsets = [0, 96], sizes = [2, 32], strides = [1, 1]} : vector<2x128xf32> to vector<2x32xf32>
    %354 = arith.mulf %351, %262 : vector<2x32xf32>
    %355 = arith.mulf %350, %352 : vector<2x32xf32>
    %356 = arith.addf %354, %355 : vector<2x32xf32>
    %357 = math.tanh %356 : vector<2x32xf32>
    %358 = arith.mulf %353, %357 : vector<2x32xf32>
    %c0_168 = arith.constant 0 : index
    %c0_169 = arith.constant 0 : index
    %359 = vector.load %arg8[%c0_168, %c0_169] : memref<32x128xf32, #tpu.memory_space<vmem>>, vector<32x128xf32>
    %cst_170 = arith.constant dense<0.000000e+00> : vector<2x128xf32>
    %360 = tpu.matmul %358, %359, %cst_170 {dimension_numbers = #tpu.dot_dimension_numbers<[1], [0], [0], [1], [0, 0, 1, 1], [], []>} : vector<2x32xf32>, vector<32x128xf32>, vector<2x128xf32> -> vector<2x128xf32>
    %c0_171 = arith.constant 0 : index
    %c0_172 = arith.constant 0 : index
    %361 = vector.load %arg9[%c0_171, %c0_172] : memref<1x128xf32, #tpu.memory_space<vmem>>, vector<1x128xf32>
    %362 = vector.broadcast %361 : vector<1x128xf32> to vector<2x128xf32>
    %363 = arith.addf %360, %362 : vector<2x128xf32>
    %cst_173 = arith.constant dense<0xFF800000> : vector<2xf32>
    %364 = vector.multi_reduction <maximumf>, %363, %cst_173 [1] : vector<2x128xf32> to vector<2xf32>
    %365 = vector.shape_cast %364 : vector<2xf32> to vector<2x1xf32>
    %366 = vector.broadcast %365 : vector<2x1xf32> to vector<2x128xf32>
    %367 = arith.subf %363, %366 : vector<2x128xf32>
    %368 = math.exp %367 : vector<2x128xf32>
    %cst_174 = arith.constant dense<0.000000e+00> : vector<2xf32>
    %369 = vector.multi_reduction <add>, %368, %cst_174 [1] : vector<2x128xf32> to vector<2xf32>
    %370 = vector.shape_cast %369 : vector<2xf32> to vector<2x1xf32>
    %371 = math.log %370 : vector<2x1xf32>
    %372 = vector.broadcast %371 : vector<2x1xf32> to vector<2x128xf32>
    %373 = arith.subf %367, %372 : vector<2x128xf32>
    %c2_175 = arith.constant 2 : index
    %c0_176 = arith.constant 0 : index
    %c0_177 = arith.constant 0 : index
    %374 = vector.load %arg10[%c2_175, %c0_176, %c0_177] : memref<8x2x128xf32, #tpu.memory_space<vmem>>, vector<1x2x128xf32>
    %375 = vector.shape_cast %374 : vector<1x2x128xf32> to vector<2x128xf32>
    %376 = vector.shape_cast %373 : vector<2x128xf32> to vector<1x2x128xf32>
    tpu.vector_store %arg10[%c2_175, %c0_176, %c0_177], %376 {strides = array<i32>} : memref<8x2x128xf32, #tpu.memory_space<vmem>>, vector<1x2x128xf32>,
    %c5 = arith.constant 5 : index
    %c0_178 = arith.constant 0 : index
    %c0_179 = arith.constant 0 : index
    %377 = vector.load %arg1[%c5, %c0_178, %c0_179] : memref<8x2x12xf32, #tpu.memory_space<vmem>>, vector<1x2x12xf32>
    %378 = vector.shape_cast %377 : vector<1x2x12xf32> to vector<2x12xf32>
    %c0_180 = arith.constant 0 : index
    %c0_181 = arith.constant 0 : index
    %379 = vector.load %arg2[%c0_180, %c0_181] : memref<12x128xf32, #tpu.memory_space<vmem>>, vector<12x128xf32>
    %c0_182 = arith.constant 0 : index
    %c0_183 = arith.constant 0 : index
    %380 = vector.load %arg5[%c0_182, %c0_183] : memref<3x128xf32, #tpu.memory_space<vmem>>, vector<1x128xf32>
    %cst_184 = arith.constant dense<0.000000e+00> : vector<2x128xf32>
    %381 = tpu.matmul %378, %379, %cst_184 {dimension_numbers = #tpu.dot_dimension_numbers<[1], [0], [0], [1], [0, 0, 1, 1], [], []>} : vector<2x12xf32>, vector<12x128xf32>, vector<2x128xf32> -> vector<2x128xf32>
    %c0_185 = arith.constant 0 : index
    %c0_186 = arith.constant 0 : index
    %c0_187 = arith.constant 0 : index
    %382 = vector.load %arg4[%c0_185, %c0_186, %c0_187] : memref<3x32x128xf32, #tpu.memory_space<vmem>>, vector<1x32x128xf32>
    %383 = vector.shape_cast %382 : vector<1x32x128xf32> to vector<32x128xf32>
    %cst_188 = arith.constant dense<0.000000e+00> : vector<2x128xf32>
    %384 = tpu.matmul %308, %383, %cst_188 {dimension_numbers = #tpu.dot_dimension_numbers<[1], [0], [0], [1], [0, 0, 1, 1], [], []>} : vector<2x32xf32>, vector<32x128xf32>, vector<2x128xf32> -> vector<2x128xf32>
    %385 = arith.addf %381, %384 : vector<2x128xf32>
    %386 = vector.broadcast %380 : vector<1x128xf32> to vector<2x128xf32>
    %387 = arith.addf %385, %386 : vector<2x128xf32>
    %388 = arith.negf %387 : vector<2x128xf32>
    %389 = math.exp %388 : vector<2x128xf32>
    %cst_189 = arith.constant 1.000000e+00 : f32
    %390 = vector.broadcast %cst_189 : f32 to vector<2x128xf32>
    %391 = arith.addf %390, %389 : vector<2x128xf32>
    %392 = arith.divf %390, %391 : vector<2x128xf32>
    %393 = math.tanh %387 : vector<2x128xf32>
    %394 = vector.extract_strided_slice %392 {offsets = [0, 0], sizes = [2, 32], strides = [1, 1]} : vector<2x128xf32> to vector<2x32xf32>
    %395 = vector.extract_strided_slice %392 {offsets = [0, 32], sizes = [2, 32], strides = [1, 1]} : vector<2x128xf32> to vector<2x32xf32>
    %396 = vector.extract_strided_slice %393 {offsets = [0, 64], sizes = [2, 32], strides = [1, 1]} : vector<2x128xf32> to vector<2x32xf32>
    %397 = vector.extract_strided_slice %392 {offsets = [0, 96], sizes = [2, 32], strides = [1, 1]} : vector<2x128xf32> to vector<2x32xf32>
    %398 = arith.mulf %395, %306 : vector<2x32xf32>
    %399 = arith.mulf %394, %396 : vector<2x32xf32>
    %400 = arith.addf %398, %399 : vector<2x32xf32>
    %401 = math.tanh %400 : vector<2x32xf32>
    %402 = arith.mulf %397, %401 : vector<2x32xf32>
    %c0_190 = arith.constant 0 : index
    %c0_191 = arith.constant 0 : index
    %c0_192 = arith.constant 0 : index
    %403 = vector.load %arg3[%c0_190, %c0_191, %c0_192] : memref<2x32x128xf32, #tpu.memory_space<vmem>>, vector<1x32x128xf32>
    %404 = vector.shape_cast %403 : vector<1x32x128xf32> to vector<32x128xf32>
    %c1_193 = arith.constant 1 : index
    %c0_194 = arith.constant 0 : index
    %405 = vector.load %arg5[%c1_193, %c0_194] : memref<3x128xf32, #tpu.memory_space<vmem>>, vector<1x128xf32>
    %cst_195 = arith.constant dense<0.000000e+00> : vector<2x128xf32>
    %406 = tpu.matmul %308, %404, %cst_195 {dimension_numbers = #tpu.dot_dimension_numbers<[1], [0], [0], [1], [0, 0, 1, 1], [], []>} : vector<2x32xf32>, vector<32x128xf32>, vector<2x128xf32> -> vector<2x128xf32>
    %c1_196 = arith.constant 1 : index
    %c0_197 = arith.constant 0 : index
    %c0_198 = arith.constant 0 : index
    %407 = vector.load %arg4[%c1_196, %c0_197, %c0_198] : memref<3x32x128xf32, #tpu.memory_space<vmem>>, vector<1x32x128xf32>
    %408 = vector.shape_cast %407 : vector<1x32x128xf32> to vector<32x128xf32>
    %cst_199 = arith.constant dense<0.000000e+00> : vector<2x128xf32>
    %409 = tpu.matmul %333, %408, %cst_199 {dimension_numbers = #tpu.dot_dimension_numbers<[1], [0], [0], [1], [0, 0, 1, 1], [], []>} : vector<2x32xf32>, vector<32x128xf32>, vector<2x128xf32> -> vector<2x128xf32>
    %410 = arith.addf %406, %409 : vector<2x128xf32>
    %411 = vector.broadcast %405 : vector<1x128xf32> to vector<2x128xf32>
    %412 = arith.addf %410, %411 : vector<2x128xf32>
    %413 = arith.negf %412 : vector<2x128xf32>
    %414 = math.exp %413 : vector<2x128xf32>
    %cst_200 = arith.constant 1.000000e+00 : f32
    %415 = vector.broadcast %cst_200 : f32 to vector<2x128xf32>
    %416 = arith.addf %415, %414 : vector<2x128xf32>
    %417 = arith.divf %415, %416 : vector<2x128xf32>
    %418 = math.tanh %412 : vector<2x128xf32>
    %419 = vector.extract_strided_slice %417 {offsets = [0, 0], sizes = [2, 32], strides = [1, 1]} : vector<2x128xf32> to vector<2x32xf32>
    %420 = vector.extract_strided_slice %417 {offsets = [0, 32], sizes = [2, 32], strides = [1, 1]} : vector<2x128xf32> to vector<2x32xf32>
    %421 = vector.extract_strided_slice %418 {offsets = [0, 64], sizes = [2, 32], strides = [1, 1]} : vector<2x128xf32> to vector<2x32xf32>
    %422 = vector.extract_strided_slice %417 {offsets = [0, 96], sizes = [2, 32], strides = [1, 1]} : vector<2x128xf32> to vector<2x32xf32>
    %423 = arith.mulf %420, %331 : vector<2x32xf32>
    %424 = arith.mulf %419, %421 : vector<2x32xf32>
    %425 = arith.addf %423, %424 : vector<2x32xf32>
    %426 = math.tanh %425 : vector<2x32xf32>
    %427 = arith.mulf %422, %426 : vector<2x32xf32>
    %c1_201 = arith.constant 1 : index
    %c0_202 = arith.constant 0 : index
    %c0_203 = arith.constant 0 : index
    %428 = vector.load %arg3[%c1_201, %c0_202, %c0_203] : memref<2x32x128xf32, #tpu.memory_space<vmem>>, vector<1x32x128xf32>
    %429 = vector.shape_cast %428 : vector<1x32x128xf32> to vector<32x128xf32>
    %c2_204 = arith.constant 2 : index
    %c0_205 = arith.constant 0 : index
    %430 = vector.load %arg5[%c2_204, %c0_205] : memref<3x128xf32, #tpu.memory_space<vmem>>, vector<1x128xf32>
    %cst_206 = arith.constant dense<0.000000e+00> : vector<2x128xf32>
    %431 = tpu.matmul %333, %429, %cst_206 {dimension_numbers = #tpu.dot_dimension_numbers<[1], [0], [0], [1], [0, 0, 1, 1], [], []>} : vector<2x32xf32>, vector<32x128xf32>, vector<2x128xf32> -> vector<2x128xf32>
    %c2_207 = arith.constant 2 : index
    %c0_208 = arith.constant 0 : index
    %c0_209 = arith.constant 0 : index
    %432 = vector.load %arg4[%c2_207, %c0_208, %c0_209] : memref<3x32x128xf32, #tpu.memory_space<vmem>>, vector<1x32x128xf32>
    %433 = vector.shape_cast %432 : vector<1x32x128xf32> to vector<32x128xf32>
    %cst_210 = arith.constant dense<0.000000e+00> : vector<2x128xf32>
    %434 = tpu.matmul %358, %433, %cst_210 {dimension_numbers = #tpu.dot_dimension_numbers<[1], [0], [0], [1], [0, 0, 1, 1], [], []>} : vector<2x32xf32>, vector<32x128xf32>, vector<2x128xf32> -> vector<2x128xf32>
    %435 = arith.addf %431, %434 : vector<2x128xf32>
    %436 = vector.broadcast %430 : vector<1x128xf32> to vector<2x128xf32>
    %437 = arith.addf %435, %436 : vector<2x128xf32>
    %438 = arith.negf %437 : vector<2x128xf32>
    %439 = math.exp %438 : vector<2x128xf32>
    %cst_211 = arith.constant 1.000000e+00 : f32
    %440 = vector.broadcast %cst_211 : f32 to vector<2x128xf32>
    %441 = arith.addf %440, %439 : vector<2x128xf32>
    %442 = arith.divf %440, %441 : vector<2x128xf32>
    %443 = math.tanh %437 : vector<2x128xf32>
    %444 = vector.extract_strided_slice %442 {offsets = [0, 0], sizes = [2, 32], strides = [1, 1]} : vector<2x128xf32> to vector<2x32xf32>
    %445 = vector.extract_strided_slice %442 {offsets = [0, 32], sizes = [2, 32], strides = [1, 1]} : vector<2x128xf32> to vector<2x32xf32>
    %446 = vector.extract_strided_slice %443 {offsets = [0, 64], sizes = [2, 32], strides = [1, 1]} : vector<2x128xf32> to vector<2x32xf32>
    %447 = vector.extract_strided_slice %442 {offsets = [0, 96], sizes = [2, 32], strides = [1, 1]} : vector<2x128xf32> to vector<2x32xf32>
    %448 = arith.mulf %445, %356 : vector<2x32xf32>
    %449 = arith.mulf %444, %446 : vector<2x32xf32>
    %450 = arith.addf %448, %449 : vector<2x32xf32>
    %451 = math.tanh %450 : vector<2x32xf32>
    %452 = arith.mulf %447, %451 : vector<2x32xf32>
    %c0_212 = arith.constant 0 : index
    %c0_213 = arith.constant 0 : index
    %453 = vector.load %arg8[%c0_212, %c0_213] : memref<32x128xf32, #tpu.memory_space<vmem>>, vector<32x128xf32>
    %cst_214 = arith.constant dense<0.000000e+00> : vector<2x128xf32>
    %454 = tpu.matmul %452, %453, %cst_214 {dimension_numbers = #tpu.dot_dimension_numbers<[1], [0], [0], [1], [0, 0, 1, 1], [], []>} : vector<2x32xf32>, vector<32x128xf32>, vector<2x128xf32> -> vector<2x128xf32>
    %c0_215 = arith.constant 0 : index
    %c0_216 = arith.constant 0 : index
    %455 = vector.load %arg9[%c0_215, %c0_216] : memref<1x128xf32, #tpu.memory_space<vmem>>, vector<1x128xf32>
    %456 = vector.broadcast %455 : vector<1x128xf32> to vector<2x128xf32>
    %457 = arith.addf %454, %456 : vector<2x128xf32>
    %cst_217 = arith.constant dense<0xFF800000> : vector<2xf32>
    %458 = vector.multi_reduction <maximumf>, %457, %cst_217 [1] : vector<2x128xf32> to vector<2xf32>
    %459 = vector.shape_cast %458 : vector<2xf32> to vector<2x1xf32>
    %460 = vector.broadcast %459 : vector<2x1xf32> to vector<2x128xf32>
    %461 = arith.subf %457, %460 : vector<2x128xf32>
    %462 = math.exp %461 : vector<2x128xf32>
    %cst_218 = arith.constant dense<0.000000e+00> : vector<2xf32>
    %463 = vector.multi_reduction <add>, %462, %cst_218 [1] : vector<2x128xf32> to vector<2xf32>
    %464 = vector.shape_cast %463 : vector<2xf32> to vector<2x1xf32>
    %465 = math.log %464 : vector<2x1xf32>
    %466 = vector.broadcast %465 : vector<2x1xf32> to vector<2x128xf32>
    %467 = arith.subf %461, %466 : vector<2x128xf32>
    %c3_219 = arith.constant 3 : index
    %c0_220 = arith.constant 0 : index
    %c0_221 = arith.constant 0 : index
    %468 = vector.load %arg10[%c3_219, %c0_220, %c0_221] : memref<8x2x128xf32, #tpu.memory_space<vmem>>, vector<1x2x128xf32>
    %469 = vector.shape_cast %468 : vector<1x2x128xf32> to vector<2x128xf32>
    %470 = vector.shape_cast %467 : vector<2x128xf32> to vector<1x2x128xf32>
    tpu.vector_store %arg10[%c3_219, %c0_220, %c0_221], %470 {strides = array<i32>} : memref<8x2x128xf32, #tpu.memory_space<vmem>>, vector<1x2x128xf32>,
    %c6 = arith.constant 6 : index
    %c0_222 = arith.constant 0 : index
    %c0_223 = arith.constant 0 : index
    %471 = vector.load %arg1[%c6, %c0_222, %c0_223] : memref<8x2x12xf32, #tpu.memory_space<vmem>>, vector<1x2x12xf32>
    %472 = vector.shape_cast %471 : vector<1x2x12xf32> to vector<2x12xf32>
    %c0_224 = arith.constant 0 : index
    %c0_225 = arith.constant 0 : index
    %473 = vector.load %arg2[%c0_224, %c0_225] : memref<12x128xf32, #tpu.memory_space<vmem>>, vector<12x128xf32>
    %c0_226 = arith.constant 0 : index
    %c0_227 = arith.constant 0 : index
    %474 = vector.load %arg5[%c0_226, %c0_227] : memref<3x128xf32, #tpu.memory_space<vmem>>, vector<1x128xf32>
    %cst_228 = arith.constant dense<0.000000e+00> : vector<2x128xf32>
    %475 = tpu.matmul %472, %473, %cst_228 {dimension_numbers = #tpu.dot_dimension_numbers<[1], [0], [0], [1], [0, 0, 1, 1], [], []>} : vector<2x12xf32>, vector<12x128xf32>, vector<2x128xf32> -> vector<2x128xf32>
    %c0_229 = arith.constant 0 : index
    %c0_230 = arith.constant 0 : index
    %c0_231 = arith.constant 0 : index
    %476 = vector.load %arg4[%c0_229, %c0_230, %c0_231] : memref<3x32x128xf32, #tpu.memory_space<vmem>>, vector<1x32x128xf32>
    %477 = vector.shape_cast %476 : vector<1x32x128xf32> to vector<32x128xf32>
    %cst_232 = arith.constant dense<0.000000e+00> : vector<2x128xf32>
    %478 = tpu.matmul %402, %477, %cst_232 {dimension_numbers = #tpu.dot_dimension_numbers<[1], [0], [0], [1], [0, 0, 1, 1], [], []>} : vector<2x32xf32>, vector<32x128xf32>, vector<2x128xf32> -> vector<2x128xf32>
    %479 = arith.addf %475, %478 : vector<2x128xf32>
    %480 = vector.broadcast %474 : vector<1x128xf32> to vector<2x128xf32>
    %481 = arith.addf %479, %480 : vector<2x128xf32>
    %482 = arith.negf %481 : vector<2x128xf32>
    %483 = math.exp %482 : vector<2x128xf32>
    %cst_233 = arith.constant 1.000000e+00 : f32
    %484 = vector.broadcast %cst_233 : f32 to vector<2x128xf32>
    %485 = arith.addf %484, %483 : vector<2x128xf32>
    %486 = arith.divf %484, %485 : vector<2x128xf32>
    %487 = math.tanh %481 : vector<2x128xf32>
    %488 = vector.extract_strided_slice %486 {offsets = [0, 0], sizes = [2, 32], strides = [1, 1]} : vector<2x128xf32> to vector<2x32xf32>
    %489 = vector.extract_strided_slice %486 {offsets = [0, 32], sizes = [2, 32], strides = [1, 1]} : vector<2x128xf32> to vector<2x32xf32>
    %490 = vector.extract_strided_slice %487 {offsets = [0, 64], sizes = [2, 32], strides = [1, 1]} : vector<2x128xf32> to vector<2x32xf32>
    %491 = vector.extract_strided_slice %486 {offsets = [0, 96], sizes = [2, 32], strides = [1, 1]} : vector<2x128xf32> to vector<2x32xf32>
    %492 = arith.mulf %489, %400 : vector<2x32xf32>
    %493 = arith.mulf %488, %490 : vector<2x32xf32>
    %494 = arith.addf %492, %493 : vector<2x32xf32>
    %495 = math.tanh %494 : vector<2x32xf32>
    %496 = arith.mulf %491, %495 : vector<2x32xf32>
    %c0_234 = arith.constant 0 : index
    %c0_235 = arith.constant 0 : index
    %c0_236 = arith.constant 0 : index
    %497 = vector.load %arg3[%c0_234, %c0_235, %c0_236] : memref<2x32x128xf32, #tpu.memory_space<vmem>>, vector<1x32x128xf32>
    %498 = vector.shape_cast %497 : vector<1x32x128xf32> to vector<32x128xf32>
    %c1_237 = arith.constant 1 : index
    %c0_238 = arith.constant 0 : index
    %499 = vector.load %arg5[%c1_237, %c0_238] : memref<3x128xf32, #tpu.memory_space<vmem>>, vector<1x128xf32>
    %cst_239 = arith.constant dense<0.000000e+00> : vector<2x128xf32>
    %500 = tpu.matmul %402, %498, %cst_239 {dimension_numbers = #tpu.dot_dimension_numbers<[1], [0], [0], [1], [0, 0, 1, 1], [], []>} : vector<2x32xf32>, vector<32x128xf32>, vector<2x128xf32> -> vector<2x128xf32>
    %c1_240 = arith.constant 1 : index
    %c0_241 = arith.constant 0 : index
    %c0_242 = arith.constant 0 : index
    %501 = vector.load %arg4[%c1_240, %c0_241, %c0_242] : memref<3x32x128xf32, #tpu.memory_space<vmem>>, vector<1x32x128xf32>
    %502 = vector.shape_cast %501 : vector<1x32x128xf32> to vector<32x128xf32>
    %cst_243 = arith.constant dense<0.000000e+00> : vector<2x128xf32>
    %503 = tpu.matmul %427, %502, %cst_243 {dimension_numbers = #tpu.dot_dimension_numbers<[1], [0], [0], [1], [0, 0, 1, 1], [], []>} : vector<2x32xf32>, vector<32x128xf32>, vector<2x128xf32> -> vector<2x128xf32>
    %504 = arith.addf %500, %503 : vector<2x128xf32>
    %505 = vector.broadcast %499 : vector<1x128xf32> to vector<2x128xf32>
    %506 = arith.addf %504, %505 : vector<2x128xf32>
    %507 = arith.negf %506 : vector<2x128xf32>
    %508 = math.exp %507 : vector<2x128xf32>
    %cst_244 = arith.constant 1.000000e+00 : f32
    %509 = vector.broadcast %cst_244 : f32 to vector<2x128xf32>
    %510 = arith.addf %509, %508 : vector<2x128xf32>
    %511 = arith.divf %509, %510 : vector<2x128xf32>
    %512 = math.tanh %506 : vector<2x128xf32>
    %513 = vector.extract_strided_slice %511 {offsets = [0, 0], sizes = [2, 32], strides = [1, 1]} : vector<2x128xf32> to vector<2x32xf32>
    %514 = vector.extract_strided_slice %511 {offsets = [0, 32], sizes = [2, 32], strides = [1, 1]} : vector<2x128xf32> to vector<2x32xf32>
    %515 = vector.extract_strided_slice %512 {offsets = [0, 64], sizes = [2, 32], strides = [1, 1]} : vector<2x128xf32> to vector<2x32xf32>
    %516 = vector.extract_strided_slice %511 {offsets = [0, 96], sizes = [2, 32], strides = [1, 1]} : vector<2x128xf32> to vector<2x32xf32>
    %517 = arith.mulf %514, %425 : vector<2x32xf32>
    %518 = arith.mulf %513, %515 : vector<2x32xf32>
    %519 = arith.addf %517, %518 : vector<2x32xf32>
    %520 = math.tanh %519 : vector<2x32xf32>
    %521 = arith.mulf %516, %520 : vector<2x32xf32>
    %c1_245 = arith.constant 1 : index
    %c0_246 = arith.constant 0 : index
    %c0_247 = arith.constant 0 : index
    %522 = vector.load %arg3[%c1_245, %c0_246, %c0_247] : memref<2x32x128xf32, #tpu.memory_space<vmem>>, vector<1x32x128xf32>
    %523 = vector.shape_cast %522 : vector<1x32x128xf32> to vector<32x128xf32>
    %c2_248 = arith.constant 2 : index
    %c0_249 = arith.constant 0 : index
    %524 = vector.load %arg5[%c2_248, %c0_249] : memref<3x128xf32, #tpu.memory_space<vmem>>, vector<1x128xf32>
    %cst_250 = arith.constant dense<0.000000e+00> : vector<2x128xf32>
    %525 = tpu.matmul %427, %523, %cst_250 {dimension_numbers = #tpu.dot_dimension_numbers<[1], [0], [0], [1], [0, 0, 1, 1], [], []>} : vector<2x32xf32>, vector<32x128xf32>, vector<2x128xf32> -> vector<2x128xf32>
    %c2_251 = arith.constant 2 : index
    %c0_252 = arith.constant 0 : index
    %c0_253 = arith.constant 0 : index
    %526 = vector.load %arg4[%c2_251, %c0_252, %c0_253] : memref<3x32x128xf32, #tpu.memory_space<vmem>>, vector<1x32x128xf32>
    %527 = vector.shape_cast %526 : vector<1x32x128xf32> to vector<32x128xf32>
    %cst_254 = arith.constant dense<0.000000e+00> : vector<2x128xf32>
    %528 = tpu.matmul %452, %527, %cst_254 {dimension_numbers = #tpu.dot_dimension_numbers<[1], [0], [0], [1], [0, 0, 1, 1], [], []>} : vector<2x32xf32>, vector<32x128xf32>, vector<2x128xf32> -> vector<2x128xf32>
    %529 = arith.addf %525, %528 : vector<2x128xf32>
    %530 = vector.broadcast %524 : vector<1x128xf32> to vector<2x128xf32>
    %531 = arith.addf %529, %530 : vector<2x128xf32>
    %532 = arith.negf %531 : vector<2x128xf32>
    %533 = math.exp %532 : vector<2x128xf32>
    %cst_255 = arith.constant 1.000000e+00 : f32
    %534 = vector.broadcast %cst_255 : f32 to vector<2x128xf32>
    %535 = arith.addf %534, %533 : vector<2x128xf32>
    %536 = arith.divf %534, %535 : vector<2x128xf32>
    %537 = math.tanh %531 : vector<2x128xf32>
    %538 = vector.extract_strided_slice %536 {offsets = [0, 0], sizes = [2, 32], strides = [1, 1]} : vector<2x128xf32> to vector<2x32xf32>
    %539 = vector.extract_strided_slice %536 {offsets = [0, 32], sizes = [2, 32], strides = [1, 1]} : vector<2x128xf32> to vector<2x32xf32>
    %540 = vector.extract_strided_slice %537 {offsets = [0, 64], sizes = [2, 32], strides = [1, 1]} : vector<2x128xf32> to vector<2x32xf32>
    %541 = vector.extract_strided_slice %536 {offsets = [0, 96], sizes = [2, 32], strides = [1, 1]} : vector<2x128xf32> to vector<2x32xf32>
    %542 = arith.mulf %539, %450 : vector<2x32xf32>
    %543 = arith.mulf %538, %540 : vector<2x32xf32>
    %544 = arith.addf %542, %543 : vector<2x32xf32>
    %545 = math.tanh %544 : vector<2x32xf32>
    %546 = arith.mulf %541, %545 : vector<2x32xf32>
    %c0_256 = arith.constant 0 : index
    %c0_257 = arith.constant 0 : index
    %547 = vector.load %arg8[%c0_256, %c0_257] : memref<32x128xf32, #tpu.memory_space<vmem>>, vector<32x128xf32>
    %cst_258 = arith.constant dense<0.000000e+00> : vector<2x128xf32>
    %548 = tpu.matmul %546, %547, %cst_258 {dimension_numbers = #tpu.dot_dimension_numbers<[1], [0], [0], [1], [0, 0, 1, 1], [], []>} : vector<2x32xf32>, vector<32x128xf32>, vector<2x128xf32> -> vector<2x128xf32>
    %c0_259 = arith.constant 0 : index
    %c0_260 = arith.constant 0 : index
    %549 = vector.load %arg9[%c0_259, %c0_260] : memref<1x128xf32, #tpu.memory_space<vmem>>, vector<1x128xf32>
    %550 = vector.broadcast %549 : vector<1x128xf32> to vector<2x128xf32>
    %551 = arith.addf %548, %550 : vector<2x128xf32>
    %cst_261 = arith.constant dense<0xFF800000> : vector<2xf32>
    %552 = vector.multi_reduction <maximumf>, %551, %cst_261 [1] : vector<2x128xf32> to vector<2xf32>
    %553 = vector.shape_cast %552 : vector<2xf32> to vector<2x1xf32>
    %554 = vector.broadcast %553 : vector<2x1xf32> to vector<2x128xf32>
    %555 = arith.subf %551, %554 : vector<2x128xf32>
    %556 = math.exp %555 : vector<2x128xf32>
    %cst_262 = arith.constant dense<0.000000e+00> : vector<2xf32>
    %557 = vector.multi_reduction <add>, %556, %cst_262 [1] : vector<2x128xf32> to vector<2xf32>
    %558 = vector.shape_cast %557 : vector<2xf32> to vector<2x1xf32>
    %559 = math.log %558 : vector<2x1xf32>
    %560 = vector.broadcast %559 : vector<2x1xf32> to vector<2x128xf32>
    %561 = arith.subf %555, %560 : vector<2x128xf32>
    %c4_263 = arith.constant 4 : index
    %c0_264 = arith.constant 0 : index
    %c0_265 = arith.constant 0 : index
    %562 = vector.load %arg10[%c4_263, %c0_264, %c0_265] : memref<8x2x128xf32, #tpu.memory_space<vmem>>, vector<1x2x128xf32>
    %563 = vector.shape_cast %562 : vector<1x2x128xf32> to vector<2x128xf32>
    %564 = vector.shape_cast %561 : vector<2x128xf32> to vector<1x2x128xf32>
    tpu.vector_store %arg10[%c4_263, %c0_264, %c0_265], %564 {strides = array<i32>} : memref<8x2x128xf32, #tpu.memory_space<vmem>>, vector<1x2x128xf32>,
    %c7 = arith.constant 7 : index
    %c0_266 = arith.constant 0 : index
    %c0_267 = arith.constant 0 : index
    %565 = vector.load %arg1[%c7, %c0_266, %c0_267] : memref<8x2x12xf32, #tpu.memory_space<vmem>>, vector<1x2x12xf32>
    %566 = vector.shape_cast %565 : vector<1x2x12xf32> to vector<2x12xf32>
    %c0_268 = arith.constant 0 : index
    %c0_269 = arith.constant 0 : index
    %567 = vector.load %arg2[%c0_268, %c0_269] : memref<12x128xf32, #tpu.memory_space<vmem>>, vector<12x128xf32>
    %c0_270 = arith.constant 0 : index
    %c0_271 = arith.constant 0 : index
    %568 = vector.load %arg5[%c0_270, %c0_271] : memref<3x128xf32, #tpu.memory_space<vmem>>, vector<1x128xf32>
    %cst_272 = arith.constant dense<0.000000e+00> : vector<2x128xf32>
    %569 = tpu.matmul %566, %567, %cst_272 {dimension_numbers = #tpu.dot_dimension_numbers<[1], [0], [0], [1], [0, 0, 1, 1], [], []>} : vector<2x12xf32>, vector<12x128xf32>, vector<2x128xf32> -> vector<2x128xf32>
    %c0_273 = arith.constant 0 : index
    %c0_274 = arith.constant 0 : index
    %c0_275 = arith.constant 0 : index
    %570 = vector.load %arg4[%c0_273, %c0_274, %c0_275] : memref<3x32x128xf32, #tpu.memory_space<vmem>>, vector<1x32x128xf32>
    %571 = vector.shape_cast %570 : vector<1x32x128xf32> to vector<32x128xf32>
    %cst_276 = arith.constant dense<0.000000e+00> : vector<2x128xf32>
    %572 = tpu.matmul %496, %571, %cst_276 {dimension_numbers = #tpu.dot_dimension_numbers<[1], [0], [0], [1], [0, 0, 1, 1], [], []>} : vector<2x32xf32>, vector<32x128xf32>, vector<2x128xf32> -> vector<2x128xf32>
    %573 = arith.addf %569, %572 : vector<2x128xf32>
    %574 = vector.broadcast %568 : vector<1x128xf32> to vector<2x128xf32>
    %575 = arith.addf %573, %574 : vector<2x128xf32>
    %576 = arith.negf %575 : vector<2x128xf32>
    %577 = math.exp %576 : vector<2x128xf32>
    %cst_277 = arith.constant 1.000000e+00 : f32
    %578 = vector.broadcast %cst_277 : f32 to vector<2x128xf32>
    %579 = arith.addf %578, %577 : vector<2x128xf32>
    %580 = arith.divf %578, %579 : vector<2x128xf32>
    %581 = math.tanh %575 : vector<2x128xf32>
    %582 = vector.extract_strided_slice %580 {offsets = [0, 0], sizes = [2, 32], strides = [1, 1]} : vector<2x128xf32> to vector<2x32xf32>
    %583 = vector.extract_strided_slice %580 {offsets = [0, 32], sizes = [2, 32], strides = [1, 1]} : vector<2x128xf32> to vector<2x32xf32>
    %584 = vector.extract_strided_slice %581 {offsets = [0, 64], sizes = [2, 32], strides = [1, 1]} : vector<2x128xf32> to vector<2x32xf32>
    %585 = vector.extract_strided_slice %580 {offsets = [0, 96], sizes = [2, 32], strides = [1, 1]} : vector<2x128xf32> to vector<2x32xf32>
    %586 = arith.mulf %583, %494 : vector<2x32xf32>
    %587 = arith.mulf %582, %584 : vector<2x32xf32>
    %588 = arith.addf %586, %587 : vector<2x32xf32>
    %589 = math.tanh %588 : vector<2x32xf32>
    %590 = arith.mulf %585, %589 : vector<2x32xf32>
    %c0_278 = arith.constant 0 : index
    %c0_279 = arith.constant 0 : index
    %c0_280 = arith.constant 0 : index
    %591 = vector.load %arg3[%c0_278, %c0_279, %c0_280] : memref<2x32x128xf32, #tpu.memory_space<vmem>>, vector<1x32x128xf32>
    %592 = vector.shape_cast %591 : vector<1x32x128xf32> to vector<32x128xf32>
    %c1_281 = arith.constant 1 : index
    %c0_282 = arith.constant 0 : index
    %593 = vector.load %arg5[%c1_281, %c0_282] : memref<3x128xf32, #tpu.memory_space<vmem>>, vector<1x128xf32>
    %cst_283 = arith.constant dense<0.000000e+00> : vector<2x128xf32>
    %594 = tpu.matmul %496, %592, %cst_283 {dimension_numbers = #tpu.dot_dimension_numbers<[1], [0], [0], [1], [0, 0, 1, 1], [], []>} : vector<2x32xf32>, vector<32x128xf32>, vector<2x128xf32> -> vector<2x128xf32>
    %c1_284 = arith.constant 1 : index
    %c0_285 = arith.constant 0 : index
    %c0_286 = arith.constant 0 : index
    %595 = vector.load %arg4[%c1_284, %c0_285, %c0_286] : memref<3x32x128xf32, #tpu.memory_space<vmem>>, vector<1x32x128xf32>
    %596 = vector.shape_cast %595 : vector<1x32x128xf32> to vector<32x128xf32>
    %cst_287 = arith.constant dense<0.000000e+00> : vector<2x128xf32>
    %597 = tpu.matmul %521, %596, %cst_287 {dimension_numbers = #tpu.dot_dimension_numbers<[1], [0], [0], [1], [0, 0, 1, 1], [], []>} : vector<2x32xf32>, vector<32x128xf32>, vector<2x128xf32> -> vector<2x128xf32>
    %598 = arith.addf %594, %597 : vector<2x128xf32>
    %599 = vector.broadcast %593 : vector<1x128xf32> to vector<2x128xf32>
    %600 = arith.addf %598, %599 : vector<2x128xf32>
    %601 = arith.negf %600 : vector<2x128xf32>
    %602 = math.exp %601 : vector<2x128xf32>
    %cst_288 = arith.constant 1.000000e+00 : f32
    %603 = vector.broadcast %cst_288 : f32 to vector<2x128xf32>
    %604 = arith.addf %603, %602 : vector<2x128xf32>
    %605 = arith.divf %603, %604 : vector<2x128xf32>
    %606 = math.tanh %600 : vector<2x128xf32>
    %607 = vector.extract_strided_slice %605 {offsets = [0, 0], sizes = [2, 32], strides = [1, 1]} : vector<2x128xf32> to vector<2x32xf32>
    %608 = vector.extract_strided_slice %605 {offsets = [0, 32], sizes = [2, 32], strides = [1, 1]} : vector<2x128xf32> to vector<2x32xf32>
    %609 = vector.extract_strided_slice %606 {offsets = [0, 64], sizes = [2, 32], strides = [1, 1]} : vector<2x128xf32> to vector<2x32xf32>
    %610 = vector.extract_strided_slice %605 {offsets = [0, 96], sizes = [2, 32], strides = [1, 1]} : vector<2x128xf32> to vector<2x32xf32>
    %611 = arith.mulf %608, %519 : vector<2x32xf32>
    %612 = arith.mulf %607, %609 : vector<2x32xf32>
    %613 = arith.addf %611, %612 : vector<2x32xf32>
    %614 = math.tanh %613 : vector<2x32xf32>
    %615 = arith.mulf %610, %614 : vector<2x32xf32>
    %c1_289 = arith.constant 1 : index
    %c0_290 = arith.constant 0 : index
    %c0_291 = arith.constant 0 : index
    %616 = vector.load %arg3[%c1_289, %c0_290, %c0_291] : memref<2x32x128xf32, #tpu.memory_space<vmem>>, vector<1x32x128xf32>
    %617 = vector.shape_cast %616 : vector<1x32x128xf32> to vector<32x128xf32>
    %c2_292 = arith.constant 2 : index
    %c0_293 = arith.constant 0 : index
    %618 = vector.load %arg5[%c2_292, %c0_293] : memref<3x128xf32, #tpu.memory_space<vmem>>, vector<1x128xf32>
    %cst_294 = arith.constant dense<0.000000e+00> : vector<2x128xf32>
    %619 = tpu.matmul %521, %617, %cst_294 {dimension_numbers = #tpu.dot_dimension_numbers<[1], [0], [0], [1], [0, 0, 1, 1], [], []>} : vector<2x32xf32>, vector<32x128xf32>, vector<2x128xf32> -> vector<2x128xf32>
    %c2_295 = arith.constant 2 : index
    %c0_296 = arith.constant 0 : index
    %c0_297 = arith.constant 0 : index
    %620 = vector.load %arg4[%c2_295, %c0_296, %c0_297] : memref<3x32x128xf32, #tpu.memory_space<vmem>>, vector<1x32x128xf32>
    %621 = vector.shape_cast %620 : vector<1x32x128xf32> to vector<32x128xf32>
    %cst_298 = arith.constant dense<0.000000e+00> : vector<2x128xf32>
    %622 = tpu.matmul %546, %621, %cst_298 {dimension_numbers = #tpu.dot_dimension_numbers<[1], [0], [0], [1], [0, 0, 1, 1], [], []>} : vector<2x32xf32>, vector<32x128xf32>, vector<2x128xf32> -> vector<2x128xf32>
    %623 = arith.addf %619, %622 : vector<2x128xf32>
    %624 = vector.broadcast %618 : vector<1x128xf32> to vector<2x128xf32>
    %625 = arith.addf %623, %624 : vector<2x128xf32>
    %626 = arith.negf %625 : vector<2x128xf32>
    %627 = math.exp %626 : vector<2x128xf32>
    %cst_299 = arith.constant 1.000000e+00 : f32
    %628 = vector.broadcast %cst_299 : f32 to vector<2x128xf32>
    %629 = arith.addf %628, %627 : vector<2x128xf32>
    %630 = arith.divf %628, %629 : vector<2x128xf32>
    %631 = math.tanh %625 : vector<2x128xf32>
    %632 = vector.extract_strided_slice %630 {offsets = [0, 0], sizes = [2, 32], strides = [1, 1]} : vector<2x128xf32> to vector<2x32xf32>
    %633 = vector.extract_strided_slice %630 {offsets = [0, 32], sizes = [2, 32], strides = [1, 1]} : vector<2x128xf32> to vector<2x32xf32>
    %634 = vector.extract_strided_slice %631 {offsets = [0, 64], sizes = [2, 32], strides = [1, 1]} : vector<2x128xf32> to vector<2x32xf32>
    %635 = vector.extract_strided_slice %630 {offsets = [0, 96], sizes = [2, 32], strides = [1, 1]} : vector<2x128xf32> to vector<2x32xf32>
    %636 = arith.mulf %633, %544 : vector<2x32xf32>
    %637 = arith.mulf %632, %634 : vector<2x32xf32>
    %638 = arith.addf %636, %637 : vector<2x32xf32>
    %639 = math.tanh %638 : vector<2x32xf32>
    %640 = arith.mulf %635, %639 : vector<2x32xf32>
    %c0_300 = arith.constant 0 : index
    %c0_301 = arith.constant 0 : index
    %641 = vector.load %arg8[%c0_300, %c0_301] : memref<32x128xf32, #tpu.memory_space<vmem>>, vector<32x128xf32>
    %cst_302 = arith.constant dense<0.000000e+00> : vector<2x128xf32>
    %642 = tpu.matmul %640, %641, %cst_302 {dimension_numbers = #tpu.dot_dimension_numbers<[1], [0], [0], [1], [0, 0, 1, 1], [], []>} : vector<2x32xf32>, vector<32x128xf32>, vector<2x128xf32> -> vector<2x128xf32>
    %c0_303 = arith.constant 0 : index
    %c0_304 = arith.constant 0 : index
    %643 = vector.load %arg9[%c0_303, %c0_304] : memref<1x128xf32, #tpu.memory_space<vmem>>, vector<1x128xf32>
    %644 = vector.broadcast %643 : vector<1x128xf32> to vector<2x128xf32>
    %645 = arith.addf %642, %644 : vector<2x128xf32>
    %cst_305 = arith.constant dense<0xFF800000> : vector<2xf32>
    %646 = vector.multi_reduction <maximumf>, %645, %cst_305 [1] : vector<2x128xf32> to vector<2xf32>
    %647 = vector.shape_cast %646 : vector<2xf32> to vector<2x1xf32>
    %648 = vector.broadcast %647 : vector<2x1xf32> to vector<2x128xf32>
    %649 = arith.subf %645, %648 : vector<2x128xf32>
    %650 = math.exp %649 : vector<2x128xf32>
    %cst_306 = arith.constant dense<0.000000e+00> : vector<2xf32>
    %651 = vector.multi_reduction <add>, %650, %cst_306 [1] : vector<2x128xf32> to vector<2xf32>
    %652 = vector.shape_cast %651 : vector<2xf32> to vector<2x1xf32>
    %653 = math.log %652 : vector<2x1xf32>
    %654 = vector.broadcast %653 : vector<2x1xf32> to vector<2x128xf32>
    %655 = arith.subf %649, %654 : vector<2x128xf32>
    %c5_307 = arith.constant 5 : index
    %c0_308 = arith.constant 0 : index
    %c0_309 = arith.constant 0 : index
    %656 = vector.load %arg10[%c5_307, %c0_308, %c0_309] : memref<8x2x128xf32, #tpu.memory_space<vmem>>, vector<1x2x128xf32>
    %657 = vector.shape_cast %656 : vector<1x2x128xf32> to vector<2x128xf32>
    %658 = vector.shape_cast %655 : vector<2x128xf32> to vector<1x2x128xf32>
    tpu.vector_store %arg10[%c5_307, %c0_308, %c0_309], %658 {strides = array<i32>} : memref<8x2x128xf32, #tpu.memory_space<vmem>>, vector<1x2x128xf32>,
    %c0_310 = arith.constant 0 : index
    %c0_311 = arith.constant 0 : index
    %c0_312 = arith.constant 0 : index
    %659 = vector.load %arg3[%c0_310, %c0_311, %c0_312] : memref<2x32x128xf32, #tpu.memory_space<vmem>>, vector<1x32x128xf32>
    %660 = vector.shape_cast %659 : vector<1x32x128xf32> to vector<32x128xf32>
    %c1_313 = arith.constant 1 : index
    %c0_314 = arith.constant 0 : index
    %661 = vector.load %arg5[%c1_313, %c0_314] : memref<3x128xf32, #tpu.memory_space<vmem>>, vector<1x128xf32>
    %cst_315 = arith.constant dense<0.000000e+00> : vector<2x128xf32>
    %662 = tpu.matmul %590, %660, %cst_315 {dimension_numbers = #tpu.dot_dimension_numbers<[1], [0], [0], [1], [0, 0, 1, 1], [], []>} : vector<2x32xf32>, vector<32x128xf32>, vector<2x128xf32> -> vector<2x128xf32>
    %c1_316 = arith.constant 1 : index
    %c0_317 = arith.constant 0 : index
    %c0_318 = arith.constant 0 : index
    %663 = vector.load %arg4[%c1_316, %c0_317, %c0_318] : memref<3x32x128xf32, #tpu.memory_space<vmem>>, vector<1x32x128xf32>
    %664 = vector.shape_cast %663 : vector<1x32x128xf32> to vector<32x128xf32>
    %cst_319 = arith.constant dense<0.000000e+00> : vector<2x128xf32>
    %665 = tpu.matmul %615, %664, %cst_319 {dimension_numbers = #tpu.dot_dimension_numbers<[1], [0], [0], [1], [0, 0, 1, 1], [], []>} : vector<2x32xf32>, vector<32x128xf32>, vector<2x128xf32> -> vector<2x128xf32>
    %666 = arith.addf %662, %665 : vector<2x128xf32>
    %667 = vector.broadcast %661 : vector<1x128xf32> to vector<2x128xf32>
    %668 = arith.addf %666, %667 : vector<2x128xf32>
    %669 = arith.negf %668 : vector<2x128xf32>
    %670 = math.exp %669 : vector<2x128xf32>
    %cst_320 = arith.constant 1.000000e+00 : f32
    %671 = vector.broadcast %cst_320 : f32 to vector<2x128xf32>
    %672 = arith.addf %671, %670 : vector<2x128xf32>
    %673 = arith.divf %671, %672 : vector<2x128xf32>
    %674 = math.tanh %668 : vector<2x128xf32>
    %675 = vector.extract_strided_slice %673 {offsets = [0, 0], sizes = [2, 32], strides = [1, 1]} : vector<2x128xf32> to vector<2x32xf32>
    %676 = vector.extract_strided_slice %673 {offsets = [0, 32], sizes = [2, 32], strides = [1, 1]} : vector<2x128xf32> to vector<2x32xf32>
    %677 = vector.extract_strided_slice %674 {offsets = [0, 64], sizes = [2, 32], strides = [1, 1]} : vector<2x128xf32> to vector<2x32xf32>
    %678 = vector.extract_strided_slice %673 {offsets = [0, 96], sizes = [2, 32], strides = [1, 1]} : vector<2x128xf32> to vector<2x32xf32>
    %679 = arith.mulf %676, %613 : vector<2x32xf32>
    %680 = arith.mulf %675, %677 : vector<2x32xf32>
    %681 = arith.addf %679, %680 : vector<2x32xf32>
    %682 = math.tanh %681 : vector<2x32xf32>
    %683 = arith.mulf %678, %682 : vector<2x32xf32>
    %c1_321 = arith.constant 1 : index
    %c0_322 = arith.constant 0 : index
    %c0_323 = arith.constant 0 : index
    %684 = vector.load %arg3[%c1_321, %c0_322, %c0_323] : memref<2x32x128xf32, #tpu.memory_space<vmem>>, vector<1x32x128xf32>
    %685 = vector.shape_cast %684 : vector<1x32x128xf32> to vector<32x128xf32>
    %c2_324 = arith.constant 2 : index
    %c0_325 = arith.constant 0 : index
    %686 = vector.load %arg5[%c2_324, %c0_325] : memref<3x128xf32, #tpu.memory_space<vmem>>, vector<1x128xf32>
    %cst_326 = arith.constant dense<0.000000e+00> : vector<2x128xf32>
    %687 = tpu.matmul %615, %685, %cst_326 {dimension_numbers = #tpu.dot_dimension_numbers<[1], [0], [0], [1], [0, 0, 1, 1], [], []>} : vector<2x32xf32>, vector<32x128xf32>, vector<2x128xf32> -> vector<2x128xf32>
    %c2_327 = arith.constant 2 : index
    %c0_328 = arith.constant 0 : index
    %c0_329 = arith.constant 0 : index
    %688 = vector.load %arg4[%c2_327, %c0_328, %c0_329] : memref<3x32x128xf32, #tpu.memory_space<vmem>>, vector<1x32x128xf32>
    %689 = vector.shape_cast %688 : vector<1x32x128xf32> to vector<32x128xf32>
    %cst_330 = arith.constant dense<0.000000e+00> : vector<2x128xf32>
    %690 = tpu.matmul %640, %689, %cst_330 {dimension_numbers = #tpu.dot_dimension_numbers<[1], [0], [0], [1], [0, 0, 1, 1], [], []>} : vector<2x32xf32>, vector<32x128xf32>, vector<2x128xf32> -> vector<2x128xf32>
    %691 = arith.addf %687, %690 : vector<2x128xf32>
    %692 = vector.broadcast %686 : vector<1x128xf32> to vector<2x128xf32>
    %693 = arith.addf %691, %692 : vector<2x128xf32>
    %694 = arith.negf %693 : vector<2x128xf32>
    %695 = math.exp %694 : vector<2x128xf32>
    %cst_331 = arith.constant 1.000000e+00 : f32
    %696 = vector.broadcast %cst_331 : f32 to vector<2x128xf32>
    %697 = arith.addf %696, %695 : vector<2x128xf32>
    %698 = arith.divf %696, %697 : vector<2x128xf32>
    %699 = math.tanh %693 : vector<2x128xf32>
    %700 = vector.extract_strided_slice %698 {offsets = [0, 0], sizes = [2, 32], strides = [1, 1]} : vector<2x128xf32> to vector<2x32xf32>
    %701 = vector.extract_strided_slice %698 {offsets = [0, 32], sizes = [2, 32], strides = [1, 1]} : vector<2x128xf32> to vector<2x32xf32>
    %702 = vector.extract_strided_slice %699 {offsets = [0, 64], sizes = [2, 32], strides = [1, 1]} : vector<2x128xf32> to vector<2x32xf32>
    %703 = vector.extract_strided_slice %698 {offsets = [0, 96], sizes = [2, 32], strides = [1, 1]} : vector<2x128xf32> to vector<2x32xf32>
    %704 = arith.mulf %701, %638 : vector<2x32xf32>
    %705 = arith.mulf %700, %702 : vector<2x32xf32>
    %706 = arith.addf %704, %705 : vector<2x32xf32>
    %707 = math.tanh %706 : vector<2x32xf32>
    %708 = arith.mulf %703, %707 : vector<2x32xf32>
    %c0_332 = arith.constant 0 : index
    %c0_333 = arith.constant 0 : index
    %709 = vector.load %arg8[%c0_332, %c0_333] : memref<32x128xf32, #tpu.memory_space<vmem>>, vector<32x128xf32>
    %cst_334 = arith.constant dense<0.000000e+00> : vector<2x128xf32>
    %710 = tpu.matmul %708, %709, %cst_334 {dimension_numbers = #tpu.dot_dimension_numbers<[1], [0], [0], [1], [0, 0, 1, 1], [], []>} : vector<2x32xf32>, vector<32x128xf32>, vector<2x128xf32> -> vector<2x128xf32>
    %c0_335 = arith.constant 0 : index
    %c0_336 = arith.constant 0 : index
    %711 = vector.load %arg9[%c0_335, %c0_336] : memref<1x128xf32, #tpu.memory_space<vmem>>, vector<1x128xf32>
    %712 = vector.broadcast %711 : vector<1x128xf32> to vector<2x128xf32>
    %713 = arith.addf %710, %712 : vector<2x128xf32>
    %cst_337 = arith.constant dense<0xFF800000> : vector<2xf32>
    %714 = vector.multi_reduction <maximumf>, %713, %cst_337 [1] : vector<2x128xf32> to vector<2xf32>
    %715 = vector.shape_cast %714 : vector<2xf32> to vector<2x1xf32>
    %716 = vector.broadcast %715 : vector<2x1xf32> to vector<2x128xf32>
    %717 = arith.subf %713, %716 : vector<2x128xf32>
    %718 = math.exp %717 : vector<2x128xf32>
    %cst_338 = arith.constant dense<0.000000e+00> : vector<2xf32>
    %719 = vector.multi_reduction <add>, %718, %cst_338 [1] : vector<2x128xf32> to vector<2xf32>
    %720 = vector.shape_cast %719 : vector<2xf32> to vector<2x1xf32>
    %721 = math.log %720 : vector<2x1xf32>
    %722 = vector.broadcast %721 : vector<2x1xf32> to vector<2x128xf32>
    %723 = arith.subf %717, %722 : vector<2x128xf32>
    %c6_339 = arith.constant 6 : index
    %c0_340 = arith.constant 0 : index
    %c0_341 = arith.constant 0 : index
    %724 = vector.load %arg10[%c6_339, %c0_340, %c0_341] : memref<8x2x128xf32, #tpu.memory_space<vmem>>, vector<1x2x128xf32>
    %725 = vector.shape_cast %724 : vector<1x2x128xf32> to vector<2x128xf32>
    %726 = vector.shape_cast %723 : vector<2x128xf32> to vector<1x2x128xf32>
    tpu.vector_store %arg10[%c6_339, %c0_340, %c0_341], %726 {strides = array<i32>} : memref<8x2x128xf32, #tpu.memory_space<vmem>>, vector<1x2x128xf32>,
    %c1_342 = arith.constant 1 : index
    %c0_343 = arith.constant 0 : index
    %c0_344 = arith.constant 0 : index
    %727 = vector.load %arg3[%c1_342, %c0_343, %c0_344] : memref<2x32x128xf32, #tpu.memory_space<vmem>>, vector<1x32x128xf32>
    %728 = vector.shape_cast %727 : vector<1x32x128xf32> to vector<32x128xf32>
    %c2_345 = arith.constant 2 : index
    %c0_346 = arith.constant 0 : index
    %729 = vector.load %arg5[%c2_345, %c0_346] : memref<3x128xf32, #tpu.memory_space<vmem>>, vector<1x128xf32>
    %cst_347 = arith.constant dense<0.000000e+00> : vector<2x128xf32>
    %730 = tpu.matmul %683, %728, %cst_347 {dimension_numbers = #tpu.dot_dimension_numbers<[1], [0], [0], [1], [0, 0, 1, 1], [], []>} : vector<2x32xf32>, vector<32x128xf32>, vector<2x128xf32> -> vector<2x128xf32>
    %c2_348 = arith.constant 2 : index
    %c0_349 = arith.constant 0 : index
    %c0_350 = arith.constant 0 : index
    %731 = vector.load %arg4[%c2_348, %c0_349, %c0_350] : memref<3x32x128xf32, #tpu.memory_space<vmem>>, vector<1x32x128xf32>
    %732 = vector.shape_cast %731 : vector<1x32x128xf32> to vector<32x128xf32>
    %cst_351 = arith.constant dense<0.000000e+00> : vector<2x128xf32>
    %733 = tpu.matmul %708, %732, %cst_351 {dimension_numbers = #tpu.dot_dimension_numbers<[1], [0], [0], [1], [0, 0, 1, 1], [], []>} : vector<2x32xf32>, vector<32x128xf32>, vector<2x128xf32> -> vector<2x128xf32>
    %734 = arith.addf %730, %733 : vector<2x128xf32>
    %735 = vector.broadcast %729 : vector<1x128xf32> to vector<2x128xf32>
    %736 = arith.addf %734, %735 : vector<2x128xf32>
    %737 = arith.negf %736 : vector<2x128xf32>
    %738 = math.exp %737 : vector<2x128xf32>
    %cst_352 = arith.constant 1.000000e+00 : f32
    %739 = vector.broadcast %cst_352 : f32 to vector<2x128xf32>
    %740 = arith.addf %739, %738 : vector<2x128xf32>
    %741 = arith.divf %739, %740 : vector<2x128xf32>
    %742 = math.tanh %736 : vector<2x128xf32>
    %743 = vector.extract_strided_slice %741 {offsets = [0, 0], sizes = [2, 32], strides = [1, 1]} : vector<2x128xf32> to vector<2x32xf32>
    %744 = vector.extract_strided_slice %741 {offsets = [0, 32], sizes = [2, 32], strides = [1, 1]} : vector<2x128xf32> to vector<2x32xf32>
    %745 = vector.extract_strided_slice %742 {offsets = [0, 64], sizes = [2, 32], strides = [1, 1]} : vector<2x128xf32> to vector<2x32xf32>
    %746 = vector.extract_strided_slice %741 {offsets = [0, 96], sizes = [2, 32], strides = [1, 1]} : vector<2x128xf32> to vector<2x32xf32>
    %747 = arith.mulf %744, %706 : vector<2x32xf32>
    %748 = arith.mulf %743, %745 : vector<2x32xf32>
    %749 = arith.addf %747, %748 : vector<2x32xf32>
    %750 = math.tanh %749 : vector<2x32xf32>
    %751 = arith.mulf %746, %750 : vector<2x32xf32>
    %c0_353 = arith.constant 0 : index
    %c0_354 = arith.constant 0 : index
    %752 = vector.load %arg8[%c0_353, %c0_354] : memref<32x128xf32, #tpu.memory_space<vmem>>, vector<32x128xf32>
    %cst_355 = arith.constant dense<0.000000e+00> : vector<2x128xf32>
    %753 = tpu.matmul %751, %752, %cst_355 {dimension_numbers = #tpu.dot_dimension_numbers<[1], [0], [0], [1], [0, 0, 1, 1], [], []>} : vector<2x32xf32>, vector<32x128xf32>, vector<2x128xf32> -> vector<2x128xf32>
    %c0_356 = arith.constant 0 : index
    %c0_357 = arith.constant 0 : index
    %754 = vector.load %arg9[%c0_356, %c0_357] : memref<1x128xf32, #tpu.memory_space<vmem>>, vector<1x128xf32>
    %755 = vector.broadcast %754 : vector<1x128xf32> to vector<2x128xf32>
    %756 = arith.addf %753, %755 : vector<2x128xf32>
    %cst_358 = arith.constant dense<0xFF800000> : vector<2xf32>
    %757 = vector.multi_reduction <maximumf>, %756, %cst_358 [1] : vector<2x128xf32> to vector<2xf32>
    %758 = vector.shape_cast %757 : vector<2xf32> to vector<2x1xf32>
    %759 = vector.broadcast %758 : vector<2x1xf32> to vector<2x128xf32>
    %760 = arith.subf %756, %759 : vector<2x128xf32>
    %761 = math.exp %760 : vector<2x128xf32>
    %cst_359 = arith.constant dense<0.000000e+00> : vector<2xf32>
    %762 = vector.multi_reduction <add>, %761, %cst_359 [1] : vector<2x128xf32> to vector<2xf32>
    %763 = vector.shape_cast %762 : vector<2xf32> to vector<2x1xf32>
    %764 = math.log %763 : vector<2x1xf32>
    %765 = vector.broadcast %764 : vector<2x1xf32> to vector<2x128xf32>
    %766 = arith.subf %760, %765 : vector<2x128xf32>
    %c7_360 = arith.constant 7 : index
    %c0_361 = arith.constant 0 : index
    %c0_362 = arith.constant 0 : index
    %767 = vector.load %arg10[%c7_360, %c0_361, %c0_362] : memref<8x2x128xf32, #tpu.memory_space<vmem>>, vector<1x2x128xf32>
    %768 = vector.shape_cast %767 : vector<1x2x128xf32> to vector<2x128xf32>
    %769 = vector.shape_cast %766 : vector<2x128xf32> to vector<1x2x128xf32>
    tpu.vector_store %arg10[%c7_360, %c0_361, %c0_362], %769 {strides = array<i32>} : memref<8x2x128xf32, #tpu.memory_space<vmem>>, vector<1x2x128xf32>,
    return
  }
  func.func @transform_0(%arg0: i32) -> (i32, i32, i32) {
    %c0_i32 = arith.constant 0 : i32
    %c0_i32_0 = arith.constant 0 : i32
    %c0_i32_1 = arith.constant 0 : i32
    return %c0_i32, %arg0, %c0_i32_0 : i32, i32, i32
  }
  func.func @transform_1(%arg0: i32) -> (i32, i32) {
    %c0_i32 = arith.constant 0 : i32
    %c0_i32_0 = arith.constant 0 : i32
    %c0_i32_1 = arith.constant 0 : i32
    return %c0_i32, %c0_i32_0 : i32, i32
  }
  func.func @transform_2(%arg0: i32) -> (i32, i32, i32) {
    %c0_i32 = arith.constant 0 : i32
    %c0_i32_0 = arith.constant 0 : i32
    %c0_i32_1 = arith.constant 0 : i32
    %c0_i32_2 = arith.constant 0 : i32
    return %c0_i32, %c0_i32_0, %c0_i32_1 : i32, i32, i32
  }
  func.func @transform_3(%arg0: i32) -> (i32, i32, i32) {
    %c0_i32 = arith.constant 0 : i32
    %c0_i32_0 = arith.constant 0 : i32
    %c0_i32_1 = arith.constant 0 : i32
    %c0_i32_2 = arith.constant 0 : i32
    return %c0_i32, %c0_i32_0, %c0_i32_1 : i32, i32, i32
  }
  func.func @transform_4(%arg0: i32) -> (i32, i32) {
    %c0_i32 = arith.constant 0 : i32
    %c0_i32_0 = arith.constant 0 : i32
    %c0_i32_1 = arith.constant 0 : i32
    return %c0_i32, %c0_i32_0 : i32, i32
  }
  func.func @transform_5(%arg0: i32) -> (i32, i32) {
    %c0_i32 = arith.constant 0 : i32
    %c0_i32_0 = arith.constant 0 : i32
    %c0_i32_1 = arith.constant 0 : i32
    return %c0_i32, %c0_i32_0 : i32, i32
  }
  func.func @transform_6(%arg0: i32) -> (i32, i32) {
    %c0_i32 = arith.constant 0 : i32
    %c0_i32_0 = arith.constant 0 : i32
    %c0_i32_1 = arith.constant 0 : i32
    return %c0_i32, %c0_i32_0 : i32, i32
  }
  func.func @transform_7(%arg0: i32) -> (i32, i32) {
    %c0_i32 = arith.constant 0 : i32
    %c0_i32_0 = arith.constant 0 : i32
    %c0_i32_1 = arith.constant 0 : i32
    return %c0_i32, %c0_i32_0 : i32, i32
  }
  func.func @transform_8(%arg0: i32) -> (i32, i32) {
    %c0_i32 = arith.constant 0 : i32
    %c0_i32_0 = arith.constant 0 : i32
    %c0_i32_1 = arith.constant 0 : i32
    return %c0_i32, %c0_i32_0 : i32, i32
  }
  func.func @transform_9(%arg0: i32) -> (i32, i32, i32) {
    %c0_i32 = arith.constant 0 : i32
    %c0_i32_0 = arith.constant 0 : i32
    %c0_i32_1 = arith.constant 0 : i32
    return %c0_i32, %arg0, %c0_i32_0 : i32, i32, i32
  }
}

</mosaic_0001>

<bundles_post_ra>
// kernel: tpu_custom_call.1
= control target key start
LH: loop header
LB: loop body
LE: loop exit
PB: predicated region body
PF: predicated region fallthrough
CT: control target
= control target key end

     0   :  { %14 = vsyncpa [#allocation3], 0  ;;  %s7803_s0 = inlined_call_operand.hbm [shape: f32[8,2,12], index: 0, kind: input, shape index: {}]   ;;  %s7804_s1 = inlined_call_operand.hbm [shape: f32[12,128], index: 1, kind: input, shape index: {}]   ;;  %s7805_s2 = inlined_call_operand.hbm [shape: f32[2,32,128], index: 2, kind: input, shape index: {}]   ;;  %s7806_s3 = inlined_call_operand.hbm [shape: f32[3,32,128], index: 3, kind: input, shape index: {}]   ;;  %s7807_s4 = inlined_call_operand.vmem [shape: f32[3,128], index: 4, kind: input, shape index: {}]   ;;  %s7808_s5 = inlined_call_operand.vmem [shape: f32[3,32], index: 5, kind: input, shape index: {}]   ;;  %s7809_s6 = inlined_call_operand.hbm [shape: f32[3,32], index: 6, kind: input, shape index: {}]   ;;  %s7810_s7 = inlined_call_operand.hbm [shape: f32[32,128], index: 7, kind: input, shape index: {}]   ;;  %s7811_s8 = inlined_call_operand.vmem [shape: f32[1,128], index: 8, kind: input, shape index: {}]   ;;  %s7812_s9 = inlined_call_operand.hbm [shape: f32[8,2,128], index: 9, kind: output, shape index: {}]  }
   0x1   :  { %15 = vsyncpa [#allocation6], 0 }
   0x2   :  { %16 = vsyncpa [#allocation9], 0 }
   0x3   :  { %17 = vsyncpa [#allocation12], 0 }
   0x4   :  { %18 = vsyncpa [#allocation4], 0  ;;  %s6707_s30 = smov [#allocation5]  }
   0x5   :  { %s36_s10 = sshll.u32 %s6707_s30, 4  ;;  %s37_s10 = int_to_ptr.vmem [resolvable:$true] %s36_s10 }
   0x6   :  { %s6565_s11 = scalar_lea.vmem %s37_s10, 256  ;;  %p6570_p1 = scmp.lt.s32.totalorder %s37_s10, %s37_s10 }
   0x7   :  { %p6566_p0 = scmp.ne.s32.totalorder %s37_s10, %s6565_s11  ;;  %p6571_p2 = scmp.lt.s32.totalorder %s6565_s11, %s6565_s11 }
   0x9   :  { %p6572_p3 = por %p6571_p2, %p6570_p1 }
   0xb   :  { %p6573_p4 = pnand %p6572_p3, %p6566_p0 }
   0xd   :  { %6576 = shalt.err (!%p6573_p4)
}
   0xe   :  { %s6708_s12 = smov 128   ;;  %s6709_s13 = smov 8  }
   0xf   :  { %42 = dma.hbm_to_vmem [thread:$0]  %s7804_s1, 256, %s37_s10, [#allocation6], %s6708_s12, %s6708_s12, %s6709_s13  }
  0x10   :  { %s6710_s16 = smov [#allocation8]   ;;  %s6711_s18 = smov [#allocation2]  }
  0x11   :  { %s60_s17 = sshll.u32 %s6710_s16, 4  ;;  %s24_s19 = sshll.u32 %s6711_s18, 4  ;;  %s61_s17 = int_to_ptr.vmem [resolvable:$true] %s60_s17  ;;  %s25_s19 = int_to_ptr.vmem [resolvable:$true] %s24_s19 }
  0x12   :  { %s6585_s20 = scalar_lea.vmem %s61_s17, 1536  ;;  %p6590_p6 = scmp.lt.s32.totalorder %s61_s17, %s61_s17 }
  0x13   :  { %p6586_p5 = scmp.ne.s32.totalorder %s61_s17, %s6585_s20  ;;  %p6591_p7 = scmp.lt.s32.totalorder %s6585_s20, %s6585_s20 }
  0x15   :  { %p6592_p8 = por %p6591_p7, %p6590_p6 }
  0x17   :  { %p6593_p9 = pnand %p6592_p8, %p6586_p5 }
  0x19   :  { %6596 = shalt.err (!%p6593_p9)
}
  0x1a   :  { %66 = dma.hbm_to_vmem [thread:$0]  %s7806_s3, 1536, %s61_s17, [#allocation9], %s6708_s12, %s6708_s12, %s6709_s13  }
  0x1b   :  { %s6605_s1 = scalar_lea.vmem %s25_s19, 256  ;;  %p6610_p11 = scmp.lt.s32.totalorder %s25_s19, %s25_s19 }
  0x1c   :  { %p6606_p10 = scmp.ne.s32.totalorder %s25_s19, %s6605_s1  ;;  %p6611_p12 = scmp.lt.s32.totalorder %s6605_s1, %s6605_s1 }
  0x1e   :  { %p6612_p13 = por %p6611_p12, %p6610_p11 }
  0x20   :  { %p6613_p0 = pnand %p6612_p13, %p6606_p10 }
  0x22   :  { %6616 = shalt.err (!%p6613_p0)
}
  0x23   :  { %s6712_s23 = smov 32   ;;  %s6713_s24 = smov 2  }
  0x24   :  { %30 = dma.hbm_to_vmem [thread:$0]  %s7803_s0, 256, %s25_s19, [#allocation3], %s6712_s23, %s6712_s23, %s6713_s24  }
  0x25   :  { %s6714_s27 = smov [#allocation7]   ;;  %s6715_s3 = smov [#allocation10]  }
  0x26   :  { %s48_s28 = sshll.u32 %s6714_s27, 4  ;;  %s77_s29 = sshll.u32 %s6715_s3, 4  ;;  %s49_s28 = int_to_ptr.vmem [resolvable:$true] %s48_s28  ;;  %s78_s29 = int_to_ptr.vmem [resolvable:$true] %s77_s29 }
  0x27   :  { %s6625_s30 = scalar_lea.vmem %s49_s28, 1024  ;;  %p6630_p2 = scmp.lt.s32.totalorder %s49_s28, %s49_s28 }
  0x28   :  { %p6626_p1 = scmp.ne.s32.totalorder %s49_s28, %s6625_s30  ;;  %p6631_p3 = scmp.lt.s32.totalorder %s6625_s30, %s6625_s30 }
  0x2a   :  { %p6632_p4 = por %p6631_p3, %p6630_p2 }
  0x2c   :  { %p6633_p5 = pnand %p6632_p4, %p6626_p1 }
  0x2e   :  { %6636 = shalt.err (!%p6633_p5)
}
  0x2f   :  { %54 = dma.hbm_to_vmem [thread:$0]  %s7805_s2, 1024, %s49_s28, [#allocation6], %s6708_s12, %s6708_s12, %s6709_s13  }
  0x30   :  { %s6645_s0 = scalar_lea.vmem %s78_s29, 64  ;;  %p6650_p7 = scmp.lt.s32.totalorder %s78_s29, %s78_s29 }
  0x31   :  { %p6646_p6 = scmp.ne.s32.totalorder %s78_s29, %s6645_s0  ;;  %p6651_p8 = scmp.lt.s32.totalorder %s6645_s0, %s6645_s0 }
  0x33   :  { %p6652_p9 = por %p6651_p8, %p6650_p7 }
  0x35   :  { %p6653_p10 = pnand %p6652_p9, %p6646_p6 }
  0x37   :  { %6656 = shalt.err (!%p6653_p10)
}
  0x38   :  { %80 = dma.hbm_to_vmem [thread:$0]  %s7809_s6, 64, %s78_s29, [#allocation9]  }
  0x39   :  { %s6716_s16 = smov [#allocation11]  }
  0x3a   :  { %s86_s17 = sshll.u32 %s6716_s16, 4  ;;  %s87_s17 = int_to_ptr.vmem [resolvable:$true] %s86_s17 }
  0x3b   :  { %s6665_s18 = scalar_lea.vmem %s87_s17, 512  ;;  %p6670_p12 = scmp.lt.s32.totalorder %s87_s17, %s87_s17 }
  0x3c   :  { %p6666_p11 = scmp.ne.s32.totalorder %s87_s17, %s6665_s18  ;;  %p6671_p13 = scmp.lt.s32.totalorder %s6665_s18, %s6665_s18 }
  0x3e   :  { %p6672_p0 = por %p6671_p13, %p6670_p12 }
  0x40   :  { %p6673_p1 = pnand %p6672_p0, %p6666_p11 }
  0x42   :  { %6676 = shalt.err (!%p6673_p1)
}
  0x43   :  { %92 = dma.hbm_to_vmem [thread:$0]  %s7810_s7, 512, %s87_s17, [#allocation12], %s6708_s12, %s6708_s12, %s6709_s13  }
  0x44   :  { %6697 = dma.done.wait [#allocation3], 256  }
  0x45   :  { %6698 = vsyncadd [#allocation3], 4294967040 }
  0x46   :  { %6699 = dma.done.wait [#allocation6], 1280  }
  0x47   :  { %6700 = vsyncadd [#allocation6], 4294966016 }
  0x48   :  { %6701 = dma.done.wait [#allocation9], 1600  }
  0x49   :  { %6702 = vsyncadd [#allocation9], 4294965696 }
  0x4a   :  { %6703 = dma.done.wait [#allocation12], 512  }
  0x4b   :  { %6704 = vsyncadd [#allocation12], 4294966784  ;;  %v6717_v0 = vmov 0.0   ;;  %vm6718_vm0 = vmmov 0   ;;  %vm229_vm1 = vcmask 1043456   ;;  %v6810_v1 = vld [vmem:[#allocation8 + $0x18] sm:$0xff] }
  0x4c   :  { %5735 = vmatprep.subr.mxu0 %v6717_v0  ;;  %5746 = vmatprep.subr.mxu1 %v6717_v0  ;;  %v6812_v2 = vld [vmem:[#allocation8 + $0x10] sm:$0xff]  ;;  %v6814_v3 = vld [vmem:[#allocation5 + $0x8] sm:$0xf]  ;;  %v143_v5 = vld [vmem:[#allocation2] sm:$0x3]  ;;  %vm225_vm2 = vcmask 97280  }
  0x4d   :  { %5750 = vmatprep.mubr.msk.f32.mxu1 %vm6718_vm0, %v6717_v0  ;;  %5743 = vmatprep.mubr.msk.f32.mxu0 %vm6718_vm0, %v6717_v0  ;;  %v6819_v4 = vld [vmem:[#allocation5] sm:$0xff]  ;;  %v6823_v6 = vld [vmem:[#allocation8 + $0x8] sm:$0xff]  ;;  %v6829_v7 = vld [vmem:[#allocation8] sm:$0xff]  ;;  %vm151_vm3 = vcmask 261120   ;;  %s6719_s20 = smov 64   ;;  %vm1315_vm4 = vcmask 1041408  }
  0x4e   :  { %5736 = vmatpush3.msra.mxu0 %v6810_v1  ;;  %5747 = vmatpush3.msk.msra.mxu1 %vm229_vm1, %v6814_v3  ;;  %v5348_v8 = vld [vmem:[%s7808_s5] ss:$0 sm:$0xff]  ;;  %v6865_v29 = vld [vmem:[#allocation8 + $0x38] sm:$0xff]  ;;  %v6869_v30 = vld [vmem:[#allocation8 + $0x30] sm:$0xff] }
  0x4f   :  { %5737 = vmatprep.subr.mxu0 %v6717_v0  ;;  %5748 = vmatprep.subr.mxu1 %v6717_v0  ;;  %v6855_v11 = vld [vmem:[%s7807_s4] ss:$0 sm:$0xff]  ;;  %v6873_v31 = vld [vmem:[#allocation8 + $0x28] sm:$0xff]  ;;  %v5349_v34 = vld [vmem:[%s7808_s5 + $0x1] ss:$0 sm:$0xff] }
  0x50   :  { %5738 = vmatpush3.msra.mxu0 %v6812_v2  ;;  %5749 = vmatpush3.msra.mxu1 %v6819_v4  ;;  %v5351_v17 = vld [vmem:[#allocation10] ss:$0 sm:$0xff]  ;;  %v337_v37 = vld [vmem:[#allocation2 + $0x2] sm:$0x3]  ;;  %v6902_v38 = vld [vmem:[#allocation7 + $0x18] sm:$0xff] }
  0x51   :  { %5739 = vmatprep.subr.mxu0 %v6717_v0  ;;  %5751 = vmatmul.mubr.msk.f32.vlgmr.msra.gmra.mxu1 %vm225_vm2, %v143_v5  ;;  %v6877_v32 = vld [vmem:[#allocation8 + $0x20] sm:$0xff]  ;;  %v6907_v39 = vld [vmem:[#allocation7 + $0x10] sm:$0xff]  ;;  %v6913_v40 = vld [vmem:[#allocation7 + $0x8] sm:$0xff] }
  0x52   :  { %5740 = vmatpush3.msra.mxu0 %v6823_v6  ;;  %5753 = vmatprep.subr.mxu1 %v6717_v0  ;;  %v6917_v41 = vld [vmem:[#allocation7] sm:$0xff] }
  0x53   :  { %5741 = vmatprep.subr.mxu0 %v6717_v0  ;;  %5754 = vmatpush3.msra.mxu1 %v6810_v1  ;;  %v6935_v50 = vld [vmem:[%s7807_s4 + $0x1] ss:$0 sm:$0xff] }
  0x54   :  { %5742 = vmatpush3.msra.mxu0 %v6829_v7  ;;  %5755 = vmatprep.subr.mxu1 %v6717_v0  ;;  %v5352_v57 = vld [vmem:[#allocation10 + $0x1] ss:$0 sm:$0xff] }
  0x55   :  { %5744 = vmatmul.mubr.msk.f32.vlgmr.msra.gmra.mxu0 %vm151_vm3, %v5348_v8  ;;  %5756 = vmatpush3.msra.mxu1 %v6812_v2 }
  0x56   :  { %5757 = vmatprep.subr.mxu1 %v6717_v0  ;;  %5761 = vmatprep.mubr.msk.f32.mxu1 %vm6718_vm0, %v6717_v0 }
  0x57   :  { %5758 = vmatpush3.msra.mxu1 %v6823_v6  ;;  %5771 = vmatprep.subr.mxu0 %v6717_v0 }
  0x58   :  { %5759 = vmatprep.subr.mxu1 %v6717_v0  ;;  %5779 = vmatprep.mubr.msk.f32.mxu0 %vm6718_vm0, %v6717_v0 }
  0x59   :  { %5760 = vmatpush3.msra.mxu1 %v6829_v7  ;;  %5772 = vmatpush3.msra.mxu0 %v6865_v29 }
  0x5a   :  { %5764 = vmatprep.subr.mxu1 %v6717_v0  ;;  %5773 = vmatprep.subr.mxu0 %v6717_v0 }
  0x5b   :  { %5774 = vmatpush3.msra.mxu0 %v6869_v30 }
  0x5c   :  { %5775 = vmatprep.subr.mxu0 %v6717_v0 }
  0x5d   :  { %5776 = vmatpush3.msra.mxu0 %v6873_v31 }
  0x5e   :  { %5777 = vmatprep.subr.mxu0 %v6717_v0 }
  0x5f   :  { %5778 = vmatpush3.msra.mxu0 %v6877_v32 }
  0x60   :  { %5780 = vmatmul.mubr.msk.f32.vlgmr.msra.gmra.mxu0 %vm151_vm3, %v5349_v34  ;;  %5793 = vmatprep.subr.mxu0 %v6717_v0  ;;  %v6974_v34 = vld [vmem:[#allocation8 + $0x58] sm:$0xff] }
  0x61   :  { %5794 = vmatpush3.msra.mxu0 %v6810_v1  ;;  %5801 = vmatprep.mubr.msk.f32.mxu0 %vm6718_vm0, %v6717_v0 }
  0x62   :  { %5795 = vmatprep.subr.mxu0 %v6717_v0 }
  0x63   :  { %5796 = vmatpush3.msra.mxu0 %v6812_v2 }
  0x64   :  { %5797 = vmatprep.subr.mxu0 %v6717_v0 }
  0x65   :  { %5798 = vmatpush3.msra.mxu0 %v6823_v6 }
  0x66   :  { %5799 = vmatprep.subr.mxu0 %v6717_v0 }
  0x67   :  { %5800 = vmatpush3.msra.mxu0 %v6829_v7 }
  0x68   :  { %5822 = vmatprep.subr.mxu0 %v6717_v0 }
 0x111   :  { %v299_v9 = vpop.f32.mrf.mxu1 }
 0x113   :  { %v5752_v10 = vpop.f32.mrf.mxu1 }
 0x115   :  { %v221_v12 = vpop.f32.mrf.mxu0 }
 0x116   :  { %v300_v13 = vadd.f32 %v299_v9, %v221_v12 }
 0x117   :  { %v5745_v14 = vpop.f32.mrf.mxu0 }
 0x118   :  { %v307_v15 = vadd.f32 %v6855_v11, %v300_v13 }
 0x11a   :  { %6333 = vtanh.f32 %v307_v15  ;;  %v5358_v18 = vmul.f32 -1.442695, %v307_v15 }
 0x11c   :  { %6335 = vpow2.f32 %v5358_v18 }
 0x120   :  { %v590_v42 = vpop.f32.mrf.mxu0 }
 0x122   :  { %v5781_v43 = vpop.f32.mrf.mxu0 }
 0x123   :  { %v6989_v43 = vld [vmem:[#allocation8 + $0x48] sm:$0xff] }
 0x127   :  { %v6334_v16 = vpop.eup %6333 }
 0x128   :  { %321 = vrot.lane.b32.xlu0 %v6334_v16, %s6719_s20 }
 0x129   :  { %v6336_v19 = vpop.eup %6335 }
 0x12a   :  { %v311_v20 = vadd.f32 1.0, %v6336_v19 }
 0x12c   :  { %316 = vrot.lane.b32.xlu0 %v5351_v17, %s6712_s23  ;;  %6337 = vrcp.f32 %v311_v20  ;;  %v698_v20 = vld [vmem:[#allocation2 + $0x4] sm:$0x3] }
 0x139   :  { %v6338_v21 = vpop.eup %6337 }
 0x19a   :  { %v322_v22 = vpop.permute.xlu0 %321 }
 0x19b   :  { %v324_v23 = vmul.f32 %v6338_v21, %v322_v22 }
 0x19d   :  { %326 = vrot.lane.b32.xlu1 %v324_v23, %s6712_s23 }
 0x19e   :  { %v317_v24 = vpop.permute.xlu0 %316 }
 0x19f   :  { %v319_v25 = vmul.f32 %v6338_v21, %v317_v24 }
 0x20f   :  { %v327_v26 = vpop.permute.xlu1 %326 }
 0x210   :  { %v6861_v27 = vadd.f32 %v327_v26, %v319_v25 }
 0x212   :  { %6339 = vtanh.f32 %v6861_v27 }
 0x21f   :  { %v6340_v28 = vpop.eup %6339 }
 0x220   :  { %332 = vrot.lane.b32.xlu1 %v6340_v28, %s6719_s20 }
 0x292   :  { %v333_v33 = vpop.permute.xlu1 %332 }
 0x293   :  { %v335_v35 = vmul.f32 %v6338_v21, %v333_v33 }
 0x295   :  { %339 = vrot.lane.b32.xlu0 %v335_v35, %s6712_s23 }
 0x307   :  { %v340_v36 = vpop.permute.xlu0 %339 }
 0x308   :  { %5762 = vmatmul.mubr.msk.f32.vlgmr.msra.gmra.mxu1 %vm151_vm3, %v340_v36 }
 0x309   :  { %5765 = vmatpush3.msk.msra.mxu1 %vm229_vm1, %v6814_v3  ;;  %5768 = vmatprep.mubr.msk.f32.mxu1 %vm6718_vm0, %v6717_v0 }
 0x30a   :  { %5766 = vmatprep.subr.mxu1 %v6717_v0 }
 0x30b   :  { %5767 = vmatpush3.msra.mxu1 %v6819_v4 }
 0x30c   :  { %5782 = vmatprep.subr.mxu1 %v6717_v0  ;;  %5769 = vmatmul.mubr.msk.f32.vlgmr.msra.gmra.mxu1 %vm225_vm2, %v337_v37  ;;  %v6981_v37 = vld [vmem:[#allocation8 + $0x50] sm:$0xff] }
 0x30d   :  { %5783 = vmatpush3.msra.mxu1 %v6902_v38  ;;  %5790 = vmatprep.mubr.msk.f32.mxu1 %vm6718_vm0, %v6717_v0 }
 0x30e   :  { %5784 = vmatprep.subr.mxu1 %v6717_v0 }
 0x30f   :  { %5785 = vmatpush3.msra.mxu1 %v6907_v39 }
 0x310   :  { %5786 = vmatprep.subr.mxu1 %v6717_v0 }
 0x311   :  { %5787 = vmatpush3.msra.mxu1 %v6913_v40 }
 0x312   :  { %5788 = vmatprep.subr.mxu1 %v6717_v0 }
 0x313   :  { %5789 = vmatpush3.msra.mxu1 %v6917_v41 }
 0x314   :  { %5791 = vmatmul.mubr.msk.f32.vlgmr.msra.gmra.mxu1 %vm151_vm3, %v340_v36  ;;  %5804 = vmatprep.subr.mxu1 %v6717_v0  ;;  %v6977_v36 = vld [vmem:[#allocation7 + $0x38] sm:$0xff] }
 0x315   :  { %5805 = vmatpush3.msk.msra.mxu1 %vm229_vm1, %v6814_v3  ;;  %5808 = vmatprep.mubr.msk.f32.mxu1 %vm6718_vm0, %v6717_v0 }
 0x316   :  { %5806 = vmatprep.subr.mxu1 %v6717_v0 }
 0x317   :  { %5807 = vmatpush3.msra.mxu1 %v6819_v4 }
 0x318   :  { %5811 = vmatprep.subr.mxu1 %v6717_v0  ;;  %5809 = vmatmul.mubr.msk.f32.vlgmr.msra.gmra.mxu1 %vm225_vm2, %v698_v20 }
 0x319   :  { %5812 = vmatpush3.msra.mxu1 %v6865_v29  ;;  %5819 = vmatprep.mubr.msk.f32.mxu1 %vm6718_vm0, %v6717_v0 }
 0x31a   :  { %5813 = vmatprep.subr.mxu1 %v6717_v0 }
 0x31b   :  { %5814 = vmatpush3.msra.mxu1 %v6869_v30 }
 0x31c   :  { %5815 = vmatprep.subr.mxu1 %v6717_v0 }
 0x31d   :  { %5816 = vmatpush3.msra.mxu1 %v6873_v31 }
 0x31e   :  { %5817 = vmatprep.subr.mxu1 %v6717_v0 }
 0x31f   :  { %5818 = vmatpush3.msra.mxu1 %v6877_v32 }
 0x320   :  { %5833 = vmatprep.subr.mxu1 %v6717_v0 }
 0x3c8   :  { %v409_v44 = vpop.f32.mrf.mxu1 }
 0x3ca   :  { %v5763_v45 = vpop.f32.mrf.mxu1 }
 0x3cb   :  { %v6997_v45 = vld [vmem:[#allocation8 + $0x40] sm:$0xff] }
 0x3cc   :  { %v482_v46 = vpop.f32.mrf.mxu1 }
 0x3cd   :  { %v483_v47 = vadd.f32 %v482_v46, %v409_v44  ;;  %v6993_v44 = vld [vmem:[#allocation7 + $0x28] sm:$0xff]  ;;  %v5350_v46 = vld [vmem:[%s7808_s5 + $0x2] ss:$0 sm:$0xff] }
 0x3ce   :  { %v5770_v48 = vpop.f32.mrf.mxu1 }
 0x3cf   :  { %v486_v49 = vadd.f32 %v6855_v11, %v483_v47  ;;  %v7006_v47 = vld [vmem:[#allocation7 + $0x20] sm:$0xff] }
 0x3d1   :  { %6341 = vtanh.f32 %v486_v49  ;;  %v5362_v58 = vmul.f32 -1.442695, %v486_v49 }
 0x3d4   :  { %v660_v51 = vpop.f32.mrf.mxu1 }
 0x3d5   :  { %v661_v52 = vadd.f32 %v660_v51, %v590_v42  ;;  %v6985_v42 = vld [vmem:[#allocation7 + $0x30] sm:$0xff] }
 0x3d6   :  { %v5792_v53 = vpop.f32.mrf.mxu1 }
 0x3d7   :  { %v668_v54 = vadd.f32 %v6935_v50, %v661_v52 }
 0x3d9   :  { %6343 = vtanh.f32 %v668_v54  ;;  %v5366_v59 = vmul.f32 -1.442695, %v668_v54 }
 0x3da   :  { %6345 = vpow2.f32 %v5362_v58 }
 0x3db   :  { %6347 = vpow2.f32 %v5366_v59  ;;  %v7035_v59 = vld [vmem:[%s7807_s4 + $0x2] ss:$0 sm:$0xff] }
 0x3de   :  { %v6342_v55 = vpop.eup %6341 }
 0x3df   :  { %496 = vrot.lane.b32.xlu1 %v6342_v55, %s6719_s20 }
 0x3e6   :  { %v6344_v56 = vpop.eup %6343 }
 0x3e7   :  { %682 = vrot.lane.b32.xlu0 %v6344_v56, %s6719_s20  ;;  %v6346_v60 = vpop.eup %6345 }
 0x3e8   :  { %v490_v61 = vadd.f32 1.0, %v6346_v60  ;;  %v6348_v62 = vpop.eup %6347 }
 0x3e9   :  { %v672_v63 = vadd.f32 1.0, %v6348_v62 }
 0x3ea   :  { %6349 = vrcp.f32 %v490_v61 }
 0x3eb   :  { %677 = vrot.lane.b32.xlu0 %v5352_v57, %s6712_s23  ;;  %6351 = vrcp.f32 %v672_v63 }
 0x3f7   :  { %v6350_v3 = vpop.eup %6349 }
 0x3f8   :  { %v6352_v9 = vpop.eup %6351  ;;  %v494_v13 = vmul.f32 %v6350_v3, %v6861_v27  ;;  %v843_v27 = vpop.f32.mrf.mxu1 }
 0x3fa   :  { %v5810_v28 = vpop.f32.mrf.mxu1 }
 0x451   :  { %v497_v5 = vpop.permute.xlu1 %496 }
 0x452   :  { %v499_v8 = vmul.f32 %v6350_v3, %v497_v5  ;;  %v5353_v5 = vld [vmem:[#allocation10 + $0x2] ss:$0 sm:$0xff] }
 0x454   :  { %501 = vrot.lane.b32.xlu1 %v499_v8, %s6712_s23 }
 0x459   :  { %v683_v10 = vpop.permute.xlu0 %682 }
 0x45a   :  { %v685_v12 = vmul.f32 %v6352_v9, %v683_v10 }
 0x45c   :  { %687 = vrot.lane.b32.xlu1 %v685_v12, %s6712_s23 }
 0x45d   :  { %v678_v16 = vpop.permute.xlu0 %677 }
 0x45e   :  { %v680_v17 = vmul.f32 %v6352_v9, %v678_v16 }
 0x4c6   :  { %v502_v14 = vpop.permute.xlu1 %501 }
 0x4c7   :  { %v6944_v15 = vadd.f32 %v502_v14, %v494_v13 }
 0x4c9   :  { %6353 = vtanh.f32 %v6944_v15 }
 0x4ce   :  { %v688_v18 = vpop.permute.xlu1 %687 }
 0x4cf   :  { %v6947_v19 = vadd.f32 %v688_v18, %v680_v17 }
 0x4d1   :  { %6355 = vtanh.f32 %v6947_v19 }
 0x4d6   :  { %v6354_v21 = vpop.eup %6353 }
 0x4d7   :  { %507 = vrot.lane.b32.xlu0 %v6354_v21, %s6719_s20 }
 0x4de   :  { %v6356_v22 = vpop.eup %6355 }
 0x4df   :  { %693 = vrot.lane.b32.xlu1 %v6356_v22, %s6719_s20 }
 0x549   :  { %v508_v23 = vpop.permute.xlu0 %507 }
 0x54a   :  { %v510_v24 = vmul.f32 %v6350_v3, %v508_v23 }
 0x54c   :  { %700 = vrot.lane.b32.xlu0 %v510_v24, %s6712_s23 }
 0x551   :  { %v694_v25 = vpop.permute.xlu1 %693 }
 0x552   :  { %v696_v26 = vmul.f32 %v6352_v9, %v694_v25 }
 0x554   :  { %873 = vrot.lane.b32.xlu1 %v696_v26, %s6712_s23 }
 0x5be   :  { %v701_v33 = vpop.permute.xlu0 %700 }
 0x5bf   :  { %5802 = vmatmul.mubr.msk.f32.vlgmr.msra.gmra.mxu0 %vm151_vm3, %v701_v33 }
 0x5c0   :  { %5823 = vmatpush3.msra.mxu0 %v6902_v38  ;;  %5830 = vmatprep.mubr.msk.f32.mxu0 %vm6718_vm0, %v6717_v0 }
 0x5c1   :  { %5824 = vmatprep.subr.mxu0 %v6717_v0 }
 0x5c2   :  { %5825 = vmatpush3.msra.mxu0 %v6907_v39 }
 0x5c3   :  { %5826 = vmatprep.subr.mxu0 %v6717_v0 }
 0x5c4   :  { %5827 = vmatpush3.msra.mxu0 %v6913_v40 }
 0x5c5   :  { %5828 = vmatprep.subr.mxu0 %v6717_v0 }
 0x5c6   :  { %5829 = vmatpush3.msra.mxu0 %v6917_v41  ;;  %v874_v35 = vpop.permute.xlu1 %873 }
 0x5c7   :  { %5820 = vmatmul.mubr.msk.f32.vlgmr.msra.gmra.mxu1 %vm151_vm3, %v874_v35  ;;  %5831 = vmatmul.mubr.msk.f32.vlgmr.msra.gmra.mxu0 %vm151_vm3, %v701_v33 }
 0x5c8   :  { %5834 = vmatpush3.msra.mxu1 %v6974_v34  ;;  %5844 = vmatprep.subr.mxu0 %v6717_v0 }
 0x5c9   :  { %5835 = vmatprep.subr.mxu1 %v6717_v0  ;;  %5845 = vmatpush3.msra.mxu0 %v6977_v36 }
 0x5ca   :  { %5836 = vmatpush3.msra.mxu1 %v6981_v37  ;;  %5846 = vmatprep.subr.mxu0 %v6717_v0 }
 0x5cb   :  { %5837 = vmatprep.subr.mxu1 %v6717_v0  ;;  %5847 = vmatpush3.msra.mxu0 %v6985_v42 }
 0x5cc   :  { %5838 = vmatpush3.msra.mxu1 %v6989_v43  ;;  %5848 = vmatprep.subr.mxu0 %v6717_v0 }
 0x5cd   :  { %5839 = vmatprep.subr.mxu1 %v6717_v0  ;;  %5849 = vmatpush3.msra.mxu0 %v6993_v44 }
 0x5ce   :  { %5840 = vmatpush3.msra.mxu1 %v6997_v45  ;;  %5841 = vmatprep.mubr.msk.f32.mxu1 %vm6718_vm0, %v6717_v0 }
 0x5cf   :  { %5850 = vmatprep.subr.mxu0 %v6717_v0  ;;  %5842 = vmatmul.mubr.msk.f32.vlgmr.msra.gmra.mxu1 %vm151_vm3, %v5350_v46 }
 0x5d0   :  { %5851 = vmatpush3.msra.mxu0 %v7006_v47  ;;  %5852 = vmatprep.mubr.msk.f32.mxu0 %vm6718_vm0, %v6717_v0 }
 0x5d1   :  { %5853 = vmatmul.mubr.msk.f32.vlgmr.msra.gmra.mxu0 %vm151_vm3, %v874_v35  ;;  %5866 = vmatprep.subr.mxu0 %v6717_v0 }
 0x5d2   :  { %5867 = vmatpush3.msra.mxu0 %v6810_v1  ;;  %5874 = vmatprep.mubr.msk.f32.mxu0 %vm6718_vm0, %v6717_v0 }
 0x5d3   :  { %5868 = vmatprep.subr.mxu0 %v6717_v0  ;;  %5855 = vmatprep.subr.mxu1 %v6717_v0 }
 0x5d4   :  { %5869 = vmatpush3.msra.mxu0 %v6812_v2  ;;  %5863 = vmatprep.mubr.msk.f32.mxu1 %vm6718_vm0, %v6717_v0 }
 0x5d5   :  { %5870 = vmatprep.subr.mxu0 %v6717_v0 }
 0x5d6   :  { %5871 = vmatpush3.msra.mxu0 %v6823_v6 }
 0x5d7   :  { %5872 = vmatprep.subr.mxu0 %v6717_v0 }
 0x5d8   :  { %5873 = vmatpush3.msra.mxu0 %v6829_v7 }
 0x5d9   :  { %5884 = vmatprep.subr.mxu0 %v6717_v0 }
 0x67f   :  { %v770_v48 = vpop.f32.mrf.mxu0 }
 0x680   :  { %v844_v49 = vadd.f32 %v843_v27, %v770_v48 }
 0x681   :  { %v5803_v51 = vpop.f32.mrf.mxu0 }
 0x682   :  { %v847_v52 = vadd.f32 %v6855_v11, %v844_v49 }
 0x684   :  { %6357 = vtanh.f32 %v847_v52  ;;  %v5370_v13 = vmul.f32 -1.442695, %v847_v52 }
 0x687   :  { %v943_v53 = vpop.f32.mrf.mxu1  ;;  %v1013_v54 = vpop.f32.mrf.mxu0 }
 0x688   :  { %v1014_v63 = vadd.f32 %v1013_v54, %v943_v53 }
 0x689   :  { %v5821_v55 = vpop.f32.mrf.mxu1  ;;  %v5832_v56 = vpop.f32.mrf.mxu0 }
 0x68a   :  { %v1017_v9 = vadd.f32 %v6935_v50, %v1014_v63  ;;  %v7060_v63 = vld [vmem:[#allocation11 + $0x18] sm:$0xff] }
 0x68b   :  { %5856 = vmatpush3.msra.mxu1 %v7060_v63 }
 0x68c   :  { %v5373_v18 = vmul.f32 -1.442695, %v1017_v9  ;;  %5857 = vmatprep.subr.mxu1 %v6717_v0 }
 0x68f   :  { %v1122_v57 = vpop.f32.mrf.mxu1 }
 0x691   :  { %v6358_v58 = vpop.eup %6357  ;;  %v1192_v60 = vpop.f32.mrf.mxu0 }
 0x692   :  { %v5843_v61 = vpop.f32.mrf.mxu1  ;;  %v1193_v62 = vadd.f32 %v1192_v60, %v1122_v57  ;;  %857 = vrot.lane.b32.xlu1 %v6358_v58, %s6719_s20 }
 0x693   :  { %v5854_v3 = vpop.f32.mrf.mxu0 }
 0x694   :  { %v1200_v8 = vadd.f32 %v7035_v59, %v1193_v62  ;;  %v7062_v3 = vld [vmem:[#allocation11 + $0x10] sm:$0xff] }
 0x695   :  { %5858 = vmatpush3.msra.mxu1 %v7062_v3 }
 0x696   :  { %1209 = vrot.lane.b32.xlu1 %v5353_v5, %s6712_s23  ;;  %6359 = vtanh.f32 %v1200_v8  ;;  %v5377_v16 = vmul.f32 -1.442695, %v1200_v8  ;;  %5859 = vmatprep.subr.mxu1 %v6717_v0  ;;  %v7070_v5 = vld [vmem:[#allocation11] sm:$0xff] }
 0x697   :  { %6361 = vtanh.f32 %v1017_v9 }
 0x698   :  { %6363 = vpow2.f32 %v5370_v13 }
 0x699   :  { %6365 = vpow2.f32 %v5377_v16 }
 0x6a3   :  { %v6360_v10 = vpop.eup %6359 }
 0x6a4   :  { %1214 = vrot.lane.b32.xlu0 %v6360_v10, %s6719_s20  ;;  %v6362_v12 = vpop.eup %6361 }
 0x6a5   :  { %v6364_v14 = vpop.eup %6363 }
 0x6a6   :  { %v851_v17 = vadd.f32 1.0, %v6364_v14  ;;  %v6366_v20 = vpop.eup %6365 }
 0x6a7   :  { %v1204_v24 = vadd.f32 1.0, %v6366_v20  ;;  %v1330_v20 = vld [vmem:[#allocation2 + $0x6] sm:$0x3] }
 0x6a8   :  { %1027 = vrot.lane.b32.xlu0 %v6362_v12, %s6719_s20  ;;  %6367 = vrcp.f32 %v851_v17  ;;  %v1332_v17 = vld [vmem:[#allocation5 + $0x8] sm:$0xf] }
 0x6a9   :  { %6369 = vpow2.f32 %v5373_v18 }
 0x6aa   :  { %6371 = vrcp.f32 %v1204_v24 }
 0x6b5   :  { %v6368_v21 = vpop.eup %6367 }
 0x6b6   :  { %v6370_v25 = vpop.eup %6369  ;;  %v855_v51 = vmul.f32 %v6368_v21, %v6944_v15 }
 0x6b7   :  { %v1021_v26 = vadd.f32 1.0, %v6370_v25  ;;  %v6372_v27 = vpop.eup %6371 }
 0x6b9   :  { %6373 = vrcp.f32 %v1021_v26 }
 0x6c6   :  { %v6374_v35 = vpop.eup %6373 }
 0x6c7   :  { %v1025_v58 = vmul.f32 %v6374_v35, %v6947_v19  ;;  %v7066_v19 = vld [vmem:[#allocation11 + $0x8] sm:$0xff] }
 0x6c8   :  { %5860 = vmatpush3.msra.mxu1 %v7066_v19 }
 0x6c9   :  { %5861 = vmatprep.subr.mxu1 %v6717_v0 }
 0x6ca   :  { %5862 = vmatpush3.msra.mxu1 %v7070_v5 }
 0x6cb   :  { %5877 = vmatprep.subr.mxu1 %v6717_v0 }
 0x704   :  { %v858_v22 = vpop.permute.xlu1 %857 }
 0x705   :  { %v860_v23 = vmul.f32 %v6368_v21, %v858_v22 }
 0x707   :  { %862 = vrot.lane.b32.xlu1 %v860_v23, %s6712_s23 }
 0x708   :  { %v1210_v49 = vpop.permute.xlu1 %1209 }
 0x709   :  { %v1212_v55 = vmul.f32 %v6372_v27, %v1210_v49 }
 0x716   :  { %v1215_v28 = vpop.permute.xlu0 %1214 }
 0x717   :  { %v1217_v33 = vmul.f32 %v6372_v27, %v1215_v28 }
 0x719   :  { %1219 = vrot.lane.b32.xlu0 %v1217_v33, %s6712_s23 }
 0x71a   :  { %v1028_v46 = vpop.permute.xlu0 %1027 }
 0x71b   :  { %v1030_v48 = vmul.f32 %v6374_v35, %v1028_v46 }
 0x71d   :  { %1032 = vrot.lane.b32.xlu0 %v1030_v48, %s6712_s23 }
 0x779   :  { %v863_v52 = vpop.permute.xlu1 %862 }
 0x77a   :  { %v7047_v53 = vadd.f32 %v863_v52, %v855_v51 }
 0x77c   :  { %6375 = vtanh.f32 %v7047_v53 }
 0x789   :  { %v6376_v54 = vpop.eup %6375 }
 0x78a   :  { %868 = vrot.lane.b32.xlu0 %v6376_v54, %s6719_s20 }
 0x78b   :  { %v1220_v56 = vpop.permute.xlu0 %1219 }
 0x78c   :  { %v7051_v57 = vadd.f32 %v1220_v56, %v1212_v55 }
 0x78e   :  { %6377 = vtanh.f32 %v7051_v57 }
 0x78f   :  { %v1033_v60 = vpop.permute.xlu0 %1032 }
 0x790   :  { %v7055_v61 = vadd.f32 %v1033_v60, %v1025_v58 }
 0x792   :  { %6379 = vtanh.f32 %v7055_v61 }
 0x79b   :  { %v6378_v15 = vpop.eup %6377 }
 0x79c   :  { %1225 = vrot.lane.b32.xlu1 %v6378_v15, %s6719_s20 }
 0x79f   :  { %v6380_v62 = vpop.eup %6379 }
 0x7a0   :  { %1038 = vrot.lane.b32.xlu1 %v6380_v62, %s6719_s20 }
 0x7fc   :  { %v869_v8 = vpop.permute.xlu0 %868 }
 0x7fd   :  { %v871_v9 = vmul.f32 %v6368_v21, %v869_v8 }
 0x7ff   :  { %1339 = vrot.lane.b32.xlu1 %v871_v9, %s6712_s23 }
 0x80e   :  { %v1226_v10 = vpop.permute.xlu1 %1225 }
 0x80f   :  { %v1228_v12 = vmul.f32 %v6372_v27, %v1226_v10 }
 0x811   :  { %1241 = vrot.lane.b32.xlu0 %v1228_v12, %s6712_s23 }
 0x812   :  { %v1039_v13 = vpop.permute.xlu1 %1038 }
 0x813   :  { %v1041_v14 = vmul.f32 %v6374_v35, %v1039_v13 }
 0x815   :  { %1528 = vrot.lane.b32.xlu0 %v1041_v14, %s6712_s23 }
 0x871   :  { %v1340_v16 = vpop.permute.xlu1 %1339 }
 0x872   :  { %5875 = vmatmul.mubr.msk.f32.vlgmr.msra.gmra.mxu0 %vm151_vm3, %v1340_v16 }
 0x873   :  { %5885 = vmatpush3.msra.mxu0 %v6865_v29  ;;  %5892 = vmatprep.mubr.msk.f32.mxu0 %vm6718_vm0, %v6717_v0 }
 0x874   :  { %5886 = vmatprep.subr.mxu0 %v6717_v0 }
 0x875   :  { %5887 = vmatpush3.msra.mxu0 %v6869_v30 }
 0x876   :  { %5888 = vmatprep.subr.mxu0 %v6717_v0 }
 0x877   :  { %5889 = vmatpush3.msra.mxu0 %v6873_v31 }
 0x878   :  { %5890 = vmatprep.subr.mxu0 %v6717_v0 }
 0x879   :  { %5891 = vmatpush3.msra.mxu0 %v6877_v32 }
 0x87a   :  { %5906 = vmatprep.subr.mxu0 %v6717_v0 }
 0x883   :  { %v1242_v18 = vpop.permute.xlu0 %1241 }
 0x884   :  { %5864 = vmatmul.mubr.msk.f32.vlgmr.msra.gmra.mxu1 %vm151_vm3, %v1242_v18 }
 0x885   :  { %5878 = vmatpush3.msk.msra.mxu1 %vm229_vm1, %v1332_v17  ;;  %5881 = vmatprep.mubr.msk.f32.mxu1 %vm6718_vm0, %v6717_v0 }
 0x886   :  { %5879 = vmatprep.subr.mxu1 %v6717_v0 }
 0x887   :  { %5880 = vmatpush3.msra.mxu1 %v6819_v4  ;;  %v1529_v21 = vpop.permute.xlu0 %1528 }
 0x888   :  { %5895 = vmatprep.subr.mxu1 %v6717_v0  ;;  %5882 = vmatmul.mubr.msk.f32.vlgmr.msra.gmra.mxu1 %vm225_vm2, %v1330_v20 }
 0x889   :  { %5893 = vmatmul.mubr.msk.f32.vlgmr.msra.gmra.mxu0 %vm151_vm3, %v1529_v21  ;;  %5896 = vmatpush3.msra.mxu1 %v6902_v38 }
 0x88a   :  { %5907 = vmatpush3.msra.mxu0 %v6974_v34  ;;  %5897 = vmatprep.subr.mxu1 %v6717_v0 }
 0x88b   :  { %5908 = vmatprep.subr.mxu0 %v6717_v0  ;;  %5898 = vmatpush3.msra.mxu1 %v6907_v39 }
 0x88c   :  { %5909 = vmatpush3.msra.mxu0 %v6981_v37  ;;  %5899 = vmatprep.subr.mxu1 %v6717_v0 }
 0x88d   :  { %5910 = vmatprep.subr.mxu0 %v6717_v0  ;;  %5900 = vmatpush3.msra.mxu1 %v6913_v40 }
 0x88e   :  { %5911 = vmatpush3.msra.mxu0 %v6989_v43  ;;  %5901 = vmatprep.subr.mxu1 %v6717_v0 }
 0x88f   :  { %5912 = vmatprep.subr.mxu0 %v6717_v0  ;;  %5902 = vmatpush3.msra.mxu1 %v6917_v41 }
 0x890   :  { %5903 = vmatprep.mubr.msk.f32.mxu1 %vm6718_vm0, %v6717_v0  ;;  %5913 = vmatpush3.msra.mxu0 %v6997_v45 }
 0x891   :  { %5914 = vmatprep.mubr.msk.f32.mxu0 %vm6718_vm0, %v6717_v0  ;;  %5904 = vmatmul.mubr.msk.f32.vlgmr.msra.gmra.mxu1 %vm151_vm3, %v1340_v16 }
 0x892   :  { %5915 = vmatmul.mubr.msk.f32.vlgmr.msra.gmra.mxu0 %vm151_vm3, %v1242_v18  ;;  %5917 = vmatprep.subr.mxu1 %v6717_v0 }
 0x893   :  { %5918 = vmatpush3.msra.mxu1 %v6977_v36  ;;  %5925 = vmatprep.mubr.msk.f32.mxu1 %vm6718_vm0, %v6717_v0 }
 0x894   :  { %5919 = vmatprep.subr.mxu1 %v6717_v0  ;;  %5928 = vmatprep.subr.mxu0 %v6717_v0 }
 0x895   :  { %5920 = vmatpush3.msra.mxu1 %v6985_v42  ;;  %5929 = vmatpush3.msra.mxu0 %v7060_v63 }
 0x896   :  { %5921 = vmatprep.subr.mxu1 %v6717_v0  ;;  %5930 = vmatprep.subr.mxu0 %v6717_v0 }
 0x897   :  { %5922 = vmatpush3.msra.mxu1 %v6993_v44  ;;  %5931 = vmatpush3.msra.mxu0 %v7062_v3 }
 0x898   :  { %5923 = vmatprep.subr.mxu1 %v6717_v0  ;;  %5932 = vmatprep.subr.mxu0 %v6717_v0 }
 0x899   :  { %5924 = vmatpush3.msra.mxu1 %v7006_v47  ;;  %5933 = vmatpush3.msra.mxu0 %v7066_v19 }
 0x89a   :  { %5926 = vmatmul.mubr.msk.f32.vlgmr.msra.gmra.mxu1 %vm151_vm3, %v1529_v21  ;;  %5939 = vmatprep.subr.mxu1 %v6717_v0 }
 0x89b   :  { %5940 = vmatpush3.msra.mxu1 %v6810_v1  ;;  %5947 = vmatprep.mubr.msk.f32.mxu1 %vm6718_vm0, %v6717_v0 }
 0x89c   :  { %5941 = vmatprep.subr.mxu1 %v6717_v0  ;;  %5934 = vmatprep.subr.mxu0 %v6717_v0 }
 0x89d   :  { %5942 = vmatpush3.msra.mxu1 %v6812_v2  ;;  %5935 = vmatpush3.msra.mxu0 %v7070_v5 }
 0x89e   :  { %5943 = vmatprep.subr.mxu1 %v6717_v0  ;;  %5936 = vmatprep.mubr.msk.f32.mxu0 %vm6718_vm0, %v6717_v0 }
 0x89f   :  { %5944 = vmatpush3.msra.mxu1 %v6823_v6  ;;  %5950 = vmatprep.subr.mxu0 %v6717_v0 }
 0x8a0   :  { %5945 = vmatprep.subr.mxu1 %v6717_v0 }
 0x8a1   :  { %5946 = vmatpush3.msra.mxu1 %v6829_v7 }
 0x8a2   :  { %5957 = vmatprep.subr.mxu1 %v6717_v0 }
 0x932   :  { %v1409_v1 = vpop.f32.mrf.mxu0 }
 0x934   :  { %v5876_v22 = vpop.f32.mrf.mxu0 }
 0x944   :  { %v7152_v2 = vpop.f32.mrf.mxu1 }
 0x946   :  { %v5865_v23 = vpop.f32.mrf.mxu1 }
 0x948   :  { %v1485_v24 = vpop.f32.mrf.mxu1 }
 0x949   :  { %v1486_v25 = vadd.f32 %v1485_v24, %v1409_v1  ;;  %v1598_v26 = vpop.f32.mrf.mxu0 }
 0x94a   :  { %v5883_v27 = vpop.f32.mrf.mxu1 }
 0x94b   :  { %v1493_v28 = vadd.f32 %v6855_v11, %v1486_v25  ;;  %v5894_v6 = vpop.f32.mrf.mxu0 }
 0x94d   :  { %6381 = vtanh.f32 %v1493_v28  ;;  %v5384_v60 = vmul.f32 -1.442695, %v1493_v28 }
 0x951   :  { %v1668_v33 = vpop.f32.mrf.mxu1 }
 0x952   :  { %v1776_v35 = vpop.f32.mrf.mxu0  ;;  %v1669_v52 = vadd.f32 %v1668_v33, %v1598_v26 }
 0x953   :  { %v5905_v46 = vpop.f32.mrf.mxu1 }
 0x954   :  { %v5916_v48 = vpop.f32.mrf.mxu0  ;;  %v1676_v56 = vadd.f32 %v6935_v50, %v1669_v52 }
 0x956   :  { %v5388_v9 = vmul.f32 -1.442695, %v1676_v56 }
 0x95a   :  { %v6382_v7 = vpop.eup %6381  ;;  %v1846_v49 = vpop.f32.mrf.mxu1 }
 0x95b   :  { %v1847_v51 = vadd.f32 %v1846_v49, %v1776_v35  ;;  %1503 = vrot.lane.b32.xlu0 %v6382_v7, %s6719_s20 }
 0x95c   :  { %v5927_v54 = vpop.f32.mrf.mxu1 }
 0x95d   :  { %v1854_v55 = vadd.f32 %v7035_v59, %v1847_v51 }
 0x95f   :  { %6383 = vtanh.f32 %v1854_v55  ;;  %v5392_v62 = vmul.f32 -1.442695, %v1854_v55 }
 0x960   :  { %6385 = vtanh.f32 %v1676_v56 }
 0x961   :  { %6387 = vpow2.f32 %v5384_v60 }
 0x962   :  { %6389 = vpow2.f32 %v5392_v62 }
 0x96c   :  { %v6384_v11 = vpop.eup %6383 }
 0x96d   :  { %1864 = vrot.lane.b32.xlu1 %v6384_v11, %s6719_s20  ;;  %v6386_v58 = vpop.eup %6385  ;;  %v1982_v11 = vld [vmem:[#allocation5 + $0x8] sm:$0xf] }
 0x96e   :  { %v6388_v15 = vpop.eup %6387 }
 0x96f   :  { %v1497_v8 = vadd.f32 1.0, %v6388_v15  ;;  %v6390_v10 = vpop.eup %6389 }
 0x970   :  { %v1858_v16 = vadd.f32 1.0, %v6390_v10 }
 0x971   :  { %1686 = vrot.lane.b32.xlu1 %v6386_v58, %s6719_s20  ;;  %6391 = vrcp.f32 %v1497_v8 }
 0x972   :  { %6393 = vpow2.f32 %v5388_v9 }
 0x973   :  { %6395 = vrcp.f32 %v1858_v16 }
 0x97e   :  { %v6392_v12 = vpop.eup %6391 }
 0x97f   :  { %v6394_v17 = vpop.eup %6393  ;;  %v1501_v25 = vmul.f32 %v6392_v12, %v7047_v53 }
 0x980   :  { %v1680_v18 = vadd.f32 1.0, %v6394_v17  ;;  %v6396_v20 = vpop.eup %6395 }
 0x981   :  { %v1862_v6 = vmul.f32 %v6396_v20, %v7051_v57 }
 0x982   :  { %6397 = vrcp.f32 %v1680_v18 }
 0x98f   :  { %v6398_v22 = vpop.eup %6397 }
 0x990   :  { %v1684_v46 = vmul.f32 %v6398_v22, %v7055_v61 }
 0x9cd   :  { %v1504_v13 = vpop.permute.xlu0 %1503 }
 0x9ce   :  { %v1506_v14 = vmul.f32 %v6392_v12, %v1504_v13 }
 0x9d0   :  { %1508 = vrot.lane.b32.xlu1 %v1506_v14, %s6712_s23 }
 0x9df   :  { %v1865_v21 = vpop.permute.xlu1 %1864 }
 0x9e0   :  { %v1867_v1 = vmul.f32 %v6396_v20, %v1865_v21 }
 0x9e2   :  { %1869 = vrot.lane.b32.xlu0 %v1867_v1, %s6712_s23 }
 0x9e3   :  { %v1687_v23 = vpop.permute.xlu1 %1686 }
 0x9e4   :  { %v1689_v24 = vmul.f32 %v6398_v22, %v1687_v23 }
 0x9e6   :  { %1691 = vrot.lane.b32.xlu0 %v1689_v24, %s6712_s23 }
 0xa42   :  { %v1509_v26 = vpop.permute.xlu1 %1508 }
 0xa43   :  { %v7164_v27 = vadd.f32 %v1509_v26, %v1501_v25 }
 0xa45   :  { %6399 = vtanh.f32 %v7164_v27 }
 0xa52   :  { %v6400_v28 = vpop.eup %6399 }
 0xa53   :  { %1514 = vrot.lane.b32.xlu0 %v6400_v28, %s6719_s20 }
 0xa54   :  { %v1870_v33 = vpop.permute.xlu0 %1869 }
 0xa55   :  { %v7169_v35 = vadd.f32 %v1870_v33, %v1862_v6 }
 0xa57   :  { %6401 = vtanh.f32 %v7169_v35 }
 0xa58   :  { %v1692_v48 = vpop.permute.xlu0 %1691 }
 0xa59   :  { %v7173_v7 = vadd.f32 %v1692_v48, %v1684_v46 }
 0xa5b   :  { %6403 = vtanh.f32 %v7173_v7 }
 0xa64   :  { %v6402_v53 = vpop.eup %6401 }
 0xa65   :  { %1875 = vrot.lane.b32.xlu1 %v6402_v53, %s6719_s20 }
 0xa68   :  { %v6404_v49 = vpop.eup %6403 }
 0xa69   :  { %1697 = vrot.lane.b32.xlu1 %v6404_v49, %s6719_s20 }
 0xac5   :  { %v1515_v51 = vpop.permute.xlu0 %1514 }
 0xac6   :  { %v1517_v57 = vmul.f32 %v6392_v12, %v1515_v51 }
 0xac8   :  { %1989 = vrot.lane.b32.xlu1 %v1517_v57, %s6712_s23 }
 0xad7   :  { %v1876_v52 = vpop.permute.xlu1 %1875 }
 0xad8   :  { %v1878_v54 = vmul.f32 %v6396_v20, %v1876_v52 }
 0xada   :  { %1891 = vrot.lane.b32.xlu0 %v1878_v54, %s6712_s23 }
 0xadb   :  { %v1698_v61 = vpop.permute.xlu1 %1697 }
 0xadc   :  { %v1700_v55 = vmul.f32 %v6398_v22, %v1698_v61 }
 0xade   :  { %2178 = vrot.lane.b32.xlu0 %v1700_v55, %s6712_s23 }
 0xb3a   :  { %v1990_v56 = vpop.permute.xlu1 %1989 }
 0xb3b   :  { %5948 = vmatmul.mubr.msk.f32.vlgmr.msra.gmra.mxu1 %vm151_vm3, %v1990_v56 }
 0xb3c   :  { %5958 = vmatpush3.msra.mxu1 %v6865_v29  ;;  %5965 = vmatprep.mubr.msk.f32.mxu1 %vm6718_vm0, %v6717_v0  ;;  %v1980_v29 = vld [vmem:[#allocation2 + $0x8] sm:$0x3] }
 0xb3d   :  { %5959 = vmatprep.subr.mxu1 %v6717_v0 }
 0xb3e   :  { %5960 = vmatpush3.msra.mxu1 %v6869_v30 }
 0xb3f   :  { %5961 = vmatprep.subr.mxu1 %v6717_v0 }
 0xb40   :  { %5962 = vmatpush3.msra.mxu1 %v6873_v31 }
 0xb41   :  { %5963 = vmatprep.subr.mxu1 %v6717_v0 }
 0xb42   :  { %5964 = vmatpush3.msra.mxu1 %v6877_v32 }
 0xb43   :  { %5979 = vmatprep.subr.mxu1 %v6717_v0 }
 0xb4c   :  { %v1892_v58 = vpop.permute.xlu0 %1891 }
 0xb4d   :  { %5937 = vmatmul.mubr.msk.f32.vlgmr.msra.gmra.mxu0 %vm151_vm3, %v1892_v58 }
 0xb4e   :  { %5951 = vmatpush3.msk.msra.mxu0 %vm229_vm1, %v1982_v11  ;;  %5954 = vmatprep.mubr.msk.f32.mxu0 %vm6718_vm0, %v6717_v0 }
 0xb4f   :  { %5952 = vmatprep.subr.mxu0 %v6717_v0 }
 0xb50   :  { %5953 = vmatpush3.msra.mxu0 %v6819_v4  ;;  %v2179_v30 = vpop.permute.xlu0 %2178 }
 0xb51   :  { %5968 = vmatprep.subr.mxu0 %v6717_v0  ;;  %5955 = vmatmul.mubr.msk.f32.vlgmr.msra.gmra.mxu0 %vm225_vm2, %v1980_v29 }
 0xb52   :  { %5966 = vmatmul.mubr.msk.f32.vlgmr.msra.gmra.mxu1 %vm151_vm3, %v2179_v30  ;;  %5969 = vmatpush3.msra.mxu0 %v6902_v38 }
 0xb53   :  { %5980 = vmatpush3.msra.mxu1 %v6974_v34  ;;  %5970 = vmatprep.subr.mxu0 %v6717_v0 }
 0xb54   :  { %5981 = vmatprep.subr.mxu1 %v6717_v0  ;;  %5971 = vmatpush3.msra.mxu0 %v6907_v39  ;;  %v7251_v39 = vld [vmem:[%s7807_s4] ss:$0 sm:$0xff] }
 0xb55   :  { %5982 = vmatpush3.msra.mxu1 %v6981_v37  ;;  %5972 = vmatprep.subr.mxu0 %v6717_v0 }
 0xb56   :  { %5983 = vmatprep.subr.mxu1 %v6717_v0  ;;  %5973 = vmatpush3.msra.mxu0 %v6913_v40 }
 0xb57   :  { %5984 = vmatpush3.msra.mxu1 %v6989_v43  ;;  %5974 = vmatprep.subr.mxu0 %v6717_v0 }
 0xb58   :  { %5985 = vmatprep.subr.mxu1 %v6717_v0  ;;  %5975 = vmatpush3.msra.mxu0 %v6917_v41 }
 0xb59   :  { %5976 = vmatprep.mubr.msk.f32.mxu0 %vm6718_vm0, %v6717_v0  ;;  %5986 = vmatpush3.msra.mxu1 %v6997_v45 }
 0xb5a   :  { %5987 = vmatprep.mubr.msk.f32.mxu1 %vm6718_vm0, %v6717_v0  ;;  %5977 = vmatmul.mubr.msk.f32.vlgmr.msra.gmra.mxu0 %vm151_vm3, %v1990_v56 }
 0xb5b   :  { %5988 = vmatmul.mubr.msk.f32.vlgmr.msra.gmra.mxu1 %vm151_vm3, %v1892_v58  ;;  %5990 = vmatprep.subr.mxu0 %v6717_v0  ;;  %v7277_v58 = vld [vmem:[#allocation8 + $0x10] sm:$0xff] }
 0xb5c   :  { %5991 = vmatpush3.msra.mxu0 %v6977_v36  ;;  %5998 = vmatprep.mubr.msk.f32.mxu0 %vm6718_vm0, %v6717_v0 }
 0xb5d   :  { %5992 = vmatprep.subr.mxu0 %v6717_v0  ;;  %6001 = vmatprep.subr.mxu1 %v6717_v0 }
 0xb5e   :  { %5993 = vmatpush3.msra.mxu0 %v6985_v42  ;;  %6002 = vmatpush3.msra.mxu1 %v7060_v63 }
 0xb5f   :  { %5994 = vmatprep.subr.mxu0 %v6717_v0  ;;  %6003 = vmatprep.subr.mxu1 %v6717_v0 }
 0xb60   :  { %5995 = vmatpush3.msra.mxu0 %v6993_v44  ;;  %6004 = vmatpush3.msra.mxu1 %v7062_v3 }
 0xb61   :  { %5996 = vmatprep.subr.mxu0 %v6717_v0  ;;  %6005 = vmatprep.subr.mxu1 %v6717_v0 }
 0xb62   :  { %5997 = vmatpush3.msra.mxu0 %v7006_v47  ;;  %6006 = vmatpush3.msra.mxu1 %v7066_v19 }
 0xb63   :  { %5999 = vmatmul.mubr.msk.f32.vlgmr.msra.gmra.mxu0 %vm151_vm3, %v2179_v30  ;;  %6012 = vmatprep.subr.mxu0 %v6717_v0 }
 0xb64   :  { %6020 = vmatprep.mubr.msk.f32.mxu0 %vm6718_vm0, %v6717_v0  ;;  %6007 = vmatprep.subr.mxu1 %v6717_v0 }
 0xb65   :  { %6008 = vmatpush3.msra.mxu1 %v7070_v5  ;;  %6009 = vmatprep.mubr.msk.f32.mxu1 %vm6718_vm0, %v6717_v0 }
 0xb66   :  { %6023 = vmatprep.subr.mxu1 %v6717_v0 }
 0xbfb   :  { %v2059_v4 = vpop.f32.mrf.mxu1 }
 0xbfd   :  { %v5949_v31 = vpop.f32.mrf.mxu1 }
 0xc0d   :  { %v7246_v32 = vpop.f32.mrf.mxu0 }
 0xc0f   :  { %v5938_v38 = vpop.f32.mrf.mxu0 }
 0xc11   :  { %v2135_v40 = vpop.f32.mrf.mxu0 }
 0xc12   :  { %v2136_v41 = vadd.f32 %v2135_v40, %v2059_v4  ;;  %v2248_v36 = vpop.f32.mrf.mxu1 }
 0xc13   :  { %v5956_v42 = vpop.f32.mrf.mxu0 }
 0xc14   :  { %v2143_v44 = vadd.f32 %v7251_v39, %v2136_v41  ;;  %v5967_v47 = vpop.f32.mrf.mxu1  ;;  %v7296_v42 = vld [vmem:[#allocation8 + $0x38] sm:$0xff] }
 0xc15   :  { %v7299_v47 = vld [vmem:[#allocation8 + $0x30] sm:$0xff] }
 0xc16   :  { %6405 = vtanh.f32 %v2143_v44  ;;  %v5399_v16 = vmul.f32 -1.442695, %v2143_v44 }
 0xc1a   :  { %v2318_v63 = vpop.f32.mrf.mxu0 }
 0xc1b   :  { %v2426_v3 = vpop.f32.mrf.mxu1  ;;  %v2319_v8 = vadd.f32 %v2318_v63, %v2248_v36  ;;  %v7305_v63 = vld [vmem:[#allocation8 + $0x28] sm:$0xff] }
 0xc1c   :  { %v5978_v19 = vpop.f32.mrf.mxu0 }
 0xc1d   :  { %v5989_v5 = vpop.f32.mrf.mxu1  ;;  %v2326_v12 = vadd.f32 %v6935_v50, %v2319_v8  ;;  %v2632_v19 = vld [vmem:[#allocation5 + $0x8] sm:$0xf] }
 0xc1f   :  { %v5403_v21 = vmul.f32 -1.442695, %v2326_v12 }
 0xc23   :  { %v6406_v60 = vpop.eup %6405  ;;  %v2496_v15 = vpop.f32.mrf.mxu0 }
 0xc24   :  { %v2497_v62 = vadd.f32 %v2496_v15, %v2426_v3  ;;  %2153 = vrot.lane.b32.xlu0 %v6406_v60, %s6719_s20  ;;  %v7309_v3 = vld [vmem:[#allocation8 + $0x20] sm:$0xff]  ;;  %v7316_v60 = vld [vmem:[#allocation5] sm:$0xff]  ;;  %v2630_v15 = vld [vmem:[#allocation2 + $0xa] sm:$0x3] }
 0xc25   :  { %v6000_v9 = vpop.f32.mrf.mxu0 }
 0xc26   :  { %v2504_v10 = vadd.f32 %v7035_v59, %v2497_v62  ;;  %v7322_v62 = vld [vmem:[#allocation7 + $0x18] sm:$0xff]  ;;  %v7327_v9 = vld [vmem:[#allocation7 + $0x10] sm:$0xff] }
 0xc28   :  { %6407 = vtanh.f32 %v2504_v10  ;;  %v5407_v18 = vmul.f32 -1.442695, %v2504_v10  ;;  %v7333_v10 = vld [vmem:[#allocation7 + $0x8] sm:$0xff] }
 0xc29   :  { %6409 = vtanh.f32 %v2326_v12  ;;  %v7339_v12 = vld [vmem:[#allocation7] sm:$0xff] }
 0xc2a   :  { %6411 = vpow2.f32 %v5399_v16 }
 0xc2b   :  { %6413 = vpow2.f32 %v5407_v18 }
 0xc35   :  { %v6408_v13 = vpop.eup %6407 }
 0xc36   :  { %2514 = vrot.lane.b32.xlu1 %v6408_v13, %s6719_s20  ;;  %v6410_v14 = vpop.eup %6409 }
 0xc37   :  { %v6412_v17 = vpop.eup %6411 }
 0xc38   :  { %v2147_v20 = vadd.f32 1.0, %v6412_v17  ;;  %v6414_v59 = vpop.eup %6413 }
 0xc39   :  { %v2508_v23 = vadd.f32 1.0, %v6414_v59 }
 0xc3a   :  { %2336 = vrot.lane.b32.xlu1 %v6410_v14, %s6719_s20  ;;  %6415 = vrcp.f32 %v2147_v20 }
 0xc3b   :  { %6417 = vpow2.f32 %v5403_v21 }
 0xc3c   :  { %6419 = vrcp.f32 %v2508_v23 }
 0xc47   :  { %v6416_v1 = vpop.eup %6415 }
 0xc48   :  { %v6418_v24 = vpop.eup %6417  ;;  %v2151_v53 = vmul.f32 %v6416_v1, %v7164_v27  ;;  %v7275_v27 = vld [vmem:[#allocation8 + $0x18] sm:$0xff] }
 0xc49   :  { %v2330_v25 = vadd.f32 1.0, %v6418_v24  ;;  %v6420_v26 = vpop.eup %6419  ;;  %6013 = vmatpush3.msra.mxu0 %v7275_v27 }
 0xc4a   :  { %v2512_v52 = vmul.f32 %v6420_v26, %v7169_v35  ;;  %6014 = vmatprep.subr.mxu0 %v6717_v0  ;;  %v7281_v35 = vld [vmem:[#allocation8 + $0x8] sm:$0xff] }
 0xc4b   :  { %6421 = vrcp.f32 %v2330_v25  ;;  %6015 = vmatpush3.msra.mxu0 %v7277_v58 }
 0xc4c   :  { %6016 = vmatprep.subr.mxu0 %v6717_v0 }
 0xc4d   :  { %6017 = vmatpush3.msra.mxu0 %v7281_v35 }
 0xc4e   :  { %6018 = vmatprep.subr.mxu0 %v6717_v0 }
 0xc58   :  { %v6422_v33 = vpop.eup %6421 }
 0xc59   :  { %v2334_v55 = vmul.f32 %v6422_v33, %v7173_v7  ;;  %v7285_v7 = vld [vmem:[#allocation8] sm:$0xff] }
 0xc5a   :  { %6019 = vmatpush3.msra.mxu0 %v7285_v7 }
 0xc5b   :  { %6030 = vmatprep.subr.mxu0 %v6717_v0 }
 0xc96   :  { %v2154_v50 = vpop.permute.xlu0 %2153 }
 0xc97   :  { %v2156_v22 = vmul.f32 %v6416_v1, %v2154_v50 }
 0xc99   :  { %2158 = vrot.lane.b32.xlu1 %v2156_v22, %s6712_s23 }
 0xca8   :  { %v2515_v28 = vpop.permute.xlu1 %2514 }
 0xca9   :  { %v2517_v6 = vmul.f32 %v6420_v26, %v2515_v28  ;;  %v7393_v28 = vld [vmem:[%s7807_s4 + $0x2] ss:$0 sm:$0xff] }
 0xcab   :  { %2519 = vrot.lane.b32.xlu0 %v2517_v6, %s6712_s23 }
 0xcac   :  { %v2337_v46 = vpop.permute.xlu1 %2336 }
 0xcad   :  { %v2339_v48 = vmul.f32 %v6422_v33, %v2337_v46 }
 0xcaf   :  { %2341 = vrot.lane.b32.xlu0 %v2339_v48, %s6712_s23 }
 0xd0b   :  { %v2159_v49 = vpop.permute.xlu1 %2158 }
 0xd0c   :  { %v7263_v51 = vadd.f32 %v2159_v49, %v2151_v53  ;;  %v7399_v53 = vld [vmem:[%s7807_s4 + $0x1] ss:$0 sm:$0xff] }
 0xd0e   :  { %6423 = vtanh.f32 %v7263_v51 }
 0xd1b   :  { %v6424_v57 = vpop.eup %6423 }
 0xd1c   :  { %2164 = vrot.lane.b32.xlu0 %v6424_v57, %s6719_s20 }
 0xd1d   :  { %v2520_v54 = vpop.permute.xlu0 %2519 }
 0xd1e   :  { %v7268_v61 = vadd.f32 %v2520_v54, %v2512_v52 }
 0xd20   :  { %6425 = vtanh.f32 %v7268_v61 }
 0xd21   :  { %v2342_v56 = vpop.permute.xlu0 %2341 }
 0xd22   :  { %v7272_v11 = vadd.f32 %v2342_v56, %v2334_v55 }
 0xd24   :  { %6427 = vtanh.f32 %v7272_v11 }
 0xd2d   :  { %v6426_v29 = vpop.eup %6425 }
 0xd2e   :  { %2525 = vrot.lane.b32.xlu1 %v6426_v29, %s6719_s20 }
 0xd31   :  { %v6428_v30 = vpop.eup %6427 }
 0xd32   :  { %2347 = vrot.lane.b32.xlu1 %v6428_v30, %s6719_s20 }
 0xd8e   :  { %v2165_v4 = vpop.permute.xlu0 %2164 }
 0xd8f   :  { %v2167_v31 = vmul.f32 %v6416_v1, %v2165_v4 }
 0xd91   :  { %2639 = vrot.lane.b32.xlu1 %v2167_v31, %s6712_s23 }
 0xda0   :  { %v2526_v38 = vpop.permute.xlu1 %2525 }
 0xda1   :  { %v2528_v40 = vmul.f32 %v6420_v26, %v2526_v38 }
 0xda3   :  { %2541 = vrot.lane.b32.xlu0 %v2528_v40, %s6712_s23 }
 0xda4   :  { %v2348_v41 = vpop.permute.xlu1 %2347 }
 0xda5   :  { %v2350_v36 = vmul.f32 %v6422_v33, %v2348_v41 }
 0xda7   :  { %2828 = vrot.lane.b32.xlu0 %v2350_v36, %s6712_s23 }
 0xe03   :  { %v2640_v44 = vpop.permute.xlu1 %2639 }
 0xe04   :  { %6021 = vmatmul.mubr.msk.f32.vlgmr.msra.gmra.mxu0 %vm151_vm3, %v2640_v44 }
 0xe05   :  { %6031 = vmatpush3.msra.mxu0 %v7296_v42  ;;  %6038 = vmatprep.mubr.msk.f32.mxu0 %vm6718_vm0, %v6717_v0 }
 0xe06   :  { %6032 = vmatprep.subr.mxu0 %v6717_v0 }
 0xe07   :  { %6033 = vmatpush3.msra.mxu0 %v7299_v47 }
 0xe08   :  { %6034 = vmatprep.subr.mxu0 %v6717_v0 }
 0xe09   :  { %6035 = vmatpush3.msra.mxu0 %v7305_v63 }
 0xe0a   :  { %6036 = vmatprep.subr.mxu0 %v6717_v0 }
 0xe0b   :  { %6037 = vmatpush3.msra.mxu0 %v7309_v3 }
 0xe0c   :  { %6052 = vmatprep.subr.mxu0 %v6717_v0 }
 0xe15   :  { %v2542_v5 = vpop.permute.xlu0 %2541 }
 0xe16   :  { %6010 = vmatmul.mubr.msk.f32.vlgmr.msra.gmra.mxu1 %vm151_vm3, %v2542_v5 }
 0xe17   :  { %6024 = vmatpush3.msk.msra.mxu1 %vm229_vm1, %v2632_v19  ;;  %6027 = vmatprep.mubr.msk.f32.mxu1 %vm6718_vm0, %v6717_v0 }
 0xe18   :  { %6025 = vmatprep.subr.mxu1 %v6717_v0 }
 0xe19   :  { %6026 = vmatpush3.msra.mxu1 %v7316_v60  ;;  %v2829_v8 = vpop.permute.xlu0 %2828 }
 0xe1a   :  { %6041 = vmatprep.subr.mxu1 %v6717_v0  ;;  %6028 = vmatmul.mubr.msk.f32.vlgmr.msra.gmra.mxu1 %vm225_vm2, %v2630_v15 }
 0xe1b   :  { %6039 = vmatmul.mubr.msk.f32.vlgmr.msra.gmra.mxu0 %vm151_vm3, %v2829_v8  ;;  %6042 = vmatpush3.msra.mxu1 %v7322_v62 }
 0xe1c   :  { %6053 = vmatpush3.msra.mxu0 %v6974_v34  ;;  %6043 = vmatprep.subr.mxu1 %v6717_v0  ;;  %v7350_v34 = vld [vmem:[#allocation7 + $0x38] sm:$0xff] }
 0xe1d   :  { %6054 = vmatprep.subr.mxu0 %v6717_v0  ;;  %6044 = vmatpush3.msra.mxu1 %v7327_v9 }
 0xe1e   :  { %6055 = vmatpush3.msra.mxu0 %v6981_v37  ;;  %6045 = vmatprep.subr.mxu1 %v6717_v0  ;;  %v7357_v37 = vld [vmem:[#allocation7 + $0x30] sm:$0xff] }
 0xe1f   :  { %6056 = vmatprep.subr.mxu0 %v6717_v0  ;;  %6046 = vmatpush3.msra.mxu1 %v7333_v10 }
 0xe20   :  { %6057 = vmatpush3.msra.mxu0 %v6989_v43  ;;  %6047 = vmatprep.subr.mxu1 %v6717_v0  ;;  %v7363_v43 = vld [vmem:[#allocation7 + $0x28] sm:$0xff] }
 0xe21   :  { %6058 = vmatprep.subr.mxu0 %v6717_v0  ;;  %6048 = vmatpush3.msra.mxu1 %v7339_v12 }
 0xe22   :  { %6049 = vmatprep.mubr.msk.f32.mxu1 %vm6718_vm0, %v6717_v0  ;;  %6059 = vmatpush3.msra.mxu0 %v6997_v45  ;;  %v7370_v45 = vld [vmem:[#allocation7 + $0x20] sm:$0xff] }
 0xe23   :  { %6060 = vmatprep.mubr.msk.f32.mxu0 %vm6718_vm0, %v6717_v0  ;;  %6050 = vmatmul.mubr.msk.f32.vlgmr.msra.gmra.mxu1 %vm151_vm3, %v2640_v44 }
 0xe24   :  { %6061 = vmatmul.mubr.msk.f32.vlgmr.msra.gmra.mxu0 %vm151_vm3, %v2542_v5  ;;  %6063 = vmatprep.subr.mxu1 %v6717_v0 }
 0xe25   :  { %6064 = vmatpush3.msra.mxu1 %v7350_v34  ;;  %6071 = vmatprep.mubr.msk.f32.mxu1 %vm6718_vm0, %v6717_v0 }
 0xe26   :  { %6065 = vmatprep.subr.mxu1 %v6717_v0  ;;  %6074 = vmatprep.subr.mxu0 %v6717_v0 }
 0xe27   :  { %6066 = vmatpush3.msra.mxu1 %v7357_v37  ;;  %6082 = vmatprep.mubr.msk.f32.mxu0 %vm6718_vm0, %v6717_v0 }
 0xe28   :  { %6067 = vmatprep.subr.mxu1 %v6717_v0 }
 0xe29   :  { %6068 = vmatpush3.msra.mxu1 %v7363_v43 }
 0xe2a   :  { %6069 = vmatprep.subr.mxu1 %v6717_v0 }
 0xe2b   :  { %6070 = vmatpush3.msra.mxu1 %v7370_v45 }
 0xe2c   :  { %6072 = vmatmul.mubr.msk.f32.vlgmr.msra.gmra.mxu1 %vm151_vm3, %v2829_v8  ;;  %6085 = vmatprep.subr.mxu1 %v6717_v0 }
 0xe2d   :  { %6086 = vmatpush3.msra.mxu1 %v7275_v27  ;;  %6093 = vmatprep.mubr.msk.f32.mxu1 %vm6718_vm0, %v6717_v0 }
 0xe2e   :  { %6087 = vmatprep.subr.mxu1 %v6717_v0 }
 0xe2f   :  { %6088 = vmatpush3.msra.mxu1 %v7277_v58 }
 0xe30   :  { %6089 = vmatprep.subr.mxu1 %v6717_v0 }
 0xe31   :  { %6090 = vmatpush3.msra.mxu1 %v7281_v35 }
 0xe32   :  { %6091 = vmatprep.subr.mxu1 %v6717_v0 }
 0xe33   :  { %6092 = vmatpush3.msra.mxu1 %v7285_v7 }
 0xe34   :  { %6103 = vmatprep.subr.mxu1 %v6717_v0 }
 0xec4   :  { %v2709_v13 = vpop.f32.mrf.mxu0 }
 0xec6   :  { %v6022_v14 = vpop.f32.mrf.mxu0 }
 0xed6   :  { %v7387_v16 = vpop.f32.mrf.mxu1 }
 0xed8   :  { %v6011_v17 = vpop.f32.mrf.mxu1 }
 0xeda   :  { %v2785_v18 = vpop.f32.mrf.mxu1 }
 0xedb   :  { %v2786_v20 = vadd.f32 %v2785_v18, %v2709_v13  ;;  %v2898_v21 = vpop.f32.mrf.mxu0 }
 0xedc   :  { %v6029_v59 = vpop.f32.mrf.mxu1 }
 0xedd   :  { %v2793_v1 = vadd.f32 %v7251_v39, %v2786_v20  ;;  %v6040_v50 = vpop.f32.mrf.mxu0 }
 0xedf   :  { %6429 = vtanh.f32 %v2793_v1  ;;  %v5414_v55 = vmul.f32 -1.442695, %v2793_v1 }
 0xee3   :  { %v2968_v22 = vpop.f32.mrf.mxu1 }
 0xee4   :  { %v3076_v23 = vpop.f32.mrf.mxu0  ;;  %v2969_v46 = vadd.f32 %v2968_v22, %v2898_v21 }
 0xee5   :  { %v6051_v24 = vpop.f32.mrf.mxu1 }
 0xee6   :  { %v6062_v25 = vpop.f32.mrf.mxu0  ;;  %v2976_v57 = vadd.f32 %v7399_v53, %v2969_v46 }
 0xee8   :  { %v5418_v4 = vmul.f32 -1.442695, %v2976_v57 }
 0xeec   :  { %v6430_v26 = vpop.eup %6429  ;;  %v3146_v6 = vpop.f32.mrf.mxu1 }
 0xeed   :  { %v3147_v33 = vadd.f32 %v3146_v6, %v3076_v23  ;;  %2803 = vrot.lane.b32.xlu0 %v6430_v26, %s6719_s20  ;;  %v7423_v6 = vld [vmem:[#allocation11 + $0x18] sm:$0xff] }
 0xeee   :  { %v6073_v48 = vpop.f32.mrf.mxu1  ;;  %6075 = vmatpush3.msra.mxu0 %v7423_v6 }
 0xeef   :  { %v3154_v49 = vadd.f32 %v7393_v28, %v3147_v33  ;;  %6076 = vmatprep.subr.mxu0 %v6717_v0  ;;  %v7433_v33 = vld [vmem:[#allocation11] sm:$0xff] }
 0xef1   :  { %6431 = vtanh.f32 %v3154_v49  ;;  %v5422_v29 = vmul.f32 -1.442695, %v3154_v49 }
 0xef2   :  { %6433 = vtanh.f32 %v2976_v57 }
 0xef3   :  { %6435 = vpow2.f32 %v5414_v55 }
 0xef4   :  { %6437 = vpow2.f32 %v5422_v29 }
 0xefe   :  { %v6432_v52 = vpop.eup %6431 }
 0xeff   :  { %3164 = vrot.lane.b32.xlu1 %v6432_v52, %s6719_s20  ;;  %v6434_v54 = vpop.eup %6433 }
 0xf00   :  { %v6436_v56 = vpop.eup %6435 }
 0xf01   :  { %v2797_v30 = vadd.f32 1.0, %v6436_v56  ;;  %v6438_v31 = vpop.eup %6437  ;;  %v3282_v56 = vld [vmem:[#allocation5 + $0x8] sm:$0xf] }
 0xf02   :  { %v3158_v36 = vadd.f32 1.0, %v6438_v31  ;;  %v7459_v31 = vld [vmem:[#allocation8 + $0x58] sm:$0xff] }
 0xf03   :  { %2986 = vrot.lane.b32.xlu1 %v6434_v54, %s6719_s20  ;;  %6439 = vrcp.f32 %v2797_v30  ;;  %v3280_v30 = vld [vmem:[#allocation2 + $0xc] sm:$0x3] }
 0xf04   :  { %6441 = vpow2.f32 %v5418_v4 }
 0xf05   :  { %6443 = vrcp.f32 %v3158_v36 }
 0xf10   :  { %v6440_v38 = vpop.eup %6439 }
 0xf11   :  { %v6442_v44 = vpop.eup %6441  ;;  %v2801_v18 = vmul.f32 %v6440_v38, %v7263_v51 }
 0xf12   :  { %v2980_v19 = vadd.f32 1.0, %v6442_v44  ;;  %v6444_v5 = vpop.eup %6443 }
 0xf13   :  { %v3162_v1 = vmul.f32 %v6444_v5, %v7268_v61  ;;  %v7425_v61 = vld [vmem:[#allocation11 + $0x10] sm:$0xff] }
 0xf14   :  { %6445 = vrcp.f32 %v2980_v19  ;;  %6077 = vmatpush3.msra.mxu0 %v7425_v61 }
 0xf15   :  { %6078 = vmatprep.subr.mxu0 %v6717_v0 }
 0xf21   :  { %v6446_v13 = vpop.eup %6445 }
 0xf22   :  { %v2984_v23 = vmul.f32 %v6446_v13, %v7272_v11  ;;  %v7429_v11 = vld [vmem:[#allocation11 + $0x8] sm:$0xff] }
 0xf23   :  { %6079 = vmatpush3.msra.mxu0 %v7429_v11 }
 0xf24   :  { %6080 = vmatprep.subr.mxu0 %v6717_v0 }
 0xf25   :  { %6081 = vmatpush3.msra.mxu0 %v7433_v33 }
 0xf26   :  { %6096 = vmatprep.subr.mxu0 %v6717_v0 }
 0xf5f   :  { %v2804_v40 = vpop.permute.xlu0 %2803 }
 0xf60   :  { %v2806_v41 = vmul.f32 %v6440_v38, %v2804_v40  ;;  %v7471_v40 = vld [vmem:[#allocation8 + $0x48] sm:$0xff] }
 0xf62   :  { %2808 = vrot.lane.b32.xlu1 %v2806_v41, %s6712_s23  ;;  %v7477_v41 = vld [vmem:[#allocation8 + $0x40] sm:$0xff] }
 0xf71   :  { %v3165_v15 = vpop.permute.xlu1 %3164 }
 0xf72   :  { %v3167_v8 = vmul.f32 %v6444_v5, %v3165_v15 }
 0xf74   :  { %3169 = vrot.lane.b32.xlu0 %v3167_v8, %s6712_s23 }
 0xf75   :  { %v2987_v14 = vpop.permute.xlu1 %2986 }
 0xf76   :  { %v2989_v17 = vmul.f32 %v6446_v13, %v2987_v14 }
 0xf78   :  { %2991 = vrot.lane.b32.xlu0 %v2989_v17, %s6712_s23 }
 0xfd4   :  { %v2809_v20 = vpop.permute.xlu1 %2808 }
 0xfd5   :  { %v7409_v21 = vadd.f32 %v2809_v20, %v2801_v18 }
 0xfd7   :  { %6447 = vtanh.f32 %v7409_v21 }
 0xfe4   :  { %v6448_v59 = vpop.eup %6447 }
 0xfe5   :  { %2814 = vrot.lane.b32.xlu0 %v6448_v59, %s6719_s20 }
 0xfe6   :  { %v3170_v50 = vpop.permute.xlu0 %3169 }
 0xfe7   :  { %v7414_v22 = vadd.f32 %v3170_v50, %v3162_v1 }
 0xfe9   :  { %6449 = vtanh.f32 %v7414_v22 }
 0xfea   :  { %v2992_v24 = vpop.permute.xlu0 %2991 }
 0xfeb   :  { %v7418_v25 = vadd.f32 %v2992_v24, %v2984_v23 }
 0xfed   :  { %6451 = vtanh.f32 %v7418_v25 }
 0xff6   :  { %v6450_v51 = vpop.eup %6449 }
 0xff7   :  { %3175 = vrot.lane.b32.xlu1 %v6450_v51, %s6719_s20 }
 0xffa   :  { %v6452_v26 = vpop.eup %6451 }
 0xffb   :  { %2997 = vrot.lane.b32.xlu1 %v6452_v26, %s6719_s20 }
0x1057   :  { %v2815_v46 = vpop.permute.xlu0 %2814 }
0x1058   :  { %v2817_v48 = vmul.f32 %v6440_v38, %v2815_v46  ;;  %v7465_v38 = vld [vmem:[#allocation8 + $0x50] sm:$0xff] }
0x105a   :  { %3289 = vrot.lane.b32.xlu1 %v2817_v48, %s6712_s23 }
0x1069   :  { %v3176_v49 = vpop.permute.xlu1 %3175 }
0x106a   :  { %v3178_v57 = vmul.f32 %v6444_v5, %v3176_v49 }
0x106c   :  { %3191 = vrot.lane.b32.xlu0 %v3178_v57, %s6712_s23 }
0x106d   :  { %v2998_v52 = vpop.permute.xlu1 %2997 }
0x106e   :  { %v3000_v54 = vmul.f32 %v6446_v13, %v2998_v52 }
0x1070   :  { %3478 = vrot.lane.b32.xlu0 %v3000_v54, %s6712_s23 }
0x10cc   :  { %v3290_v55 = vpop.permute.xlu1 %3289 }
0x10cd   :  { %6094 = vmatmul.mubr.msk.f32.vlgmr.msra.gmra.mxu1 %vm151_vm3, %v3290_v55 }
0x10ce   :  { %6104 = vmatpush3.msra.mxu1 %v7296_v42  ;;  %6111 = vmatprep.mubr.msk.f32.mxu1 %vm6718_vm0, %v6717_v0 }
0x10cf   :  { %6105 = vmatprep.subr.mxu1 %v6717_v0 }
0x10d0   :  { %6106 = vmatpush3.msra.mxu1 %v7299_v47 }
0x10d1   :  { %6107 = vmatprep.subr.mxu1 %v6717_v0 }
0x10d2   :  { %6108 = vmatpush3.msra.mxu1 %v7305_v63 }
0x10d3   :  { %6109 = vmatprep.subr.mxu1 %v6717_v0 }
0x10d4   :  { %6110 = vmatpush3.msra.mxu1 %v7309_v3 }
0x10d5   :  { %6125 = vmatprep.subr.mxu1 %v6717_v0 }
0x10de   :  { %v3192_v29 = vpop.permute.xlu0 %3191 }
0x10df   :  { %6083 = vmatmul.mubr.msk.f32.vlgmr.msra.gmra.mxu0 %vm151_vm3, %v3192_v29 }
0x10e0   :  { %6097 = vmatpush3.msk.msra.mxu0 %vm229_vm1, %v3282_v56  ;;  %6100 = vmatprep.mubr.msk.f32.mxu0 %vm6718_vm0, %v6717_v0 }
0x10e1   :  { %6098 = vmatprep.subr.mxu0 %v6717_v0 }
0x10e2   :  { %6099 = vmatpush3.msra.mxu0 %v7316_v60  ;;  %v3479_v4 = vpop.permute.xlu0 %3478 }
0x10e3   :  { %6114 = vmatprep.subr.mxu0 %v6717_v0  ;;  %6101 = vmatmul.mubr.msk.f32.vlgmr.msra.gmra.mxu0 %vm225_vm2, %v3280_v30 }
0x10e4   :  { %6112 = vmatmul.mubr.msk.f32.vlgmr.msra.gmra.mxu1 %vm151_vm3, %v3479_v4  ;;  %6115 = vmatpush3.msra.mxu0 %v7322_v62 }
0x10e5   :  { %6126 = vmatpush3.msra.mxu1 %v7459_v31  ;;  %6116 = vmatprep.subr.mxu0 %v6717_v0 }
0x10e6   :  { %6127 = vmatprep.subr.mxu1 %v6717_v0  ;;  %6117 = vmatpush3.msra.mxu0 %v7327_v9 }
0x10e7   :  { %6128 = vmatpush3.msra.mxu1 %v7465_v38  ;;  %6118 = vmatprep.subr.mxu0 %v6717_v0 }
0x10e8   :  { %6129 = vmatprep.subr.mxu1 %v6717_v0  ;;  %6119 = vmatpush3.msra.mxu0 %v7333_v10 }
0x10e9   :  { %6130 = vmatpush3.msra.mxu1 %v7471_v40  ;;  %6120 = vmatprep.subr.mxu0 %v6717_v0 }
0x10ea   :  { %6131 = vmatprep.subr.mxu1 %v6717_v0  ;;  %6121 = vmatpush3.msra.mxu0 %v7339_v12 }
0x10eb   :  { %6122 = vmatprep.mubr.msk.f32.mxu0 %vm6718_vm0, %v6717_v0  ;;  %6132 = vmatpush3.msra.mxu1 %v7477_v41 }
0x10ec   :  { %6133 = vmatprep.mubr.msk.f32.mxu1 %vm6718_vm0, %v6717_v0  ;;  %6123 = vmatmul.mubr.msk.f32.vlgmr.msra.gmra.mxu0 %vm151_vm3, %v3290_v55 }
0x10ed   :  { %6134 = vmatmul.mubr.msk.f32.vlgmr.msra.gmra.mxu1 %vm151_vm3, %v3192_v29  ;;  %6136 = vmatprep.subr.mxu0 %v6717_v0 }
0x10ee   :  { %6137 = vmatpush3.msra.mxu0 %v7350_v34  ;;  %6144 = vmatprep.mubr.msk.f32.mxu0 %vm6718_vm0, %v6717_v0 }
0x10ef   :  { %6138 = vmatprep.subr.mxu0 %v6717_v0  ;;  %6147 = vmatprep.subr.mxu1 %v6717_v0 }
0x10f0   :  { %6139 = vmatpush3.msra.mxu0 %v7357_v37  ;;  %6148 = vmatpush3.msra.mxu1 %v7423_v6 }
0x10f1   :  { %6140 = vmatprep.subr.mxu0 %v6717_v0  ;;  %6149 = vmatprep.subr.mxu1 %v6717_v0 }
0x10f2   :  { %6141 = vmatpush3.msra.mxu0 %v7363_v43  ;;  %6150 = vmatpush3.msra.mxu1 %v7425_v61 }
0x10f3   :  { %6142 = vmatprep.subr.mxu0 %v6717_v0  ;;  %6151 = vmatprep.subr.mxu1 %v6717_v0 }
0x10f4   :  { %6143 = vmatpush3.msra.mxu0 %v7370_v45  ;;  %6152 = vmatpush3.msra.mxu1 %v7429_v11 }
0x10f5   :  { %6145 = vmatmul.mubr.msk.f32.vlgmr.msra.gmra.mxu0 %vm151_vm3, %v3479_v4  ;;  %6158 = vmatprep.subr.mxu0 %v6717_v0 }
0x10f6   :  { %6159 = vmatpush3.msra.mxu0 %v7275_v27  ;;  %6166 = vmatprep.mubr.msk.f32.mxu0 %vm6718_vm0, %v6717_v0 }
0x10f7   :  { %6160 = vmatprep.subr.mxu0 %v6717_v0  ;;  %6153 = vmatprep.subr.mxu1 %v6717_v0 }
0x10f8   :  { %6161 = vmatpush3.msra.mxu0 %v7277_v58  ;;  %6154 = vmatpush3.msra.mxu1 %v7433_v33 }
0x10f9   :  { %6162 = vmatprep.subr.mxu0 %v6717_v0  ;;  %6155 = vmatprep.mubr.msk.f32.mxu1 %vm6718_vm0, %v6717_v0 }
0x10fa   :  { %6163 = vmatpush3.msra.mxu0 %v7281_v35  ;;  %6169 = vmatprep.subr.mxu1 %v6717_v0 }
0x10fb   :  { %6164 = vmatprep.subr.mxu0 %v6717_v0 }
0x10fc   :  { %6165 = vmatpush3.msra.mxu0 %v7285_v7 }
0x10fd   :  { %6176 = vmatprep.subr.mxu0 %v6717_v0 }
0x118d   :  { %v3359_v27 = vpop.f32.mrf.mxu1 }
0x118f   :  { %v6095_v36 = vpop.f32.mrf.mxu1 }
0x119f   :  { %v7523_v58 = vpop.f32.mrf.mxu0 }
0x11a1   :  { %v6084_v44 = vpop.f32.mrf.mxu0 }
0x11a3   :  { %v3435_v19 = vpop.f32.mrf.mxu0 }
0x11a4   :  { %v3436_v5 = vadd.f32 %v3435_v19, %v3359_v27  ;;  %v3548_v15 = vpop.f32.mrf.mxu1 }
0x11a5   :  { %v6102_v8 = vpop.f32.mrf.mxu0 }
0x11a6   :  { %v3443_v13 = vadd.f32 %v7251_v39, %v3436_v5  ;;  %v6113_v35 = vpop.f32.mrf.mxu1 }
0x11a8   :  { %6453 = vtanh.f32 %v3443_v13  ;;  %v5429_v46 = vmul.f32 -1.442695, %v3443_v13 }
0x11ac   :  { %v3618_v14 = vpop.f32.mrf.mxu0 }
0x11ad   :  { %v3726_v17 = vpop.f32.mrf.mxu1  ;;  %v3619_v50 = vadd.f32 %v3618_v14, %v3548_v15 }
0x11ae   :  { %v6124_v18 = vpop.f32.mrf.mxu0 }
0x11af   :  { %v6135_v20 = vpop.f32.mrf.mxu1  ;;  %v3626_v51 = vadd.f32 %v7399_v53, %v3619_v50 }
0x11b1   :  { %v5433_v52 = vmul.f32 -1.442695, %v3626_v51 }
0x11b5   :  { %v6454_v7 = vpop.eup %6453  ;;  %v3796_v59 = vpop.f32.mrf.mxu0 }
0x11b6   :  { %v3797_v1 = vadd.f32 %v3796_v59, %v3726_v17  ;;  %3453 = vrot.lane.b32.xlu0 %v6454_v7, %s6719_s20 }
0x11b7   :  { %v6146_v23 = vpop.f32.mrf.mxu0 }
0x11b8   :  { %v3804_v24 = vadd.f32 %v7393_v28, %v3797_v1 }
0x11ba   :  { %6455 = vtanh.f32 %v3804_v24  ;;  %v5437_v49 = vmul.f32 -1.442695, %v3804_v24 }
0x11bb   :  { %6457 = vtanh.f32 %v3626_v51 }
0x11bc   :  { %6459 = vpow2.f32 %v5429_v46 }
0x11bd   :  { %6461 = vpow2.f32 %v5437_v49 }
0x11c7   :  { %v6456_v39 = vpop.eup %6455 }
0x11c8   :  { %3814 = vrot.lane.b32.xlu1 %v6456_v39, %s6719_s20  ;;  %v6458_v26 = vpop.eup %6457 }
0x11c9   :  { %v6460_v48 = vpop.eup %6459 }
0x11ca   :  { %v3447_v57 = vadd.f32 1.0, %v6460_v48  ;;  %v6462_v54 = vpop.eup %6461  ;;  %v3932_v48 = vld [vmem:[#allocation5 + $0x8] sm:$0xf] }
0x11cb   :  { %v3808_v30 = vadd.f32 1.0, %v6462_v54 }
0x11cc   :  { %3636 = vrot.lane.b32.xlu1 %v6458_v26, %s6719_s20  ;;  %6463 = vrcp.f32 %v3447_v57  ;;  %v3930_v57 = vld [vmem:[#allocation2 + $0xe] sm:$0x3] }
0x11cd   :  { %6465 = vpow2.f32 %v5433_v52 }
0x11ce   :  { %6467 = vrcp.f32 %v3808_v30 }
0x11d9   :  { %v6464_v55 = vpop.eup %6463 }
0x11da   :  { %v6466_v4 = vpop.eup %6465  ;;  %v3451_v13 = vmul.f32 %v6464_v55, %v7409_v21 }
0x11db   :  { %v3630_v27 = vadd.f32 1.0, %v6466_v4  ;;  %v6468_v36 = vpop.eup %6467 }
0x11dc   :  { %v3812_v18 = vmul.f32 %v6468_v36, %v7414_v22 }
0x11dd   :  { %6469 = vrcp.f32 %v3630_v27 }
0x11ea   :  { %v6470_v5 = vpop.eup %6469 }
0x11eb   :  { %v3634_v59 = vmul.f32 %v6470_v5, %v7418_v25 }
0x1228   :  { %v3454_v56 = vpop.permute.xlu0 %3453 }
0x1229   :  { %v3456_v29 = vmul.f32 %v6464_v55, %v3454_v56 }
0x122b   :  { %3458 = vrot.lane.b32.xlu1 %v3456_v29, %s6712_s23 }
0x123a   :  { %v3815_v44 = vpop.permute.xlu1 %3814 }
0x123b   :  { %v3817_v19 = vmul.f32 %v6468_v36, %v3815_v44 }
0x123d   :  { %3819 = vrot.lane.b32.xlu0 %v3817_v19, %s6712_s23 }
0x123e   :  { %v3637_v15 = vpop.permute.xlu1 %3636 }
0x123f   :  { %v3639_v8 = vmul.f32 %v6470_v5, %v3637_v15 }
0x1241   :  { %3641 = vrot.lane.b32.xlu0 %v3639_v8, %s6712_s23 }
0x129d   :  { %v3459_v35 = vpop.permute.xlu1 %3458 }
0x129e   :  { %v7535_v14 = vadd.f32 %v3459_v35, %v3451_v13 }
0x12a0   :  { %6471 = vtanh.f32 %v7535_v14 }
0x12ad   :  { %v6472_v17 = vpop.eup %6471 }
0x12ae   :  { %3464 = vrot.lane.b32.xlu0 %v6472_v17, %s6719_s20 }
0x12af   :  { %v3820_v20 = vpop.permute.xlu0 %3819 }
0x12b0   :  { %v7540_v7 = vadd.f32 %v3820_v20, %v3812_v18 }
0x12b2   :  { %6473 = vtanh.f32 %v7540_v7 }
0x12b3   :  { %v3642_v1 = vpop.permute.xlu0 %3641 }
0x12b4   :  { %v7544_v50 = vadd.f32 %v3642_v1, %v3634_v59 }
0x12b6   :  { %6475 = vtanh.f32 %v7544_v50 }
0x12bf   :  { %v6474_v21 = vpop.eup %6473 }
0x12c0   :  { %3825 = vrot.lane.b32.xlu1 %v6474_v21, %s6719_s20 }
0x12c3   :  { %v6476_v23 = vpop.eup %6475 }
0x12c4   :  { %3647 = vrot.lane.b32.xlu1 %v6476_v23, %s6719_s20 }
0x1320   :  { %v3465_v24 = vpop.permute.xlu0 %3464 }
0x1321   :  { %v3467_v22 = vmul.f32 %v6464_v55, %v3465_v24  ;;  %v5443_v55 = vld [vmem:[%s7807_s4] ss:$0 sm:$0xff] }
0x1323   :  { %3939 = vrot.lane.b32.xlu1 %v3467_v22, %s6712_s23 }
0x1332   :  { %v3826_v51 = vpop.permute.xlu1 %3825 }
0x1333   :  { %v3828_v39 = vmul.f32 %v6468_v36, %v3826_v51 }
0x1335   :  { %3841 = vrot.lane.b32.xlu0 %v3828_v39, %s6712_s23 }
0x1336   :  { %v3648_v25 = vpop.permute.xlu1 %3647 }
0x1337   :  { %v3650_v26 = vmul.f32 %v6470_v5, %v3648_v25 }
0x1339   :  { %4128 = vrot.lane.b32.xlu0 %v3650_v26, %s6712_s23 }
0x1395   :  { %v3940_v46 = vpop.permute.xlu1 %3939 }
0x1396   :  { %6167 = vmatmul.mubr.msk.f32.vlgmr.msra.gmra.mxu0 %vm151_vm3, %v3940_v46 }
0x1397   :  { %6177 = vmatpush3.msra.mxu0 %v7296_v42  ;;  %6184 = vmatprep.mubr.msk.f32.mxu0 %vm6718_vm0, %v6717_v0 }
0x1398   :  { %6178 = vmatprep.subr.mxu0 %v6717_v0 }
0x1399   :  { %6179 = vmatpush3.msra.mxu0 %v7299_v47 }
0x139a   :  { %6180 = vmatprep.subr.mxu0 %v6717_v0 }
0x139b   :  { %6181 = vmatpush3.msra.mxu0 %v7305_v63 }
0x139c   :  { %6182 = vmatprep.subr.mxu0 %v6717_v0 }
0x139d   :  { %6183 = vmatpush3.msra.mxu0 %v7309_v3 }
0x139e   :  { %6198 = vmatprep.subr.mxu0 %v6717_v0 }
0x13a7   :  { %v3842_v49 = vpop.permute.xlu0 %3841 }
0x13a8   :  { %6156 = vmatmul.mubr.msk.f32.vlgmr.msra.gmra.mxu1 %vm151_vm3, %v3842_v49 }
0x13a9   :  { %6170 = vmatpush3.msk.msra.mxu1 %vm229_vm1, %v3932_v48  ;;  %6173 = vmatprep.mubr.msk.f32.mxu1 %vm6718_vm0, %v6717_v0 }
0x13aa   :  { %6171 = vmatprep.subr.mxu1 %v6717_v0 }
0x13ab   :  { %6172 = vmatpush3.msra.mxu1 %v7316_v60  ;;  %v4129_v52 = vpop.permute.xlu0 %4128 }
0x13ac   :  { %6187 = vmatprep.subr.mxu1 %v6717_v0  ;;  %6174 = vmatmul.mubr.msk.f32.vlgmr.msra.gmra.mxu1 %vm225_vm2, %v3930_v57 }
0x13ad   :  { %6185 = vmatmul.mubr.msk.f32.vlgmr.msra.gmra.mxu0 %vm151_vm3, %v4129_v52  ;;  %6188 = vmatpush3.msra.mxu1 %v7322_v62 }
0x13ae   :  { %6199 = vmatpush3.msra.mxu0 %v7459_v31  ;;  %6189 = vmatprep.subr.mxu1 %v6717_v0 }
0x13af   :  { %6200 = vmatprep.subr.mxu0 %v6717_v0  ;;  %6190 = vmatpush3.msra.mxu1 %v7327_v9 }
0x13b0   :  { %6201 = vmatpush3.msra.mxu0 %v7465_v38  ;;  %6191 = vmatprep.subr.mxu1 %v6717_v0 }
0x13b1   :  { %6202 = vmatprep.subr.mxu0 %v6717_v0  ;;  %6192 = vmatpush3.msra.mxu1 %v7333_v10 }
0x13b2   :  { %6203 = vmatpush3.msra.mxu0 %v7471_v40  ;;  %6193 = vmatprep.subr.mxu1 %v6717_v0 }
0x13b3   :  { %6204 = vmatprep.subr.mxu0 %v6717_v0  ;;  %6194 = vmatpush3.msra.mxu1 %v7339_v12 }
0x13b4   :  { %6195 = vmatprep.mubr.msk.f32.mxu1 %vm6718_vm0, %v6717_v0  ;;  %6205 = vmatpush3.msra.mxu0 %v7477_v41 }
0x13b5   :  { %6206 = vmatprep.mubr.msk.f32.mxu0 %vm6718_vm0, %v6717_v0  ;;  %6196 = vmatmul.mubr.msk.f32.vlgmr.msra.gmra.mxu1 %vm151_vm3, %v3940_v46 }
0x13b6   :  { %6207 = vmatmul.mubr.msk.f32.vlgmr.msra.gmra.mxu0 %vm151_vm3, %v3842_v49  ;;  %6209 = vmatprep.subr.mxu1 %v6717_v0 }
0x13b7   :  { %6210 = vmatpush3.msra.mxu1 %v7350_v34  ;;  %6217 = vmatprep.mubr.msk.f32.mxu1 %vm6718_vm0, %v6717_v0 }
0x13b8   :  { %6211 = vmatprep.subr.mxu1 %v6717_v0  ;;  %6220 = vmatprep.subr.mxu0 %v6717_v0 }
0x13b9   :  { %6212 = vmatpush3.msra.mxu1 %v7357_v37  ;;  %6221 = vmatpush3.msra.mxu0 %v7423_v6 }
0x13ba   :  { %6213 = vmatprep.subr.mxu1 %v6717_v0  ;;  %6222 = vmatprep.subr.mxu0 %v6717_v0 }
0x13bb   :  { %6214 = vmatpush3.msra.mxu1 %v7363_v43  ;;  %6223 = vmatpush3.msra.mxu0 %v7425_v61 }
0x13bc   :  { %6215 = vmatprep.subr.mxu1 %v6717_v0  ;;  %6224 = vmatprep.subr.mxu0 %v6717_v0 }
0x13bd   :  { %6216 = vmatpush3.msra.mxu1 %v7370_v45  ;;  %6225 = vmatpush3.msra.mxu0 %v7429_v11 }
0x13be   :  { %6218 = vmatmul.mubr.msk.f32.vlgmr.msra.gmra.mxu1 %vm151_vm3, %v4129_v52  ;;  %6231 = vmatprep.subr.mxu1 %v6717_v0 }
0x13bf   :  { %6232 = vmatpush3.msra.mxu1 %v7296_v42  ;;  %6226 = vmatprep.subr.mxu0 %v6717_v0 }
0x13c0   :  { %6233 = vmatprep.subr.mxu1 %v6717_v0  ;;  %6227 = vmatpush3.msra.mxu0 %v7433_v33 }
0x13c1   :  { %6234 = vmatpush3.msra.mxu1 %v7299_v47  ;;  %6228 = vmatprep.mubr.msk.f32.mxu0 %vm6718_vm0, %v6717_v0 }
0x13c2   :  { %6235 = vmatprep.subr.mxu1 %v6717_v0  ;;  %6242 = vmatprep.subr.mxu0 %v6717_v0 }
0x13c3   :  { %6236 = vmatpush3.msra.mxu1 %v7305_v63  ;;  %6239 = vmatprep.mubr.msk.f32.mxu1 %vm6718_vm0, %v6717_v0 }
0x13c4   :  { %6237 = vmatprep.subr.mxu1 %v6717_v0 }
0x13c5   :  { %6238 = vmatpush3.msra.mxu1 %v7309_v3 }
0x13c6   :  { %6253 = vmatprep.subr.mxu1 %v6717_v0 }
0x1456   :  { %v4009_v42 = vpop.f32.mrf.mxu0 }
0x1458   :  { %v6168_v47 = vpop.f32.mrf.mxu0 }
0x1468   :  { %v7625_v60 = vpop.f32.mrf.mxu1 }
0x146a   :  { %v6157_v54 = vpop.f32.mrf.mxu1 }
0x146c   :  { %v4085_v56 = vpop.f32.mrf.mxu1 }
0x146d   :  { %v4086_v63 = vadd.f32 %v4085_v56, %v4009_v42  ;;  %v4198_v29 = vpop.f32.mrf.mxu0 }
0x146e   :  { %v6175_v30 = vpop.f32.mrf.mxu1 }
0x146f   :  { %v4093_v4 = vadd.f32 %v5443_v55, %v4086_v63  ;;  %v6186_v27 = vpop.f32.mrf.mxu0 }
0x1471   :  { %6477 = vtanh.f32 %v4093_v4  ;;  %v5444_v1 = vmul.f32 -1.442695, %v4093_v4 }
0x1475   :  { %v4268_v36 = vpop.f32.mrf.mxu1 }
0x1476   :  { %v4376_v3 = vpop.f32.mrf.mxu0  ;;  %v4269_v13 = vadd.f32 %v4268_v36, %v4198_v29 }
0x1477   :  { %v6197_v44 = vpop.f32.mrf.mxu1 }
0x1478   :  { %v6208_v19 = vpop.f32.mrf.mxu0  ;;  %v4276_v18 = vadd.f32 %v7399_v53, %v4269_v13 }
0x147a   :  { %v5448_v22 = vmul.f32 -1.442695, %v4276_v18 }
0x147e   :  { %v6478_v5 = vpop.eup %6477  ;;  %v4446_v15 = vpop.f32.mrf.mxu1 }
0x147f   :  { %v4447_v8 = vadd.f32 %v4446_v15, %v4376_v3  ;;  %4103 = vrot.lane.b32.xlu0 %v6478_v5, %s6719_s20 }
0x1480   :  { %v6219_v35 = vpop.f32.mrf.mxu1 }
0x1481   :  { %v4454_v17 = vadd.f32 %v7393_v28, %v4447_v8 }
0x1483   :  { %6479 = vtanh.f32 %v4454_v17  ;;  %v5452_v23 = vmul.f32 -1.442695, %v4454_v17 }
0x1484   :  { %6481 = vtanh.f32 %v4276_v18 }
0x1485   :  { %6483 = vpow2.f32 %v5444_v1 }
0x1486   :  { %6485 = vpow2.f32 %v5452_v23 }
0x1490   :  { %v6480_v20 = vpop.eup %6479 }
0x1491   :  { %4464 = vrot.lane.b32.xlu1 %v6480_v20, %s6719_s20  ;;  %v6482_v59 = vpop.eup %6481 }
0x1492   :  { %v6484_v21 = vpop.eup %6483 }
0x1493   :  { %v4097_v24 = vadd.f32 1.0, %v6484_v21  ;;  %v6486_v51 = vpop.eup %6485 }
0x1494   :  { %v4458_v46 = vadd.f32 1.0, %v6486_v51 }
0x1495   :  { %4286 = vrot.lane.b32.xlu1 %v6482_v59, %s6719_s20  ;;  %6487 = vrcp.f32 %v4097_v24 }
0x1496   :  { %6489 = vpow2.f32 %v5448_v22 }
0x1497   :  { %6491 = vrcp.f32 %v4458_v46 }
0x14a2   :  { %v6488_v39 = vpop.eup %6487 }
0x14a3   :  { %v6490_v48 = vpop.eup %6489  ;;  %v4101_v56 = vmul.f32 %v6488_v39, %v7535_v14 }
0x14a4   :  { %v4280_v49 = vadd.f32 1.0, %v6490_v48  ;;  %v6492_v57 = vpop.eup %6491 }
0x14a5   :  { %v4462_v4 = vmul.f32 %v6492_v57, %v7540_v7 }
0x14a6   :  { %6493 = vrcp.f32 %v4280_v49 }
0x14b3   :  { %v6494_v47 = vpop.eup %6493 }
0x14b4   :  { %v4284_v3 = vmul.f32 %v6494_v47, %v7544_v50 }
0x14f1   :  { %v4104_v25 = vpop.permute.xlu0 %4103 }
0x14f2   :  { %v4106_v26 = vmul.f32 %v6488_v39, %v4104_v25 }
0x14f4   :  { %4108 = vrot.lane.b32.xlu1 %v4106_v26, %s6712_s23 }
0x1503   :  { %v4465_v52 = vpop.permute.xlu1 %4464 }
0x1504   :  { %v4467_v42 = vmul.f32 %v6492_v57, %v4465_v52 }
0x1506   :  { %4469 = vrot.lane.b32.xlu0 %v4467_v42, %s6712_s23 }
0x1507   :  { %v4287_v54 = vpop.permute.xlu1 %4286 }
0x1508   :  { %v4289_v55 = vmul.f32 %v6494_v47, %v4287_v54 }
0x150a   :  { %4291 = vrot.lane.b32.xlu0 %v4289_v55, %s6712_s23 }
0x1566   :  { %v4109_v63 = vpop.permute.xlu1 %4108 }
0x1567   :  { %v4111_v29 = vadd.f32 %v4109_v63, %v4101_v56 }
0x1569   :  { %6495 = vtanh.f32 %v4111_v29 }
0x1576   :  { %v6496_v30 = vpop.eup %6495 }
0x1577   :  { %4114 = vrot.lane.b32.xlu0 %v6496_v30, %s6719_s20  ;;  %v5048_v30 = vld [vmem:[#allocation7 + $0x38] sm:$0xff] }
0x1578   :  { %v4470_v27 = vpop.permute.xlu0 %4469 }
0x1579   :  { %v7641_v36 = vadd.f32 %v4470_v27, %v4462_v4  ;;  %v5047_v27 = vld [vmem:[#allocation7 + $0x30] sm:$0xff] }
0x157b   :  { %6497 = vtanh.f32 %v7641_v36 }
0x157c   :  { %v4292_v44 = vpop.permute.xlu0 %4291 }
0x157d   :  { %v7645_v19 = vadd.f32 %v4292_v44, %v4284_v3  ;;  %v5045_v3 = vld [vmem:[#allocation7 + $0x20] sm:$0xff] }
0x157f   :  { %6499 = vtanh.f32 %v7645_v19 }
0x1588   :  { %v6498_v14 = vpop.eup %6497 }
0x1589   :  { %4475 = vrot.lane.b32.xlu1 %v6498_v14, %s6719_s20 }
0x158c   :  { %v6500_v5 = vpop.eup %6499 }
0x158d   :  { %4297 = vrot.lane.b32.xlu1 %v6500_v5, %s6719_s20 }
0x15e9   :  { %v4115_v8 = vpop.permute.xlu0 %4114 }
0x15ea   :  { %v4117_v35 = vmul.f32 %v6488_v39, %v4115_v8 }
0x15fb   :  { %v4476_v15 = vpop.permute.xlu1 %4475 }
0x15fc   :  { %v4478_v7 = vmul.f32 %v6492_v57, %v4476_v15 }
0x15fe   :  { %4491 = vrot.lane.b32.xlu0 %v4478_v7, %s6712_s23  ;;  %v5467_v7 = vld [vmem:[%s7807_s4 + $0x2] ss:$0 sm:$0xff] }
0x15ff   :  { %v4298_v13 = vpop.permute.xlu1 %4297 }
0x1600   :  { %v4300_v17 = vmul.f32 %v6494_v47, %v4298_v13 }
0x1602   :  { %4664 = vrot.lane.b32.xlu0 %v4117_v35, %s6712_s23  ;;  %4589 = vrot.lane.b32.xlu1 %v4300_v17, %s6712_s23 }
0x1670   :  { %v4492_v50 = vpop.permute.xlu0 %4491 }
0x1671   :  { %6229 = vmatmul.mubr.msk.f32.vlgmr.msra.gmra.mxu0 %vm151_vm3, %v4492_v50 }
0x1672   :  { %6243 = vmatpush3.msra.mxu0 %v7322_v62  ;;  %6250 = vmatprep.mubr.msk.f32.mxu0 %vm6718_vm0, %v6717_v0 }
0x1673   :  { %6244 = vmatprep.subr.mxu0 %v6717_v0 }
0x1674   :  { %6245 = vmatpush3.msra.mxu0 %v7327_v9  ;;  %v4590_v18 = vpop.permute.xlu1 %4589  ;;  %v4665_v62 = vpop.permute.xlu0 %4664 }
0x1675   :  { %6246 = vmatprep.subr.mxu0 %v6717_v0  ;;  %6240 = vmatmul.mubr.msk.f32.vlgmr.msra.gmra.mxu1 %vm151_vm3, %v4590_v18 }
0x1676   :  { %6247 = vmatpush3.msra.mxu0 %v7333_v10  ;;  %6254 = vmatpush3.msra.mxu1 %v7459_v31 }
0x1677   :  { %6248 = vmatprep.subr.mxu0 %v6717_v0  ;;  %6255 = vmatprep.subr.mxu1 %v6717_v0 }
0x1678   :  { %6249 = vmatpush3.msra.mxu0 %v7339_v12  ;;  %6256 = vmatpush3.msra.mxu1 %v7465_v38 }
0x1679   :  { %6251 = vmatmul.mubr.msk.f32.vlgmr.msra.gmra.mxu0 %vm151_vm3, %v4665_v62  ;;  %6257 = vmatprep.subr.mxu1 %v6717_v0 }
0x167a   :  { %6264 = vmatprep.subr.mxu0 %v6717_v0  ;;  %6258 = vmatpush3.msra.mxu1 %v7471_v40 }
0x167b   :  { %6265 = vmatpush3.msra.mxu0 %v7350_v34  ;;  %6259 = vmatprep.subr.mxu1 %v6717_v0 }
0x167c   :  { %6266 = vmatprep.subr.mxu0 %v6717_v0  ;;  %6260 = vmatpush3.msra.mxu1 %v7477_v41 }
0x167d   :  { %6261 = vmatprep.mubr.msk.f32.mxu1 %vm6718_vm0, %v6717_v0  ;;  %6267 = vmatpush3.msra.mxu0 %v7357_v37 }
0x167e   :  { %6262 = vmatmul.mubr.msk.f32.vlgmr.msra.gmra.mxu1 %vm151_vm3, %v4492_v50  ;;  %6268 = vmatprep.subr.mxu0 %v6717_v0 }
0x167f   :  { %6269 = vmatpush3.msra.mxu0 %v7363_v43  ;;  %6272 = vmatprep.mubr.msk.f32.mxu0 %vm6718_vm0, %v6717_v0 }
0x1680   :  { %6270 = vmatprep.subr.mxu0 %v6717_v0  ;;  %6275 = vmatprep.subr.mxu1 %v6717_v0 }
0x1681   :  { %6271 = vmatpush3.msra.mxu0 %v7370_v45  ;;  %6276 = vmatpush3.msra.mxu1 %v7423_v6 }
0x1682   :  { %6273 = vmatmul.mubr.msk.f32.vlgmr.msra.gmra.mxu0 %vm151_vm3, %v4590_v18  ;;  %6286 = vmatprep.subr.mxu0 %v6717_v0 }
0x1683   :  { %6277 = vmatprep.subr.mxu1 %v6717_v0  ;;  %6287 = vmatpush3.msra.mxu0 %v7459_v31 }
0x1684   :  { %6278 = vmatpush3.msra.mxu1 %v7425_v61  ;;  %6288 = vmatprep.subr.mxu0 %v6717_v0 }
0x1685   :  { %6279 = vmatprep.subr.mxu1 %v6717_v0  ;;  %6289 = vmatpush3.msra.mxu0 %v7465_v38 }
0x1686   :  { %6280 = vmatpush3.msra.mxu1 %v7429_v11  ;;  %6290 = vmatprep.subr.mxu0 %v6717_v0 }
0x1687   :  { %6281 = vmatprep.subr.mxu1 %v6717_v0  ;;  %6291 = vmatpush3.msra.mxu0 %v7471_v40 }
0x1688   :  { %6282 = vmatpush3.msra.mxu1 %v7433_v33  ;;  %6292 = vmatprep.subr.mxu0 %v6717_v0 }
0x1689   :  { %6283 = vmatprep.mubr.msk.f32.mxu1 %vm6718_vm0, %v6717_v0  ;;  %6293 = vmatpush3.msra.mxu0 %v7477_v41 }
0x168a   :  { %6294 = vmatprep.mubr.msk.f32.mxu0 %vm6718_vm0, %v6717_v0  ;;  %6297 = vmatprep.subr.mxu1 %v6717_v0 }
0x168b   :  { %6308 = vmatprep.subr.mxu0 %v6717_v0 }
0x1731   :  { %v7708_v9 = vpop.f32.mrf.mxu0 }
0x1733   :  { %v6230_v10 = vpop.f32.mrf.mxu0 }
0x1735   :  { %v4659_v12 = vpop.f32.mrf.mxu1 }
0x1737   :  { %v6241_v34 = vpop.f32.mrf.mxu1 }
0x1739   :  { %v4734_v37 = vpop.f32.mrf.mxu0 }
0x173a   :  { %v4735_v43 = vadd.f32 %v4734_v37, %v4659_v12 }
0x173b   :  { %v6252_v45 = vpop.f32.mrf.mxu0 }
0x173c   :  { %v4742_v6 = vadd.f32 %v7399_v53, %v4735_v43 }
0x173e   :  { %6501 = vtanh.f32 %v4742_v6  ;;  %v4842_v61 = vpop.f32.mrf.mxu1  ;;  %v5458_v59 = vmul.f32 -1.442695, %v4742_v6 }
0x1740   :  { %v6263_v11 = vpop.f32.mrf.mxu1 }
0x1741   :  { %v5378_v11 = vld [vmem:[%s7811_s8] ss:$0 sm:$0xff] }
0x1742   :  { %v4912_v33 = vpop.f32.mrf.mxu0 }
0x1743   :  { %v4913_v31 = vadd.f32 %v4912_v33, %v4842_v61  ;;  %v1312_v33 = vadd.f32 %v5378_v11, %v7152_v2 }
0x1744   :  { %v6274_v38 = vpop.f32.mrf.mxu0 }
0x1745   :  { %v4920_v40 = vadd.f32 %v7393_v28, %v4913_v31  ;;  %v1316_v31 = vsel %vm1315_vm4, %v1312_v33, -inf  ;;  %v5231_v38 = vld [vmem:[#allocation11 + $0x18] sm:$0xff] }
0x1747   :  { %6503 = vtanh.f32 %v4920_v40  ;;  %v5462_v1 = vmul.f32 -1.442695, %v4920_v40  ;;  %v5230_v40 = vld [vmem:[#allocation11 + $0x10] sm:$0xff] }
0x1748   :  { %6505 = vpow2.f32 %v5458_v59 }
0x1749   :  { %6507 = vpow2.f32 %v5462_v1 }
0x174b   :  { %v6502_v41 = vpop.eup %6501 }
0x174c   :  { %4752 = vrot.lane.b32.xlu0 %v6502_v41, %s6719_s20  ;;  %v5229_v41 = vld [vmem:[#allocation11 + $0x8] sm:$0xff] }
0x1754   :  { %v6504_v20 = vpop.eup %6503 }
0x1755   :  { %4930 = vrot.lane.b32.xlu1 %v6504_v20, %s6719_s20  ;;  %v6506_v53 = vpop.eup %6505  ;;  %v5228_v20 = vld [vmem:[#allocation11] sm:$0xff] }
0x1756   :  { %v4746_v21 = vadd.f32 1.0, %v6506_v53  ;;  %v6508_v23 = vpop.eup %6507 }
0x1757   :  { %v4924_v24 = vadd.f32 1.0, %v6508_v23 }
0x1758   :  { %6509 = vrcp.f32 %v4746_v21 }
0x1759   :  { %6511 = vrcp.f32 %v4924_v24  ;;  %v1962_v24 = vadd.f32 %v5378_v11, %v7246_v32 }
0x1765   :  { %v6510_v22 = vpop.eup %6509 }
0x1766   :  { %v6512_v39 = vpop.eup %6511  ;;  %v4750_v46 = vmul.f32 %v6510_v22, %v7645_v19 }
0x1767   :  { %v4928_v57 = vmul.f32 %v6512_v39, %v7641_v36  ;;  %v5046_v36 = vld [vmem:[#allocation7 + $0x28] sm:$0xff] }
0x17be   :  { %v4753_v51 = vpop.permute.xlu0 %4752 }
0x17bf   :  { %v4755_v28 = vmul.f32 %v6510_v22, %v4753_v51  ;;  %v2612_v51 = vadd.f32 %v5378_v11, %v7387_v16 }
0x17c1   :  { %4757 = vrot.lane.b32.xlu0 %v4755_v28, %s6712_s23  ;;  %v1965_v28 = vsel %vm1315_vm4, %v1962_v24, -inf }
0x17c7   :  { %v4931_v25 = vpop.permute.xlu1 %4930 }
0x17c8   :  { %v4933_v26 = vmul.f32 %v6512_v39, %v4931_v25  ;;  %v2615_v25 = vsel %vm1315_vm4, %v2612_v51, -inf }
0x17ca   :  { %4935 = vrot.lane.b32.xlu1 %v4933_v26, %s6712_s23 }
0x1833   :  { %v4758_v48 = vpop.permute.xlu0 %4757 }
0x1834   :  { %v4760_v49 = vadd.f32 %v4758_v48, %v4750_v46 }
0x1836   :  { %6513 = vtanh.f32 %v4760_v49 }
0x183c   :  { %v4936_v52 = vpop.permute.xlu1 %4935 }
0x183d   :  { %v4938_v42 = vadd.f32 %v4936_v52, %v4928_v57 }
0x183f   :  { %6515 = vtanh.f32 %v4938_v42 }
0x1843   :  { %v6514_v47 = vpop.eup %6513 }
0x1844   :  { %4763 = vrot.lane.b32.xlu0 %v6514_v47, %s6719_s20 }
0x184c   :  { %v6516_v54 = vpop.eup %6515 }
0x184d   :  { %4941 = vrot.lane.b32.xlu1 %v6516_v54, %s6719_s20 }
0x18b6   :  { %v4764_v55 = vpop.permute.xlu0 %4763 }
0x18b7   :  { %v4766_v56 = vmul.f32 %v6510_v22, %v4764_v55 }
0x18b9   :  { %5125 = vrot.lane.b32.xlu0 %v4766_v56, %s6712_s23 }
0x18bf   :  { %v4942_v63 = vpop.permute.xlu1 %4941 }
0x18c0   :  { %v4944_v29 = vmul.f32 %v6512_v39, %v4942_v63 }
0x18c2   :  { %4957 = vrot.lane.b32.xlu1 %v4944_v29, %s6712_s23 }
0x192b   :  { %v5126_v44 = vpop.permute.xlu0 %5125 }
0x1934   :  { %v4958_v4 = vpop.permute.xlu1 %4957 }
0x1935   :  { %6284 = vmatmul.mubr.msk.f32.vlgmr.msra.gmra.mxu1 %vm151_vm3, %v4958_v4  ;;  %6295 = vmatmul.mubr.msk.f32.vlgmr.msra.gmra.mxu0 %vm151_vm3, %v4958_v4 }
0x1936   :  { %6298 = vmatpush3.msra.mxu1 %v5048_v30  ;;  %6305 = vmatprep.mubr.msk.f32.mxu1 %vm6718_vm0, %v6717_v0 }
0x1937   :  { %6299 = vmatprep.subr.mxu1 %v6717_v0  ;;  %6316 = vmatprep.mubr.msk.f32.mxu0 %vm6718_vm0, %v6717_v0 }
0x1938   :  { %6300 = vmatpush3.msra.mxu1 %v5047_v27  ;;  %6309 = vmatpush3.msra.mxu0 %v5231_v38 }
0x1939   :  { %6301 = vmatprep.subr.mxu1 %v6717_v0  ;;  %6310 = vmatprep.subr.mxu0 %v6717_v0 }
0x193a   :  { %6302 = vmatpush3.msra.mxu1 %v5046_v36  ;;  %6311 = vmatpush3.msra.mxu0 %v5230_v40 }
0x193b   :  { %6303 = vmatprep.subr.mxu1 %v6717_v0  ;;  %6312 = vmatprep.subr.mxu0 %v6717_v0 }
0x193c   :  { %6304 = vmatpush3.msra.mxu1 %v5045_v3  ;;  %6313 = vmatpush3.msra.mxu0 %v5229_v41 }
0x193d   :  { %6306 = vmatmul.mubr.msk.f32.vlgmr.msra.gmra.mxu1 %vm151_vm3, %v5126_v44  ;;  %6314 = vmatprep.subr.mxu0 %v6717_v0  ;;  %v5423_v0 = vld [vmem:[%s7811_s8] ss:$0 sm:$0xff] }
0x193e   :  { %6315 = vmatpush3.msra.mxu0 %v5228_v20  ;;  %v3262_v39 = vadd.f32 %v5423_v0, %v7523_v58  ;;  %v3912_v26 = vadd.f32 %v5423_v0, %v7625_v60 }
0x1940   :  { %v3265_v32 = vsel %vm1315_vm4, %v3262_v39, -inf  ;;  %v3915_v16 = vsel %vm1315_vm4, %v3912_v26, -inf }
0x19f5   :  { %v7732_v19 = vpop.f32.mrf.mxu1  ;;  %v5120_v14 = vpop.f32.mrf.mxu0 }
0x19f6   :  { %v5028_v46 = vadd.f32 %v5423_v0, %v7732_v19 }
0x19f7   :  { %v6285_v5 = vpop.f32.mrf.mxu1  ;;  %v6296_v15 = vpop.f32.mrf.mxu0 }
0x19f8   :  { %v5031_v48 = vsel %vm1315_vm4, %v5028_v46, -inf }
0x19fd   :  { %v5195_v8 = vpop.f32.mrf.mxu1 }
0x19fe   :  { %v5196_v13 = vadd.f32 %v5195_v8, %v5120_v14 }
0x19ff   :  { %v6307_v35 = vpop.f32.mrf.mxu1 }
0x1a00   :  { %v5203_v17 = vadd.f32 %v5467_v7, %v5196_v13  ;;  %v4562_v35 = vadd.f32 %v5423_v0, %v7708_v9 }
0x1a02   :  { %6517 = vtanh.f32 %v5203_v17  ;;  %v5468_v18 = vmul.f32 -1.442695, %v5203_v17 }
0x1a04   :  { %6519 = vpow2.f32 %v5468_v18  ;;  %v4565_v18 = vsel %vm1315_vm4, %v4562_v35, -inf }
0x1a0f   :  { %v6518_v50 = vpop.eup %6517 }
0x1a10   :  { %5213 = vrot.lane.b32.xlu1 %v6518_v50, %s6719_s20 }
0x1a11   :  { %v6520_v62 = vpop.eup %6519 }
0x1a12   :  { %v5207_v10 = vadd.f32 1.0, %v6520_v62 }
0x1a14   :  { %6521 = vrcp.f32 %v5207_v10 }
0x1a21   :  { %v6522_v12 = vpop.eup %6521 }
0x1a22   :  { %v5211_v43 = vmul.f32 %v6522_v12, %v4938_v42 }
0x1a82   :  { %v5214_v34 = vpop.permute.xlu1 %5213 }
0x1a83   :  { %v5216_v37 = vmul.f32 %v6522_v12, %v5214_v34  ;;  %v5469_v34 = vld [vmem:[%s7811_s8] ss:$0 sm:$0xff]  ;;  %s6720_s8 = smov [#allocation13]  }
0x1a84   :  { %s5333_s12 = sshll.u32 %s6720_s8, 4  ;;  %s5334_s12 = int_to_ptr.vmem [resolvable:$true] %s5333_s12 }
0x1a85   :  { %5218 = vrot.lane.b32.xlu0 %v5216_v37, %s6712_s23  ;;  %s6677_s13 = scalar_lea.vmem %s5334_s12, 256  ;;  %p6682_p3 = scmp.lt.s32.totalorder %s5334_s12, %s5334_s12 }
0x1a86   :  { %p6678_p2 = scmp.ne.s32.totalorder %s5334_s12, %s6677_s13  ;;  %p6683_p4 = scmp.lt.s32.totalorder %s6677_s13, %s6677_s13 }
0x1a88   :  { %p6684_p5 = por %p6683_p4, %p6682_p3 }
0x1a8a   :  { %p6685_p6 = pnand %p6684_p5, %p6678_p2 }
0x1af7   :  { %v5219_v45 = vpop.permute.xlu0 %5218 }
0x1af8   :  { %v5221_v6 = vadd.f32 %v5219_v45, %v5211_v43 }
0x1afa   :  { %6523 = vtanh.f32 %v5221_v6 }
0x1b07   :  { %v6524_v61 = vpop.eup %6523 }
0x1b08   :  { %5224 = vrot.lane.b32.xlu1 %v6524_v61, %s6719_s20 }
0x1b2c   :  { %1317 = vmax.xlane.f32.xlu1 %v1316_v31 }
0x1b7a   :  { %v5225_v59 = vpop.permute.xlu1 %5224 }
0x1b7b   :  { %v5227_v2 = vmul.f32 %v6522_v12, %v5225_v59 }
0x1b7d   :  { %5240 = vrot.lane.b32.xlu0 %v5227_v2, %s6712_s23 }
0x1bb5   :  { %v1318_v1 = vpop.xlane.xlu1 %1317 }
0x1bb6   :  { %v1319_v53 = vsub.f32 %v1312_v33, %v1318_v1 }
0x1bb8   :  { %v1320_v21 = vmul.f32 1.442695, %v1319_v53 }
0x1bba   :  { %6525 = vpow2.f32 %v1320_v21 }
0x1bc7   :  { %v6526_v23 = vpop.eup %6525 }
0x1bc8   :  { %v1322_v22 = vsel %vm1315_vm4, %v6526_v23, 0.0 }
0x1bc9   :  { %1323 = vadd.xlane.f32.xlu0 %v1322_v22 }
0x1bcd   :  { %1966 = vmax.xlane.f32.xlu0 %v1965_v28 }
0x1bd1   :  { %2616 = vmax.xlane.f32.xlu0 %v2615_v25 }
0x1bd5   :  { %3266 = vmax.xlane.f32.xlu0 %v3265_v32 }
0x1bd9   :  { %3916 = vmax.xlane.f32.xlu0 %v3915_v16 }
0x1bdd   :  { %5032 = vmax.xlane.f32.xlu0 %v5031_v48 }
0x1bef   :  { %v5241_v49 = vpop.permute.xlu0 %5240 }
0x1bf0   :  { %6317 = vmatmul.mubr.msk.f32.vlgmr.msra.gmra.mxu0 %vm151_vm3, %v5241_v49 }
0x1c52   :  { %v1324_v58 = vpop.xlane.xlu0 %1323 }
0x1c53   :  { %6527 = vlog2.f32 %v1324_v58 }
0x1c56   :  { %v1967_v57 = vpop.xlane.xlu0 %1966 }
0x1c57   :  { %v7764_v52 = vsub.f32 %v1962_v24, %v1967_v57 }
0x1c59   :  { %v1969_v60 = vmul.f32 1.442695, %v7764_v52 }
0x1c5a   :  { %v2617_v42 = vpop.xlane.xlu0 %2616 }
0x1c5b   :  { %6529 = vpow2.f32 %v1969_v60  ;;  %v7767_v47 = vsub.f32 %v2612_v51, %v2617_v42 }
0x1c5d   :  { %v2619_v54 = vmul.f32 1.442695, %v7767_v47 }
0x1c5e   :  { %v3267_v55 = vpop.xlane.xlu0 %3266 }
0x1c5f   :  { %6531 = vpow2.f32 %v2619_v54  ;;  %v7770_v56 = vsub.f32 %v3262_v39, %v3267_v55 }
0x1c60   :  { %v6528_v63 = vpop.eup %6527 }
0x1c61   :  { %v1326_v29 = vmul.f32 0.6931472, %v6528_v63  ;;  %v3269_v30 = vmul.f32 1.442695, %v7770_v56 }
0x1c62   :  { %v3917_v4 = vpop.xlane.xlu0 %3916 }
0x1c63   :  { %v1327_v27 = vsub.f32 %v1319_v53, %v1326_v29  ;;  %6533 = vpow2.f32 %v3269_v30  ;;  %v7773_v36 = vsub.f32 %v3912_v26, %v3917_v4 }
0x1c65   :  { %1328 = vst [vmem:[#allocation13] sm:$0x3] %v1327_v27  ;;  %v3919_v3 = vmul.f32 1.442695, %v7773_v36 }
0x1c66   :  { %v5033_v44 = vpop.xlane.xlu0 %5032 }
0x1c67   :  { %6535 = vpow2.f32 %v3919_v3  ;;  %v7776_v19 = vsub.f32 %v5028_v46, %v5033_v44 }
0x1c68   :  { %v6530_v14 = vpop.eup %6529 }
0x1c69   :  { %v5035_v5 = vmul.f32 1.442695, %v7776_v19  ;;  %v1971_v15 = vsel %vm1315_vm4, %v6530_v14, 0.0 }
0x1c6a   :  { %1972 = vadd.xlane.f32.xlu1 %v1971_v15 }
0x1c6b   :  { %6537 = vpow2.f32 %v5035_v5 }
0x1c6c   :  { %v6532_v7 = vpop.eup %6531 }
0x1c6d   :  { %v2621_v8 = vsel %vm1315_vm4, %v6532_v7, 0.0 }
0x1c6e   :  { %2622 = vadd.xlane.f32.xlu1 %v2621_v8 }
0x1c70   :  { %v6534_v13 = vpop.eup %6533 }
0x1c71   :  { %v3271_v17 = vsel %vm1315_vm4, %v6534_v13, 0.0 }
0x1c72   :  { %3272 = vadd.xlane.f32.xlu1 %v3271_v17 }
0x1c74   :  { %v6536_v50 = vpop.eup %6535 }
0x1c75   :  { %v3921_v62 = vsel %vm1315_vm4, %v6536_v50, 0.0 }
0x1c76   :  { %4566 = vmax.xlane.f32.xlu1 %v4565_v18  ;;  %3922 = vadd.xlane.f32.xlu0 %v3921_v62 }
0x1c78   :  { %v6538_v10 = vpop.eup %6537 }
0x1c79   :  { %v5037_v12 = vsel %vm1315_vm4, %v6538_v10, 0.0 }
0x1c7a   :  { %5038 = vadd.xlane.f32.xlu0 %v5037_v12 }
0x1cb0   :  { %v5310_v37 = vpop.f32.mrf.mxu0 }
0x1cb1   :  { %v5311_v9 = vadd.f32 %v5469_v34, %v5310_v37 }
0x1cb2   :  { %v6318_v43 = vpop.f32.mrf.mxu0 }
0x1cb3   :  { %v5314_v45 = vsel %vm1315_vm4, %v5311_v9, -inf }
0x1cb4   :  { %5315 = vmax.xlane.f32.xlu1 %v5314_v45 }
0x1cf3   :  { %v1973_v6 = vpop.xlane.xlu1 %1972 }
0x1cf4   :  { %6539 = vlog2.f32 %v1973_v6 }
0x1cf7   :  { %v2623_v61 = vpop.xlane.xlu1 %2622 }
0x1cf8   :  { %6541 = vlog2.f32 %v2623_v61 }
0x1cfb   :  { %v3273_v11 = vpop.xlane.xlu1 %3272 }
0x1cfc   :  { %6543 = vlog2.f32 %v3273_v11 }
0x1cff   :  { %v4567_v33 = vpop.xlane.xlu1 %4566  ;;  %v3923_v31 = vpop.xlane.xlu0 %3922 }
0x1d00   :  { %v4568_v38 = vsub.f32 %v4562_v35, %v4567_v33  ;;  %6545 = vlog2.f32 %v3923_v31 }
0x1d01   :  { %v6540_v40 = vpop.eup %6539 }
0x1d02   :  { %v1975_v41 = vmul.f32 0.6931472, %v6540_v40  ;;  %v4569_v20 = vmul.f32 1.442695, %v4568_v38 }
0x1d03   :  { %v5039_v59 = vpop.xlane.xlu0 %5038 }
0x1d04   :  { %v1976_v2 = vsub.f32 %v7764_v52, %v1975_v41  ;;  %6547 = vpow2.f32 %v4569_v20 }
0x1d05   :  { %v6542_v1 = vpop.eup %6541  ;;  %6549 = vlog2.f32 %v5039_v59 }
0x1d06   :  { %1978 = vst [vmem:[#allocation13 + $0x2] sm:$0x3] %v1976_v2  ;;  %v2625_v53 = vmul.f32 0.6931472, %v6542_v1 }
0x1d08   :  { %v2626_v21 = vsub.f32 %v7767_v47, %v2625_v53 }
0x1d09   :  { %v6544_v23 = vpop.eup %6543 }
0x1d0a   :  { %2628 = vst [vmem:[#allocation13 + $0x4] sm:$0x3] %v2626_v21  ;;  %v3275_v24 = vmul.f32 0.6931472, %v6544_v23 }
0x1d0c   :  { %v3276_v22 = vsub.f32 %v7770_v56, %v3275_v24 }
0x1d0d   :  { %v6546_v51 = vpop.eup %6545 }
0x1d0e   :  { %3278 = vst [vmem:[#allocation13 + $0x6] sm:$0x3] %v3276_v22  ;;  %v3925_v28 = vmul.f32 0.6931472, %v6546_v51 }
0x1d10   :  { %v3926_v0 = vsub.f32 %v7773_v36, %v3925_v28 }
0x1d11   :  { %v6548_v39 = vpop.eup %6547 }
0x1d12   :  { %v6550_v25 = vpop.eup %6549  ;;  %3928 = vst [vmem:[#allocation13 + $0x8] sm:$0x3] %v3926_v0  ;;  %v4571_v26 = vsel %vm1315_vm4, %v6548_v39, 0.0 }
0x1d13   :  { %v5041_v32 = vmul.f32 0.6931472, %v6550_v25  ;;  %4572 = vadd.xlane.f32.xlu1 %v4571_v26 }
0x1d15   :  { %v5042_v46 = vsub.f32 %v7776_v19, %v5041_v32 }
0x1d17   :  { %5044 = vst [vmem:[#allocation13 + $0xc] sm:$0x3] %v5042_v46 }
0x1d3d   :  { %v5316_v16 = vpop.xlane.xlu1 %5315 }
0x1d3e   :  { %v5317_v48 = vsub.f32 %v5311_v9, %v5316_v16 }
0x1d40   :  { %v5318_v49 = vmul.f32 1.442695, %v5317_v48 }
0x1d42   :  { %6551 = vpow2.f32 %v5318_v49 }
0x1d4f   :  { %v6552_v58 = vpop.eup %6551 }
0x1d50   :  { %v5320_v57 = vsel %vm1315_vm4, %v6552_v58, 0.0 }
0x1d51   :  { %5321 = vadd.xlane.f32.xlu1 %v5320_v57 }
0x1d9c   :  { %v4573_v52 = vpop.xlane.xlu1 %4572 }
0x1d9d   :  { %6553 = vlog2.f32 %v4573_v52 }
0x1daa   :  { %v6554_v60 = vpop.eup %6553 }
0x1dab   :  { %v4575_v42 = vmul.f32 0.6931472, %v6554_v60 }
0x1dad   :  { %v4576_v47 = vsub.f32 %v4568_v38, %v4575_v42 }
0x1daf   :  { %4578 = vst [vmem:[#allocation13 + $0xa] sm:$0x3] %v4576_v47 }
0x1dda   :  { %v5322_v54 = vpop.xlane.xlu1 %5321 }
0x1ddb   :  { %6555 = vlog2.f32 %v5322_v54 }
0x1de8   :  { %v6556_v55 = vpop.eup %6555 }
0x1de9   :  { %v5324_v56 = vmul.f32 0.6931472, %v6556_v55 }
0x1deb   :  { %v5325_v63 = vsub.f32 %v5317_v48, %v5324_v56 }
0x1ded   :  { %5327 = vst [vmem:[#allocation13 + $0xe] sm:$0x3] %v5325_v63 }
0x1dee   :  { %6688 = shalt.err (!%p6685_p6)
}
0x1def   :  { %5339 = dma.vmem_to_hbm [thread:$0]  %s5334_s12, 256, %s7812_s9, [#allocation4], %s6712_s23, %s6712_s23, %s6713_s24  }
0x1df0   :  { %6705 = dma.done.wait [#allocation4], 256  }
0x1df1   :  { %6706 = vsyncadd [#allocation4], 4294967040 }
0x1df2   :  { %5343 = vsyncpa [#allocation3], 1 }
0x1df3   :  { %5344 = vsyncpa [#allocation6], 1 }
0x1df4   :  { %5345 = vsyncpa [#allocation9], 1 }
0x1df5   :  { %5346 = vsyncpa [#allocation12], 1 }
0x1df6   :  { %5347 = vsyncpa [#allocation4], 1 }

</bundles_post_ra>
